<compile_context>
chip_gen: v5e
topology: v5e:2x2
jax: 0.10.0
libtpu: 0.0.40
codegen_flags: <defaults>
</compile_context>

<pallas_src>
import numpy as np
import jax
import jax.numpy as jnp
from jax.experimental import pallas as pl
from jax.experimental.pallas import tpu as pltpu  # noqa: F401  (kept for parity / future tiling)

HIDDEN = 128
NUM_CLASS = 2
NUM_RES_BLOCKS = 3          # layer_dim_list=[128,128,128,128,2] -> three 128->128 blocks + one 128->2 block
BN_EPS = 1e-5


# ------------------------------ fused kernel ------------------------------- #
def fused_forward_kernel(x_ref,        # (T*B, D)  time-major, flattened
                         wih_ref,      # (D, 4H)
                         whh_ref,      # (H, 4H)
                         b_ref,        # (1, 4H)   b_ih + b_hh
                         blk_bn_ref,   # (nb, 3, 4, H)  [bn1_s, bn1_b, bn2_s, bn2_b]
                         blk_w1_ref,   # (nb, 3, H, H)
                         blk_w2_ref,   # (nb, 3, H, H)
                         fin_bn1_ref,  # (nb, 2, H)     [bn1_s, bn1_b]
                         fin_w_ref,    # (nb, H, 2*NC)  [fc1 | downsample*bnd_scale]
                         fin_tail_ref, # (nb, 3+NC, NC) [bn2_s, bn2_b, bnd_b, fc2 row 0, fc2 row 1]
                         out_ref):     # (B, nb*NC)
    B = out_ref.shape[0]
    TB, _ = x_ref.shape
    T = TB // B
    H = whh_ref.shape[0]
    nb = blk_w1_ref.shape[0]
    nblocks = blk_w1_ref.shape[1]
    NC = fin_tail_ref.shape[-1]

    # ---------------- LSTM ----------------
    # Input projection for ALL timesteps in one MXU matmul, bias added once (hoisted).
    wih = wih_ref[...]
    whh = whh_ref[...]
    xg = jnp.dot(x_ref[...], wih, preferred_element_type=jnp.float32) + b_ref[...]   # (T*B, 4H)

    h = jnp.zeros((B, H), jnp.float32)
    c = jnp.zeros((B, H), jnp.float32)
    # Fully unrolled recurrence: only h @ W_hh stays on the serial critical path.
    for t in range(T):
        g = jnp.dot(h, whh, preferred_element_type=jnp.float32) + xg[t * B:(t + 1) * B, :]
        i = jax.nn.sigmoid(g[:, 0:H])
        f = jax.nn.sigmoid(g[:, H:2 * H])
        gg = jnp.tanh(g[:, 2 * H:3 * H])
        o = jax.nn.sigmoid(g[:, 3 * H:4 * H])
        c = f * c + i * gg
        h = o * jnp.tanh(c)

    # shared_layers is an empty nn.Sequential -> identity; shared_features == h.

    # ---------------- output heads, batched over the head dim ----------------
    hh = jnp.broadcast_to(h[None], (nb, B, H))                                        # (nb, B, H)
    for k in range(nblocks):
        bn = blk_bn_ref[:, k]                                                         # (nb, 4, H)
        y = jnp.maximum(hh * bn[:, 0:1, :] + bn[:, 1:2, :], 0.0)                      # BN1 + ReLU
        y = jnp.einsum('nbh,nhk->nbk', y, blk_w1_ref[:, k],
                       preferred_element_type=jnp.float32)
        y = jnp.maximum(y * bn[:, 2:3, :] + bn[:, 3:4, :], 0.0)                       # BN2 + ReLU
        y = jnp.einsum('nbh,nhk->nbk', y, blk_w2_ref[:, k],
                       preferred_element_type=jnp.float32)
        hh = jnp.maximum(y + hh, 0.0)                                                 # residual + inter-block ReLU

    # Final VectorResBlock(128 -> 2) with downsample branch, no trailing ReLU.
    fbn1 = fin_bn1_ref[...]                                                           # (nb, 2, H)
    y = jnp.maximum(hh * fbn1[:, 0:1, :] + fbn1[:, 1:2, :], 0.0)                      # BN1 + ReLU
    # One stacked matmul produces both fc1(y) and downsample(hh) (bnd scale pre-folded).
    stacked = jnp.concatenate([y, hh], axis=1)                                        # (nb, 2B, H)
    res = jnp.einsum('nbh,nhc->nbc', stacked, fin_w_ref[...],
                     preferred_element_type=jnp.float32)                              # (nb, 2B, 2*NC)
    yw = res[:, :B, :NC]                                                              # y  @ fc1
    ident = res[:, B:, NC:]                                                           # hh @ (wd * bnd_scale)

    tail = fin_tail_ref[...]                                                          # (nb, 3+NC, NC)
    yr = jnp.maximum(yw * tail[:, 0:1, :] + tail[:, 1:2, :], 0.0)                     # BN2 + ReLU
    out = ident + tail[:, 2:3, :]                                                     # + bnd shift
    for j in range(NC):                                                               # (NC x NC) fc2 on the VPU
        out = out + yr[:, :, j:j + 1] * tail[:, 3 + j:4 + j, :]

    # Single contiguous store: head n occupies columns [n*NC, (n+1)*NC).
    out_ref[...] = jnp.concatenate([out[n] for n in range(nb)], axis=1)               # (B, nb*NC)


# ------------------------------- parameters -------------------------------- #
def init_params(key, feature_dim, num_bs, hidden=HIDDEN, num_class=NUM_CLASS):
    counter = [0]

    def nk():
        counter[0] += 1
        return jax.random.fold_in(key, counter[0])

    def nrm(shape, scale=0.1):
        return scale * jax.random.normal(nk(), shape, dtype=jnp.float32)

    def bn_fold(shape):
        gamma = 1.0 + 0.1 * jax.random.normal(nk(), shape, jnp.float32)
        beta = 0.1 * jax.random.normal(nk(), shape, jnp.float32)
        mean = 0.1 * jax.random.normal(nk(), shape, jnp.float32)
        var = jax.random.uniform(nk(), shape, jnp.float32, minval=0.5, maxval=1.5)
        scale = gamma / jnp.sqrt(var + BN_EPS)
        shift = beta - mean * scale
        return scale, shift

    p = {
        # PyTorch LSTM weights are (4H, in); stored pre-transposed as (in, 4H).
        "w_ih": nrm((feature_dim, 4 * hidden)),
        "w_hh": nrm((hidden, 4 * hidden)),
        "b": nrm((1, 4 * hidden)),                  # b_ih + b_hh combined
        "blk_w1": nrm((num_bs, NUM_RES_BLOCKS, hidden, hidden)),
        "blk_w2": nrm((num_bs, NUM_RES_BLOCKS, hidden, hidden)),
        "fin_w1": nrm((num_bs, hidden, num_class)),
        "fin_w2": nrm((num_bs, num_class, num_class)),
        "fin_wd": nrm((num_bs, hidden, num_class)),
    }
    p["blk_bn1_s"], p["blk_bn1_b"] = bn_fold((num_bs, NUM_RES_BLOCKS, hidden))
    p["blk_bn2_s"], p["blk_bn2_b"] = bn_fold((num_bs, NUM_RES_BLOCKS, hidden))
    p["fin_bn1_s"], p["fin_bn1_b"] = bn_fold((num_bs, hidden))
    p["fin_bn2_s"], p["fin_bn2_b"] = bn_fold((num_bs, num_class))
    p["fin_bnd_s"], p["fin_bnd_b"] = bn_fold((num_bs, num_class))
    return p


def pack_params(p):
    """Pack natural per-head params into the few tensors the fused kernel consumes."""
    num_class = p["fin_w1"].shape[-1]
    blk_bn = jnp.stack([p["blk_bn1_s"], p["blk_bn1_b"],
                        p["blk_bn2_s"], p["blk_bn2_b"]], axis=2)          # (nb, 3, 4, H)
    fin_bn1 = jnp.stack([p["fin_bn1_s"], p["fin_bn1_b"]], axis=1)         # (nb, 2, H)
    wd_folded = p["fin_wd"] * p["fin_bnd_s"][:, None, :]                  # fold BN scale into downsample
    fin_w = jnp.concatenate([p["fin_w1"], wd_folded], axis=2)             # (nb, H, 2*NC)
    fin_tail = jnp.stack([p["fin_bn2_s"], p["fin_bn2_b"], p["fin_bnd_b"]]
                         + [p["fin_w2"][:, j, :] for j in range(num_class)], axis=1)  # (nb, 3+NC, NC)
    return {
        "w_ih": p["w_ih"], "w_hh": p["w_hh"], "b": p["b"],
        "blk_bn": blk_bn, "blk_w1": p["blk_w1"], "blk_w2": p["blk_w2"],
        "fin_bn1": fin_bn1, "fin_w": fin_w, "fin_tail": fin_tail,
    }


# --------------------------------- wrapper --------------------------------- #
def block_prediction_lstm_forward(x, packed):
    """x: (B, T, D) batch-first (PyTorch batch_first=True). Returns (B, num_bs, num_class)."""
    # TODO(synk): packed-sequence (lengths is not None) path is not implemented.
    B, T, D = x.shape
    nb = packed["blk_w1"].shape[0]
    nc = packed["fin_tail"].shape[-1]
    # Time-major + flattened so the kernel does the input projection as ONE matmul.
    x2d = jnp.transpose(x, (1, 0, 2)).reshape(T * B, D)

    out_flat = pl.pallas_call(
        fused_forward_kernel,
        out_shape=jax.ShapeDtypeStruct((B, nb * nc), jnp.float32),
    )(x2d, packed["w_ih"], packed["w_hh"], packed["b"],
      packed["blk_bn"], packed["blk_w1"], packed["blk_w2"],
      packed["fin_bn1"], packed["fin_w"], packed["fin_tail"])

    return out_flat.reshape(B, nb, nc)                                    # matches torch.stack(outputs, dim=-2)


# ----------------------------- pure-JAX reference --------------------------- #
def reference_forward(x, p):
    B, T, D = x.shape
    H = HIDDEN
    h = jnp.zeros((B, H), jnp.float32)
    c = jnp.zeros((B, H), jnp.float32)
    for t in range(T):
        g = jnp.dot(x[:, t], p["w_ih"]) + jnp.dot(h, p["w_hh"]) + p["b"]
        i = jax.nn.sigmoid(g[:, :H]); f = jax.nn.sigmoid(g[:, H:2 * H])
        gg = jnp.tanh(g[:, 2 * H:3 * H]); o = jax.nn.sigmoid(g[:, 3 * H:])
        c = f * c + i * gg
        h = o * jnp.tanh(c)
    feats = h
    outs = []
    nb = p["blk_w1"].shape[0]
    for n in range(nb):
        hh = feats
        for k in range(NUM_RES_BLOCKS):
            y = jnp.maximum(hh * p["blk_bn1_s"][n, k] + p["blk_bn1_b"][n, k], 0.0)
            y = jnp.dot(y, p["blk_w1"][n, k])
            y = jnp.maximum(y * p["blk_bn2_s"][n, k] + p["blk_bn2_b"][n, k], 0.0)
            y = jnp.dot(y, p["blk_w2"][n, k])
            hh = jnp.maximum(y + hh, 0.0)
        y = jnp.maximum(hh * p["fin_bn1_s"][n] + p["fin_bn1_b"][n], 0.0)
        y = jnp.dot(y, p["fin_w1"][n])
        y = jnp.maximum(y * p["fin_bn2_s"][n] + p["fin_bn2_b"][n], 0.0)
        y = jnp.dot(y, p["fin_w2"][n])
        ident = jnp.dot(hh, p["fin_wd"][n])
        ident = ident * p["fin_bnd_s"][n] + p["fin_bnd_b"][n]
        outs.append(y + ident)
    return jnp.stack(outs, axis=-2)                                       # (B, num_bs, num_class)


# ----------------------------------- main ----------------------------------- #
if __name__ == "__main__":
    key = jax.random.PRNGKey(0)
    B, T, D, NB = 4, 8, 16, 3        # batch, seq, feature_input_dim, num_bs
    kx, kp = jax.random.split(key)
    x = jax.random.normal(kx, (B, T, D), dtype=jnp.float32)
    params = init_params(kp, D, NB)
    packed = pack_params(params)

    out = jax.block_until_ready(block_prediction_lstm_forward(x, packed))
    assert out.shape == (B, NB, NUM_CLASS)

    ref = jax.block_until_ready(reference_forward(x, params))
    np.testing.assert_allclose(np.asarray(out), np.asarray(ref), rtol=2e-2, atol=2e-2)

    print("KERNEL_OK")
</pallas_src>

<mosaic_0001>
module attributes {stable_mosaic.version = 11 : i64} {
  func.func @fused_forward_kernel(%arg0: memref<32x16xf32, #tpu.memory_space<vmem>>, %arg1: memref<16x512xf32, #tpu.memory_space<vmem>>, %arg2: memref<128x512xf32, #tpu.memory_space<vmem>>, %arg3: memref<1x512xf32, #tpu.memory_space<vmem>>, %arg4: memref<3x3x4x128xf32, #tpu.memory_space<vmem>>, %arg5: memref<3x3x128x128xf32, #tpu.memory_space<vmem>>, %arg6: memref<3x3x128x128xf32, #tpu.memory_space<vmem>>, %arg7: memref<3x2x128xf32, #tpu.memory_space<vmem>>, %arg8: memref<3x128x4xf32, #tpu.memory_space<vmem>>, %arg9: memref<3x5x2xf32, #tpu.memory_space<vmem>>, %arg10: memref<4x6xf32, #tpu.memory_space<vmem>>) attributes {dimension_semantics = [], scalar_prefetch = 0 : i64, scratch_operands = 0 : i64, tpu.core_type = #tpu.core_type<tc>} {
    %c0 = arith.constant 0 : index
    %c0_0 = arith.constant 0 : index
    %0 = vector.load %arg1[%c0, %c0_0] : memref<16x512xf32, #tpu.memory_space<vmem>>, vector<16x512xf32>
    %c0_1 = arith.constant 0 : index
    %c0_2 = arith.constant 0 : index
    %1 = vector.load %arg2[%c0_1, %c0_2] : memref<128x512xf32, #tpu.memory_space<vmem>>, vector<128x512xf32>
    %c0_3 = arith.constant 0 : index
    %c0_4 = arith.constant 0 : index
    %2 = vector.load %arg0[%c0_3, %c0_4] : memref<32x16xf32, #tpu.memory_space<vmem>>, vector<32x16xf32>
    %cst = arith.constant dense<0.000000e+00> : vector<32x512xf32>
    %3 = tpu.matmul %2, %0, %cst {dimension_numbers = #tpu.dot_dimension_numbers<[1], [0], [0], [1], [0, 0, 1, 1], [], []>} : vector<32x16xf32>, vector<16x512xf32>, vector<32x512xf32> -> vector<32x512xf32>
    %c0_5 = arith.constant 0 : index
    %c0_6 = arith.constant 0 : index
    %4 = vector.load %arg3[%c0_5, %c0_6] : memref<1x512xf32, #tpu.memory_space<vmem>>, vector<1x512xf32>
    %5 = vector.broadcast %4 : vector<1x512xf32> to vector<32x512xf32>
    %6 = arith.addf %3, %5 : vector<32x512xf32>
    %cst_7 = arith.constant 0.000000e+00 : f32
    %7 = vector.broadcast %cst_7 : f32 to vector<4x128xf32>
    %cst_8 = arith.constant 0.000000e+00 : f32
    %8 = vector.broadcast %cst_8 : f32 to vector<4x128xf32>
    %cst_9 = arith.constant dense<0.000000e+00> : vector<4x512xf32>
    %9 = tpu.matmul %7, %1, %cst_9 {dimension_numbers = #tpu.dot_dimension_numbers<[1], [0], [0], [1], [0, 0, 1, 1], [], []>} : vector<4x128xf32>, vector<128x512xf32>, vector<4x512xf32> -> vector<4x512xf32>
    %10 = vector.extract_strided_slice %6 {offsets = [0, 0], sizes = [4, 512], strides = [1, 1]} : vector<32x512xf32> to vector<4x512xf32>
    %11 = arith.addf %9, %10 : vector<4x512xf32>
    %12 = vector.extract_strided_slice %11 {offsets = [0, 0], sizes = [4, 128], strides = [1, 1]} : vector<4x512xf32> to vector<4x128xf32>
    %13 = arith.negf %12 : vector<4x128xf32>
    %14 = math.exp %13 : vector<4x128xf32>
    %cst_10 = arith.constant 1.000000e+00 : f32
    %15 = vector.broadcast %cst_10 : f32 to vector<4x128xf32>
    %16 = arith.addf %15, %14 : vector<4x128xf32>
    %17 = arith.divf %15, %16 : vector<4x128xf32>
    %18 = vector.extract_strided_slice %11 {offsets = [0, 128], sizes = [4, 128], strides = [1, 1]} : vector<4x512xf32> to vector<4x128xf32>
    %19 = arith.negf %18 : vector<4x128xf32>
    %20 = math.exp %19 : vector<4x128xf32>
    %cst_11 = arith.constant 1.000000e+00 : f32
    %21 = vector.broadcast %cst_11 : f32 to vector<4x128xf32>
    %22 = arith.addf %21, %20 : vector<4x128xf32>
    %23 = arith.divf %21, %22 : vector<4x128xf32>
    %24 = vector.extract_strided_slice %11 {offsets = [0, 256], sizes = [4, 128], strides = [1, 1]} : vector<4x512xf32> to vector<4x128xf32>
    %25 = math.tanh %24 : vector<4x128xf32>
    %26 = vector.extract_strided_slice %11 {offsets = [0, 384], sizes = [4, 128], strides = [1, 1]} : vector<4x512xf32> to vector<4x128xf32>
    %27 = arith.negf %26 : vector<4x128xf32>
    %28 = math.exp %27 : vector<4x128xf32>
    %cst_12 = arith.constant 1.000000e+00 : f32
    %29 = vector.broadcast %cst_12 : f32 to vector<4x128xf32>
    %30 = arith.addf %29, %28 : vector<4x128xf32>
    %31 = arith.divf %29, %30 : vector<4x128xf32>
    %32 = arith.mulf %23, %8 : vector<4x128xf32>
    %33 = arith.mulf %17, %25 : vector<4x128xf32>
    %34 = arith.addf %32, %33 : vector<4x128xf32>
    %35 = math.tanh %34 : vector<4x128xf32>
    %36 = arith.mulf %31, %35 : vector<4x128xf32>
    %cst_13 = arith.constant dense<0.000000e+00> : vector<4x512xf32>
    %37 = tpu.matmul %36, %1, %cst_13 {dimension_numbers = #tpu.dot_dimension_numbers<[1], [0], [0], [1], [0, 0, 1, 1], [], []>} : vector<4x128xf32>, vector<128x512xf32>, vector<4x512xf32> -> vector<4x512xf32>
    %38 = vector.extract_strided_slice %6 {offsets = [4, 0], sizes = [4, 512], strides = [1, 1]} : vector<32x512xf32> to vector<4x512xf32>
    %39 = arith.addf %37, %38 : vector<4x512xf32>
    %40 = vector.extract_strided_slice %39 {offsets = [0, 0], sizes = [4, 128], strides = [1, 1]} : vector<4x512xf32> to vector<4x128xf32>
    %41 = arith.negf %40 : vector<4x128xf32>
    %42 = math.exp %41 : vector<4x128xf32>
    %cst_14 = arith.constant 1.000000e+00 : f32
    %43 = vector.broadcast %cst_14 : f32 to vector<4x128xf32>
    %44 = arith.addf %43, %42 : vector<4x128xf32>
    %45 = arith.divf %43, %44 : vector<4x128xf32>
    %46 = vector.extract_strided_slice %39 {offsets = [0, 128], sizes = [4, 128], strides = [1, 1]} : vector<4x512xf32> to vector<4x128xf32>
    %47 = arith.negf %46 : vector<4x128xf32>
    %48 = math.exp %47 : vector<4x128xf32>
    %cst_15 = arith.constant 1.000000e+00 : f32
    %49 = vector.broadcast %cst_15 : f32 to vector<4x128xf32>
    %50 = arith.addf %49, %48 : vector<4x128xf32>
    %51 = arith.divf %49, %50 : vector<4x128xf32>
    %52 = vector.extract_strided_slice %39 {offsets = [0, 256], sizes = [4, 128], strides = [1, 1]} : vector<4x512xf32> to vector<4x128xf32>
    %53 = math.tanh %52 : vector<4x128xf32>
    %54 = vector.extract_strided_slice %39 {offsets = [0, 384], sizes = [4, 128], strides = [1, 1]} : vector<4x512xf32> to vector<4x128xf32>
    %55 = arith.negf %54 : vector<4x128xf32>
    %56 = math.exp %55 : vector<4x128xf32>
    %cst_16 = arith.constant 1.000000e+00 : f32
    %57 = vector.broadcast %cst_16 : f32 to vector<4x128xf32>
    %58 = arith.addf %57, %56 : vector<4x128xf32>
    %59 = arith.divf %57, %58 : vector<4x128xf32>
    %60 = arith.mulf %51, %34 : vector<4x128xf32>
    %61 = arith.mulf %45, %53 : vector<4x128xf32>
    %62 = arith.addf %60, %61 : vector<4x128xf32>
    %63 = math.tanh %62 : vector<4x128xf32>
    %64 = arith.mulf %59, %63 : vector<4x128xf32>
    %cst_17 = arith.constant dense<0.000000e+00> : vector<4x512xf32>
    %65 = tpu.matmul %64, %1, %cst_17 {dimension_numbers = #tpu.dot_dimension_numbers<[1], [0], [0], [1], [0, 0, 1, 1], [], []>} : vector<4x128xf32>, vector<128x512xf32>, vector<4x512xf32> -> vector<4x512xf32>
    %66 = vector.extract_strided_slice %6 {offsets = [8, 0], sizes = [4, 512], strides = [1, 1]} : vector<32x512xf32> to vector<4x512xf32>
    %67 = arith.addf %65, %66 : vector<4x512xf32>
    %68 = vector.extract_strided_slice %67 {offsets = [0, 0], sizes = [4, 128], strides = [1, 1]} : vector<4x512xf32> to vector<4x128xf32>
    %69 = arith.negf %68 : vector<4x128xf32>
    %70 = math.exp %69 : vector<4x128xf32>
    %cst_18 = arith.constant 1.000000e+00 : f32
    %71 = vector.broadcast %cst_18 : f32 to vector<4x128xf32>
    %72 = arith.addf %71, %70 : vector<4x128xf32>
    %73 = arith.divf %71, %72 : vector<4x128xf32>
    %74 = vector.extract_strided_slice %67 {offsets = [0, 128], sizes = [4, 128], strides = [1, 1]} : vector<4x512xf32> to vector<4x128xf32>
    %75 = arith.negf %74 : vector<4x128xf32>
    %76 = math.exp %75 : vector<4x128xf32>
    %cst_19 = arith.constant 1.000000e+00 : f32
    %77 = vector.broadcast %cst_19 : f32 to vector<4x128xf32>
    %78 = arith.addf %77, %76 : vector<4x128xf32>
    %79 = arith.divf %77, %78 : vector<4x128xf32>
    %80 = vector.extract_strided_slice %67 {offsets = [0, 256], sizes = [4, 128], strides = [1, 1]} : vector<4x512xf32> to vector<4x128xf32>
    %81 = math.tanh %80 : vector<4x128xf32>
    %82 = vector.extract_strided_slice %67 {offsets = [0, 384], sizes = [4, 128], strides = [1, 1]} : vector<4x512xf32> to vector<4x128xf32>
    %83 = arith.negf %82 : vector<4x128xf32>
    %84 = math.exp %83 : vector<4x128xf32>
    %cst_20 = arith.constant 1.000000e+00 : f32
    %85 = vector.broadcast %cst_20 : f32 to vector<4x128xf32>
    %86 = arith.addf %85, %84 : vector<4x128xf32>
    %87 = arith.divf %85, %86 : vector<4x128xf32>
    %88 = arith.mulf %79, %62 : vector<4x128xf32>
    %89 = arith.mulf %73, %81 : vector<4x128xf32>
    %90 = arith.addf %88, %89 : vector<4x128xf32>
    %91 = math.tanh %90 : vector<4x128xf32>
    %92 = arith.mulf %87, %91 : vector<4x128xf32>
    %cst_21 = arith.constant dense<0.000000e+00> : vector<4x512xf32>
    %93 = tpu.matmul %92, %1, %cst_21 {dimension_numbers = #tpu.dot_dimension_numbers<[1], [0], [0], [1], [0, 0, 1, 1], [], []>} : vector<4x128xf32>, vector<128x512xf32>, vector<4x512xf32> -> vector<4x512xf32>
    %94 = vector.extract_strided_slice %6 {offsets = [12, 0], sizes = [4, 512], strides = [1, 1]} : vector<32x512xf32> to vector<4x512xf32>
    %95 = arith.addf %93, %94 : vector<4x512xf32>
    %96 = vector.extract_strided_slice %95 {offsets = [0, 0], sizes = [4, 128], strides = [1, 1]} : vector<4x512xf32> to vector<4x128xf32>
    %97 = arith.negf %96 : vector<4x128xf32>
    %98 = math.exp %97 : vector<4x128xf32>
    %cst_22 = arith.constant 1.000000e+00 : f32
    %99 = vector.broadcast %cst_22 : f32 to vector<4x128xf32>
    %100 = arith.addf %99, %98 : vector<4x128xf32>
    %101 = arith.divf %99, %100 : vector<4x128xf32>
    %102 = vector.extract_strided_slice %95 {offsets = [0, 128], sizes = [4, 128], strides = [1, 1]} : vector<4x512xf32> to vector<4x128xf32>
    %103 = arith.negf %102 : vector<4x128xf32>
    %104 = math.exp %103 : vector<4x128xf32>
    %cst_23 = arith.constant 1.000000e+00 : f32
    %105 = vector.broadcast %cst_23 : f32 to vector<4x128xf32>
    %106 = arith.addf %105, %104 : vector<4x128xf32>
    %107 = arith.divf %105, %106 : vector<4x128xf32>
    %108 = vector.extract_strided_slice %95 {offsets = [0, 256], sizes = [4, 128], strides = [1, 1]} : vector<4x512xf32> to vector<4x128xf32>
    %109 = math.tanh %108 : vector<4x128xf32>
    %110 = vector.extract_strided_slice %95 {offsets = [0, 384], sizes = [4, 128], strides = [1, 1]} : vector<4x512xf32> to vector<4x128xf32>
    %111 = arith.negf %110 : vector<4x128xf32>
    %112 = math.exp %111 : vector<4x128xf32>
    %cst_24 = arith.constant 1.000000e+00 : f32
    %113 = vector.broadcast %cst_24 : f32 to vector<4x128xf32>
    %114 = arith.addf %113, %112 : vector<4x128xf32>
    %115 = arith.divf %113, %114 : vector<4x128xf32>
    %116 = arith.mulf %107, %90 : vector<4x128xf32>
    %117 = arith.mulf %101, %109 : vector<4x128xf32>
    %118 = arith.addf %116, %117 : vector<4x128xf32>
    %119 = math.tanh %118 : vector<4x128xf32>
    %120 = arith.mulf %115, %119 : vector<4x128xf32>
    %cst_25 = arith.constant dense<0.000000e+00> : vector<4x512xf32>
    %121 = tpu.matmul %120, %1, %cst_25 {dimension_numbers = #tpu.dot_dimension_numbers<[1], [0], [0], [1], [0, 0, 1, 1], [], []>} : vector<4x128xf32>, vector<128x512xf32>, vector<4x512xf32> -> vector<4x512xf32>
    %122 = vector.extract_strided_slice %6 {offsets = [16, 0], sizes = [4, 512], strides = [1, 1]} : vector<32x512xf32> to vector<4x512xf32>
    %123 = arith.addf %121, %122 : vector<4x512xf32>
    %124 = vector.extract_strided_slice %123 {offsets = [0, 0], sizes = [4, 128], strides = [1, 1]} : vector<4x512xf32> to vector<4x128xf32>
    %125 = arith.negf %124 : vector<4x128xf32>
    %126 = math.exp %125 : vector<4x128xf32>
    %cst_26 = arith.constant 1.000000e+00 : f32
    %127 = vector.broadcast %cst_26 : f32 to vector<4x128xf32>
    %128 = arith.addf %127, %126 : vector<4x128xf32>
    %129 = arith.divf %127, %128 : vector<4x128xf32>
    %130 = vector.extract_strided_slice %123 {offsets = [0, 128], sizes = [4, 128], strides = [1, 1]} : vector<4x512xf32> to vector<4x128xf32>
    %131 = arith.negf %130 : vector<4x128xf32>
    %132 = math.exp %131 : vector<4x128xf32>
    %cst_27 = arith.constant 1.000000e+00 : f32
    %133 = vector.broadcast %cst_27 : f32 to vector<4x128xf32>
    %134 = arith.addf %133, %132 : vector<4x128xf32>
    %135 = arith.divf %133, %134 : vector<4x128xf32>
    %136 = vector.extract_strided_slice %123 {offsets = [0, 256], sizes = [4, 128], strides = [1, 1]} : vector<4x512xf32> to vector<4x128xf32>
    %137 = math.tanh %136 : vector<4x128xf32>
    %138 = vector.extract_strided_slice %123 {offsets = [0, 384], sizes = [4, 128], strides = [1, 1]} : vector<4x512xf32> to vector<4x128xf32>
    %139 = arith.negf %138 : vector<4x128xf32>
    %140 = math.exp %139 : vector<4x128xf32>
    %cst_28 = arith.constant 1.000000e+00 : f32
    %141 = vector.broadcast %cst_28 : f32 to vector<4x128xf32>
    %142 = arith.addf %141, %140 : vector<4x128xf32>
    %143 = arith.divf %141, %142 : vector<4x128xf32>
    %144 = arith.mulf %135, %118 : vector<4x128xf32>
    %145 = arith.mulf %129, %137 : vector<4x128xf32>
    %146 = arith.addf %144, %145 : vector<4x128xf32>
    %147 = math.tanh %146 : vector<4x128xf32>
    %148 = arith.mulf %143, %147 : vector<4x128xf32>
    %cst_29 = arith.constant dense<0.000000e+00> : vector<4x512xf32>
    %149 = tpu.matmul %148, %1, %cst_29 {dimension_numbers = #tpu.dot_dimension_numbers<[1], [0], [0], [1], [0, 0, 1, 1], [], []>} : vector<4x128xf32>, vector<128x512xf32>, vector<4x512xf32> -> vector<4x512xf32>
    %150 = vector.extract_strided_slice %6 {offsets = [20, 0], sizes = [4, 512], strides = [1, 1]} : vector<32x512xf32> to vector<4x512xf32>
    %151 = arith.addf %149, %150 : vector<4x512xf32>
    %152 = vector.extract_strided_slice %151 {offsets = [0, 0], sizes = [4, 128], strides = [1, 1]} : vector<4x512xf32> to vector<4x128xf32>
    %153 = arith.negf %152 : vector<4x128xf32>
    %154 = math.exp %153 : vector<4x128xf32>
    %cst_30 = arith.constant 1.000000e+00 : f32
    %155 = vector.broadcast %cst_30 : f32 to vector<4x128xf32>
    %156 = arith.addf %155, %154 : vector<4x128xf32>
    %157 = arith.divf %155, %156 : vector<4x128xf32>
    %158 = vector.extract_strided_slice %151 {offsets = [0, 128], sizes = [4, 128], strides = [1, 1]} : vector<4x512xf32> to vector<4x128xf32>
    %159 = arith.negf %158 : vector<4x128xf32>
    %160 = math.exp %159 : vector<4x128xf32>
    %cst_31 = arith.constant 1.000000e+00 : f32
    %161 = vector.broadcast %cst_31 : f32 to vector<4x128xf32>
    %162 = arith.addf %161, %160 : vector<4x128xf32>
    %163 = arith.divf %161, %162 : vector<4x128xf32>
    %164 = vector.extract_strided_slice %151 {offsets = [0, 256], sizes = [4, 128], strides = [1, 1]} : vector<4x512xf32> to vector<4x128xf32>
    %165 = math.tanh %164 : vector<4x128xf32>
    %166 = vector.extract_strided_slice %151 {offsets = [0, 384], sizes = [4, 128], strides = [1, 1]} : vector<4x512xf32> to vector<4x128xf32>
    %167 = arith.negf %166 : vector<4x128xf32>
    %168 = math.exp %167 : vector<4x128xf32>
    %cst_32 = arith.constant 1.000000e+00 : f32
    %169 = vector.broadcast %cst_32 : f32 to vector<4x128xf32>
    %170 = arith.addf %169, %168 : vector<4x128xf32>
    %171 = arith.divf %169, %170 : vector<4x128xf32>
    %172 = arith.mulf %163, %146 : vector<4x128xf32>
    %173 = arith.mulf %157, %165 : vector<4x128xf32>
    %174 = arith.addf %172, %173 : vector<4x128xf32>
    %175 = math.tanh %174 : vector<4x128xf32>
    %176 = arith.mulf %171, %175 : vector<4x128xf32>
    %cst_33 = arith.constant dense<0.000000e+00> : vector<4x512xf32>
    %177 = tpu.matmul %176, %1, %cst_33 {dimension_numbers = #tpu.dot_dimension_numbers<[1], [0], [0], [1], [0, 0, 1, 1], [], []>} : vector<4x128xf32>, vector<128x512xf32>, vector<4x512xf32> -> vector<4x512xf32>
    %178 = vector.extract_strided_slice %6 {offsets = [24, 0], sizes = [4, 512], strides = [1, 1]} : vector<32x512xf32> to vector<4x512xf32>
    %179 = arith.addf %177, %178 : vector<4x512xf32>
    %180 = vector.extract_strided_slice %179 {offsets = [0, 0], sizes = [4, 128], strides = [1, 1]} : vector<4x512xf32> to vector<4x128xf32>
    %181 = arith.negf %180 : vector<4x128xf32>
    %182 = math.exp %181 : vector<4x128xf32>
    %cst_34 = arith.constant 1.000000e+00 : f32
    %183 = vector.broadcast %cst_34 : f32 to vector<4x128xf32>
    %184 = arith.addf %183, %182 : vector<4x128xf32>
    %185 = arith.divf %183, %184 : vector<4x128xf32>
    %186 = vector.extract_strided_slice %179 {offsets = [0, 128], sizes = [4, 128], strides = [1, 1]} : vector<4x512xf32> to vector<4x128xf32>
    %187 = arith.negf %186 : vector<4x128xf32>
    %188 = math.exp %187 : vector<4x128xf32>
    %cst_35 = arith.constant 1.000000e+00 : f32
    %189 = vector.broadcast %cst_35 : f32 to vector<4x128xf32>
    %190 = arith.addf %189, %188 : vector<4x128xf32>
    %191 = arith.divf %189, %190 : vector<4x128xf32>
    %192 = vector.extract_strided_slice %179 {offsets = [0, 256], sizes = [4, 128], strides = [1, 1]} : vector<4x512xf32> to vector<4x128xf32>
    %193 = math.tanh %192 : vector<4x128xf32>
    %194 = vector.extract_strided_slice %179 {offsets = [0, 384], sizes = [4, 128], strides = [1, 1]} : vector<4x512xf32> to vector<4x128xf32>
    %195 = arith.negf %194 : vector<4x128xf32>
    %196 = math.exp %195 : vector<4x128xf32>
    %cst_36 = arith.constant 1.000000e+00 : f32
    %197 = vector.broadcast %cst_36 : f32 to vector<4x128xf32>
    %198 = arith.addf %197, %196 : vector<4x128xf32>
    %199 = arith.divf %197, %198 : vector<4x128xf32>
    %200 = arith.mulf %191, %174 : vector<4x128xf32>
    %201 = arith.mulf %185, %193 : vector<4x128xf32>
    %202 = arith.addf %200, %201 : vector<4x128xf32>
    %203 = math.tanh %202 : vector<4x128xf32>
    %204 = arith.mulf %199, %203 : vector<4x128xf32>
    %cst_37 = arith.constant dense<0.000000e+00> : vector<4x512xf32>
    %205 = tpu.matmul %204, %1, %cst_37 {dimension_numbers = #tpu.dot_dimension_numbers<[1], [0], [0], [1], [0, 0, 1, 1], [], []>} : vector<4x128xf32>, vector<128x512xf32>, vector<4x512xf32> -> vector<4x512xf32>
    %206 = vector.extract_strided_slice %6 {offsets = [28, 0], sizes = [4, 512], strides = [1, 1]} : vector<32x512xf32> to vector<4x512xf32>
    %207 = arith.addf %205, %206 : vector<4x512xf32>
    %208 = vector.extract_strided_slice %207 {offsets = [0, 0], sizes = [4, 128], strides = [1, 1]} : vector<4x512xf32> to vector<4x128xf32>
    %209 = arith.negf %208 : vector<4x128xf32>
    %210 = math.exp %209 : vector<4x128xf32>
    %cst_38 = arith.constant 1.000000e+00 : f32
    %211 = vector.broadcast %cst_38 : f32 to vector<4x128xf32>
    %212 = arith.addf %211, %210 : vector<4x128xf32>
    %213 = arith.divf %211, %212 : vector<4x128xf32>
    %214 = vector.extract_strided_slice %207 {offsets = [0, 128], sizes = [4, 128], strides = [1, 1]} : vector<4x512xf32> to vector<4x128xf32>
    %215 = arith.negf %214 : vector<4x128xf32>
    %216 = math.exp %215 : vector<4x128xf32>
    %cst_39 = arith.constant 1.000000e+00 : f32
    %217 = vector.broadcast %cst_39 : f32 to vector<4x128xf32>
    %218 = arith.addf %217, %216 : vector<4x128xf32>
    %219 = arith.divf %217, %218 : vector<4x128xf32>
    %220 = vector.extract_strided_slice %207 {offsets = [0, 256], sizes = [4, 128], strides = [1, 1]} : vector<4x512xf32> to vector<4x128xf32>
    %221 = math.tanh %220 : vector<4x128xf32>
    %222 = vector.extract_strided_slice %207 {offsets = [0, 384], sizes = [4, 128], strides = [1, 1]} : vector<4x512xf32> to vector<4x128xf32>
    %223 = arith.negf %222 : vector<4x128xf32>
    %224 = math.exp %223 : vector<4x128xf32>
    %cst_40 = arith.constant 1.000000e+00 : f32
    %225 = vector.broadcast %cst_40 : f32 to vector<4x128xf32>
    %226 = arith.addf %225, %224 : vector<4x128xf32>
    %227 = arith.divf %225, %226 : vector<4x128xf32>
    %228 = arith.mulf %219, %202 : vector<4x128xf32>
    %229 = arith.mulf %213, %221 : vector<4x128xf32>
    %230 = arith.addf %228, %229 : vector<4x128xf32>
    %231 = math.tanh %230 : vector<4x128xf32>
    %232 = arith.mulf %227, %231 : vector<4x128xf32>
    %233 = vector.shape_cast %232 : vector<4x128xf32> to vector<1x4x128xf32>
    %234 = vector.shape_cast %233 : vector<1x4x128xf32> to vector<1x4x128xf32>
    %235 = vector.broadcast %234 : vector<1x4x128xf32> to vector<3x4x128xf32>
    %c0_41 = arith.constant 0 : index
    %c0_42 = arith.constant 0 : index
    %c0_43 = arith.constant 0 : index
    %c0_44 = arith.constant 0 : index
    %236 = vector.load %arg4[%c0_41, %c0_42, %c0_43, %c0_44] : memref<3x3x4x128xf32, #tpu.memory_space<vmem>>, vector<3x1x4x128xf32>
    %237 = vector.shape_cast %236 : vector<3x1x4x128xf32> to vector<3x4x128xf32>
    %238 = vector.extract_strided_slice %237 {offsets = [0, 0, 0], sizes = [3, 1, 128], strides = [1, 1, 1]} : vector<3x4x128xf32> to vector<3x1x128xf32>
    %239 = vector.broadcast %238 : vector<3x1x128xf32> to vector<3x4x128xf32>
    %240 = arith.mulf %235, %239 : vector<3x4x128xf32>
    %241 = vector.extract_strided_slice %237 {offsets = [0, 1, 0], sizes = [3, 1, 128], strides = [1, 1, 1]} : vector<3x4x128xf32> to vector<3x1x128xf32>
    %242 = vector.broadcast %241 : vector<3x1x128xf32> to vector<3x4x128xf32>
    %243 = arith.addf %240, %242 : vector<3x4x128xf32>
    %cst_45 = arith.constant 0.000000e+00 : f32
    %244 = vector.broadcast %cst_45 : f32 to vector<3x4x128xf32>
    %245 = arith.maximumf %243, %244 : vector<3x4x128xf32>
    %c0_46 = arith.constant 0 : index
    %c0_47 = arith.constant 0 : index
    %c0_48 = arith.constant 0 : index
    %c0_49 = arith.constant 0 : index
    %246 = vector.load %arg5[%c0_46, %c0_47, %c0_48, %c0_49] : memref<3x3x128x128xf32, #tpu.memory_space<vmem>>, vector<3x1x128x128xf32>
    %247 = vector.shape_cast %246 : vector<3x1x128x128xf32> to vector<3x128x128xf32>
    "tpu.trace_start"() <{level = 10 : i32, message = "nbh,nhk->nbk"}> : () -> ()
    %cst_50 = arith.constant dense<0.000000e+00> : vector<3x4x128xf32>
    %248 = tpu.matmul %245, %247, %cst_50 {dimension_numbers = #tpu.dot_dimension_numbers<[2], [1], [1], [2], [0, 0, 0, 1, 1, 2], [0], [0]>} : vector<3x4x128xf32>, vector<3x128x128xf32>, vector<3x4x128xf32> -> vector<3x4x128xf32>
    "tpu.trace_stop"() : () -> ()
    %249 = vector.extract_strided_slice %237 {offsets = [0, 2, 0], sizes = [3, 1, 128], strides = [1, 1, 1]} : vector<3x4x128xf32> to vector<3x1x128xf32>
    %250 = vector.broadcast %249 : vector<3x1x128xf32> to vector<3x4x128xf32>
    %251 = arith.mulf %248, %250 : vector<3x4x128xf32>
    %252 = vector.extract_strided_slice %237 {offsets = [0, 3, 0], sizes = [3, 1, 128], strides = [1, 1, 1]} : vector<3x4x128xf32> to vector<3x1x128xf32>
    %253 = vector.broadcast %252 : vector<3x1x128xf32> to vector<3x4x128xf32>
    %254 = arith.addf %251, %253 : vector<3x4x128xf32>
    %cst_51 = arith.constant 0.000000e+00 : f32
    %255 = vector.broadcast %cst_51 : f32 to vector<3x4x128xf32>
    %256 = arith.maximumf %254, %255 : vector<3x4x128xf32>
    %c0_52 = arith.constant 0 : index
    %c0_53 = arith.constant 0 : index
    %c0_54 = arith.constant 0 : index
    %c0_55 = arith.constant 0 : index
    %257 = vector.load %arg6[%c0_52, %c0_53, %c0_54, %c0_55] : memref<3x3x128x128xf32, #tpu.memory_space<vmem>>, vector<3x1x128x128xf32>
    %258 = vector.shape_cast %257 : vector<3x1x128x128xf32> to vector<3x128x128xf32>
    "tpu.trace_start"() <{level = 10 : i32, message = "nbh,nhk->nbk"}> : () -> ()
    %cst_56 = arith.constant dense<0.000000e+00> : vector<3x4x128xf32>
    %259 = tpu.matmul %256, %258, %cst_56 {dimension_numbers = #tpu.dot_dimension_numbers<[2], [1], [1], [2], [0, 0, 0, 1, 1, 2], [0], [0]>} : vector<3x4x128xf32>, vector<3x128x128xf32>, vector<3x4x128xf32> -> vector<3x4x128xf32>
    "tpu.trace_stop"() : () -> ()
    %260 = arith.addf %259, %235 : vector<3x4x128xf32>
    %cst_57 = arith.constant 0.000000e+00 : f32
    %261 = vector.broadcast %cst_57 : f32 to vector<3x4x128xf32>
    %262 = arith.maximumf %260, %261 : vector<3x4x128xf32>
    %c0_58 = arith.constant 0 : index
    %c1 = arith.constant 1 : index
    %c0_59 = arith.constant 0 : index
    %c0_60 = arith.constant 0 : index
    %263 = vector.load %arg4[%c0_58, %c1, %c0_59, %c0_60] : memref<3x3x4x128xf32, #tpu.memory_space<vmem>>, vector<3x1x4x128xf32>
    %264 = vector.shape_cast %263 : vector<3x1x4x128xf32> to vector<3x4x128xf32>
    %265 = vector.extract_strided_slice %264 {offsets = [0, 0, 0], sizes = [3, 1, 128], strides = [1, 1, 1]} : vector<3x4x128xf32> to vector<3x1x128xf32>
    %266 = vector.broadcast %265 : vector<3x1x128xf32> to vector<3x4x128xf32>
    %267 = arith.mulf %262, %266 : vector<3x4x128xf32>
    %268 = vector.extract_strided_slice %264 {offsets = [0, 1, 0], sizes = [3, 1, 128], strides = [1, 1, 1]} : vector<3x4x128xf32> to vector<3x1x128xf32>
    %269 = vector.broadcast %268 : vector<3x1x128xf32> to vector<3x4x128xf32>
    %270 = arith.addf %267, %269 : vector<3x4x128xf32>
    %cst_61 = arith.constant 0.000000e+00 : f32
    %271 = vector.broadcast %cst_61 : f32 to vector<3x4x128xf32>
    %272 = arith.maximumf %270, %271 : vector<3x4x128xf32>
    %c0_62 = arith.constant 0 : index
    %c1_63 = arith.constant 1 : index
    %c0_64 = arith.constant 0 : index
    %c0_65 = arith.constant 0 : index
    %273 = vector.load %arg5[%c0_62, %c1_63, %c0_64, %c0_65] : memref<3x3x128x128xf32, #tpu.memory_space<vmem>>, vector<3x1x128x128xf32>
    %274 = vector.shape_cast %273 : vector<3x1x128x128xf32> to vector<3x128x128xf32>
    "tpu.trace_start"() <{level = 10 : i32, message = "nbh,nhk->nbk"}> : () -> ()
    %cst_66 = arith.constant dense<0.000000e+00> : vector<3x4x128xf32>
    %275 = tpu.matmul %272, %274, %cst_66 {dimension_numbers = #tpu.dot_dimension_numbers<[2], [1], [1], [2], [0, 0, 0, 1, 1, 2], [0], [0]>} : vector<3x4x128xf32>, vector<3x128x128xf32>, vector<3x4x128xf32> -> vector<3x4x128xf32>
    "tpu.trace_stop"() : () -> ()
    %276 = vector.extract_strided_slice %264 {offsets = [0, 2, 0], sizes = [3, 1, 128], strides = [1, 1, 1]} : vector<3x4x128xf32> to vector<3x1x128xf32>
    %277 = vector.broadcast %276 : vector<3x1x128xf32> to vector<3x4x128xf32>
    %278 = arith.mulf %275, %277 : vector<3x4x128xf32>
    %279 = vector.extract_strided_slice %264 {offsets = [0, 3, 0], sizes = [3, 1, 128], strides = [1, 1, 1]} : vector<3x4x128xf32> to vector<3x1x128xf32>
    %280 = vector.broadcast %279 : vector<3x1x128xf32> to vector<3x4x128xf32>
    %281 = arith.addf %278, %280 : vector<3x4x128xf32>
    %cst_67 = arith.constant 0.000000e+00 : f32
    %282 = vector.broadcast %cst_67 : f32 to vector<3x4x128xf32>
    %283 = arith.maximumf %281, %282 : vector<3x4x128xf32>
    %c0_68 = arith.constant 0 : index
    %c1_69 = arith.constant 1 : index
    %c0_70 = arith.constant 0 : index
    %c0_71 = arith.constant 0 : index
    %284 = vector.load %arg6[%c0_68, %c1_69, %c0_70, %c0_71] : memref<3x3x128x128xf32, #tpu.memory_space<vmem>>, vector<3x1x128x128xf32>
    %285 = vector.shape_cast %284 : vector<3x1x128x128xf32> to vector<3x128x128xf32>
    "tpu.trace_start"() <{level = 10 : i32, message = "nbh,nhk->nbk"}> : () -> ()
    %cst_72 = arith.constant dense<0.000000e+00> : vector<3x4x128xf32>
    %286 = tpu.matmul %283, %285, %cst_72 {dimension_numbers = #tpu.dot_dimension_numbers<[2], [1], [1], [2], [0, 0, 0, 1, 1, 2], [0], [0]>} : vector<3x4x128xf32>, vector<3x128x128xf32>, vector<3x4x128xf32> -> vector<3x4x128xf32>
    "tpu.trace_stop"() : () -> ()
    %287 = arith.addf %286, %262 : vector<3x4x128xf32>
    %cst_73 = arith.constant 0.000000e+00 : f32
    %288 = vector.broadcast %cst_73 : f32 to vector<3x4x128xf32>
    %289 = arith.maximumf %287, %288 : vector<3x4x128xf32>
    %c0_74 = arith.constant 0 : index
    %c2 = arith.constant 2 : index
    %c0_75 = arith.constant 0 : index
    %c0_76 = arith.constant 0 : index
    %290 = vector.load %arg4[%c0_74, %c2, %c0_75, %c0_76] : memref<3x3x4x128xf32, #tpu.memory_space<vmem>>, vector<3x1x4x128xf32>
    %291 = vector.shape_cast %290 : vector<3x1x4x128xf32> to vector<3x4x128xf32>
    %292 = vector.extract_strided_slice %291 {offsets = [0, 0, 0], sizes = [3, 1, 128], strides = [1, 1, 1]} : vector<3x4x128xf32> to vector<3x1x128xf32>
    %293 = vector.broadcast %292 : vector<3x1x128xf32> to vector<3x4x128xf32>
    %294 = arith.mulf %289, %293 : vector<3x4x128xf32>
    %295 = vector.extract_strided_slice %291 {offsets = [0, 1, 0], sizes = [3, 1, 128], strides = [1, 1, 1]} : vector<3x4x128xf32> to vector<3x1x128xf32>
    %296 = vector.broadcast %295 : vector<3x1x128xf32> to vector<3x4x128xf32>
    %297 = arith.addf %294, %296 : vector<3x4x128xf32>
    %cst_77 = arith.constant 0.000000e+00 : f32
    %298 = vector.broadcast %cst_77 : f32 to vector<3x4x128xf32>
    %299 = arith.maximumf %297, %298 : vector<3x4x128xf32>
    %c0_78 = arith.constant 0 : index
    %c2_79 = arith.constant 2 : index
    %c0_80 = arith.constant 0 : index
    %c0_81 = arith.constant 0 : index
    %300 = vector.load %arg5[%c0_78, %c2_79, %c0_80, %c0_81] : memref<3x3x128x128xf32, #tpu.memory_space<vmem>>, vector<3x1x128x128xf32>
    %301 = vector.shape_cast %300 : vector<3x1x128x128xf32> to vector<3x128x128xf32>
    "tpu.trace_start"() <{level = 10 : i32, message = "nbh,nhk->nbk"}> : () -> ()
    %cst_82 = arith.constant dense<0.000000e+00> : vector<3x4x128xf32>
    %302 = tpu.matmul %299, %301, %cst_82 {dimension_numbers = #tpu.dot_dimension_numbers<[2], [1], [1], [2], [0, 0, 0, 1, 1, 2], [0], [0]>} : vector<3x4x128xf32>, vector<3x128x128xf32>, vector<3x4x128xf32> -> vector<3x4x128xf32>
    "tpu.trace_stop"() : () -> ()
    %303 = vector.extract_strided_slice %291 {offsets = [0, 2, 0], sizes = [3, 1, 128], strides = [1, 1, 1]} : vector<3x4x128xf32> to vector<3x1x128xf32>
    %304 = vector.broadcast %303 : vector<3x1x128xf32> to vector<3x4x128xf32>
    %305 = arith.mulf %302, %304 : vector<3x4x128xf32>
    %306 = vector.extract_strided_slice %291 {offsets = [0, 3, 0], sizes = [3, 1, 128], strides = [1, 1, 1]} : vector<3x4x128xf32> to vector<3x1x128xf32>
    %307 = vector.broadcast %306 : vector<3x1x128xf32> to vector<3x4x128xf32>
    %308 = arith.addf %305, %307 : vector<3x4x128xf32>
    %cst_83 = arith.constant 0.000000e+00 : f32
    %309 = vector.broadcast %cst_83 : f32 to vector<3x4x128xf32>
    %310 = arith.maximumf %308, %309 : vector<3x4x128xf32>
    %c0_84 = arith.constant 0 : index
    %c2_85 = arith.constant 2 : index
    %c0_86 = arith.constant 0 : index
    %c0_87 = arith.constant 0 : index
    %311 = vector.load %arg6[%c0_84, %c2_85, %c0_86, %c0_87] : memref<3x3x128x128xf32, #tpu.memory_space<vmem>>, vector<3x1x128x128xf32>
    %312 = vector.shape_cast %311 : vector<3x1x128x128xf32> to vector<3x128x128xf32>
    "tpu.trace_start"() <{level = 10 : i32, message = "nbh,nhk->nbk"}> : () -> ()
    %cst_88 = arith.constant dense<0.000000e+00> : vector<3x4x128xf32>
    %313 = tpu.matmul %310, %312, %cst_88 {dimension_numbers = #tpu.dot_dimension_numbers<[2], [1], [1], [2], [0, 0, 0, 1, 1, 2], [0], [0]>} : vector<3x4x128xf32>, vector<3x128x128xf32>, vector<3x4x128xf32> -> vector<3x4x128xf32>
    "tpu.trace_stop"() : () -> ()
    %314 = arith.addf %313, %289 : vector<3x4x128xf32>
    %cst_89 = arith.constant 0.000000e+00 : f32
    %315 = vector.broadcast %cst_89 : f32 to vector<3x4x128xf32>
    %316 = arith.maximumf %314, %315 : vector<3x4x128xf32>
    %c0_90 = arith.constant 0 : index
    %c0_91 = arith.constant 0 : index
    %c0_92 = arith.constant 0 : index
    %317 = vector.load %arg7[%c0_90, %c0_91, %c0_92] : memref<3x2x128xf32, #tpu.memory_space<vmem>>, vector<3x2x128xf32>
    %318 = vector.extract_strided_slice %317 {offsets = [0, 0, 0], sizes = [3, 1, 128], strides = [1, 1, 1]} : vector<3x2x128xf32> to vector<3x1x128xf32>
    %319 = vector.broadcast %318 : vector<3x1x128xf32> to vector<3x4x128xf32>
    %320 = arith.mulf %316, %319 : vector<3x4x128xf32>
    %321 = vector.extract_strided_slice %317 {offsets = [0, 1, 0], sizes = [3, 1, 128], strides = [1, 1, 1]} : vector<3x2x128xf32> to vector<3x1x128xf32>
    %322 = vector.broadcast %321 : vector<3x1x128xf32> to vector<3x4x128xf32>
    %323 = arith.addf %320, %322 : vector<3x4x128xf32>
    %cst_93 = arith.constant 0.000000e+00 : f32
    %324 = vector.broadcast %cst_93 : f32 to vector<3x4x128xf32>
    %325 = arith.maximumf %323, %324 : vector<3x4x128xf32>
    %326 = tpu.concatenate %325, %316 in 1 : vector<3x4x128xf32>, vector<3x4x128xf32> -> vector<3x8x128xf32>
    %c0_94 = arith.constant 0 : index
    %c0_95 = arith.constant 0 : index
    %c0_96 = arith.constant 0 : index
    %327 = vector.load %arg8[%c0_94, %c0_95, %c0_96] : memref<3x128x4xf32, #tpu.memory_space<vmem>>, vector<3x128x4xf32>
    "tpu.trace_start"() <{level = 10 : i32, message = "nbh,nhc->nbc"}> : () -> ()
    %cst_97 = arith.constant dense<0.000000e+00> : vector<3x8x4xf32>
    %328 = tpu.matmul %326, %327, %cst_97 {dimension_numbers = #tpu.dot_dimension_numbers<[2], [1], [1], [2], [0, 0, 0, 1, 1, 2], [0], [0]>} : vector<3x8x128xf32>, vector<3x128x4xf32>, vector<3x8x4xf32> -> vector<3x8x4xf32>
    "tpu.trace_stop"() : () -> ()
    %329 = vector.extract_strided_slice %328 {offsets = [0, 0, 0], sizes = [3, 4, 2], strides = [1, 1, 1]} : vector<3x8x4xf32> to vector<3x4x2xf32>
    %330 = vector.extract_strided_slice %328 {offsets = [0, 4, 2], sizes = [3, 4, 2], strides = [1, 1, 1]} : vector<3x8x4xf32> to vector<3x4x2xf32>
    %c0_98 = arith.constant 0 : index
    %c0_99 = arith.constant 0 : index
    %c0_100 = arith.constant 0 : index
    %331 = vector.load %arg9[%c0_98, %c0_99, %c0_100] : memref<3x5x2xf32, #tpu.memory_space<vmem>>, vector<3x5x2xf32>
    %332 = vector.extract_strided_slice %331 {offsets = [0, 0, 0], sizes = [3, 1, 2], strides = [1, 1, 1]} : vector<3x5x2xf32> to vector<3x1x2xf32>
    %333 = vector.broadcast %332 : vector<3x1x2xf32> to vector<3x4x2xf32>
    %334 = arith.mulf %329, %333 : vector<3x4x2xf32>
    %335 = vector.extract_strided_slice %331 {offsets = [0, 1, 0], sizes = [3, 1, 2], strides = [1, 1, 1]} : vector<3x5x2xf32> to vector<3x1x2xf32>
    %336 = vector.broadcast %335 : vector<3x1x2xf32> to vector<3x4x2xf32>
    %337 = arith.addf %334, %336 : vector<3x4x2xf32>
    %cst_101 = arith.constant 0.000000e+00 : f32
    %338 = vector.broadcast %cst_101 : f32 to vector<3x4x2xf32>
    %339 = arith.maximumf %337, %338 : vector<3x4x2xf32>
    %340 = vector.extract_strided_slice %331 {offsets = [0, 2, 0], sizes = [3, 1, 2], strides = [1, 1, 1]} : vector<3x5x2xf32> to vector<3x1x2xf32>
    %341 = vector.broadcast %340 : vector<3x1x2xf32> to vector<3x4x2xf32>
    %342 = arith.addf %330, %341 : vector<3x4x2xf32>
    %343 = vector.extract_strided_slice %339 {offsets = [0, 0, 0], sizes = [3, 4, 1], strides = [1, 1, 1]} : vector<3x4x2xf32> to vector<3x4x1xf32>
    %344 = vector.extract_strided_slice %331 {offsets = [0, 3, 0], sizes = [3, 1, 2], strides = [1, 1, 1]} : vector<3x5x2xf32> to vector<3x1x2xf32>
    %345 = vector.broadcast %343 : vector<3x4x1xf32> to vector<3x4x2xf32>
    %346 = vector.broadcast %344 : vector<3x1x2xf32> to vector<3x4x2xf32>
    %347 = arith.mulf %345, %346 : vector<3x4x2xf32>
    %348 = arith.addf %342, %347 : vector<3x4x2xf32>
    %349 = vector.extract_strided_slice %339 {offsets = [0, 0, 1], sizes = [3, 4, 1], strides = [1, 1, 1]} : vector<3x4x2xf32> to vector<3x4x1xf32>
    %350 = vector.extract_strided_slice %331 {offsets = [0, 4, 0], sizes = [3, 1, 2], strides = [1, 1, 1]} : vector<3x5x2xf32> to vector<3x1x2xf32>
    %351 = vector.broadcast %349 : vector<3x4x1xf32> to vector<3x4x2xf32>
    %352 = vector.broadcast %350 : vector<3x1x2xf32> to vector<3x4x2xf32>
    %353 = arith.mulf %351, %352 : vector<3x4x2xf32>
    %354 = arith.addf %348, %353 : vector<3x4x2xf32>
    %355 = vector.extract_strided_slice %354 {offsets = [0, 0, 0], sizes = [1, 4, 2], strides = [1, 1, 1]} : vector<3x4x2xf32> to vector<1x4x2xf32>
    %356 = vector.shape_cast %355 : vector<1x4x2xf32> to vector<4x2xf32>
    %357 = vector.extract_strided_slice %354 {offsets = [1, 0, 0], sizes = [1, 4, 2], strides = [1, 1, 1]} : vector<3x4x2xf32> to vector<1x4x2xf32>
    %358 = vector.shape_cast %357 : vector<1x4x2xf32> to vector<4x2xf32>
    %359 = vector.extract_strided_slice %354 {offsets = [2, 0, 0], sizes = [1, 4, 2], strides = [1, 1, 1]} : vector<3x4x2xf32> to vector<1x4x2xf32>
    %360 = vector.shape_cast %359 : vector<1x4x2xf32> to vector<4x2xf32>
    %361 = tpu.concatenate %356, %358, %360 in 1 : vector<4x2xf32>, vector<4x2xf32>, vector<4x2xf32> -> vector<4x6xf32>
    %c0_102 = arith.constant 0 : index
    %c0_103 = arith.constant 0 : index
    %362 = vector.load %arg10[%c0_102, %c0_103] : memref<4x6xf32, #tpu.memory_space<vmem>>, vector<4x6xf32>
    tpu.vector_store %arg10[%c0_102, %c0_103], %361 {strides = array<i32>} : memref<4x6xf32, #tpu.memory_space<vmem>>, vector<4x6xf32>,
    return
  }
}

</mosaic_0001>

<bundles_post_ra>
// kernel: tpu_custom_call.1
= control target key start
LH: loop header
LB: loop body
LE: loop exit
PB: predicated region body
PF: predicated region fallthrough
CT: control target
= control target key end

     0   :  { %15 = vsyncpa [#allocation3], 0  ;;  %s4269_s0 = inlined_call_operand.vmem [shape: f32[32,16], index: 0, kind: input, shape index: {}]   ;;  %s4270_s1 = inlined_call_operand.vmem [shape: f32[16,512], index: 1, kind: input, shape index: {}]   ;;  %s4271_s2 = inlined_call_operand.hbm [shape: f32[128,512], index: 2, kind: input, shape index: {}]   ;;  %s4272_s3 = inlined_call_operand.vmem [shape: f32[1,512], index: 3, kind: input, shape index: {}]   ;;  %s4273_s4 = inlined_call_operand.vmem [shape: f32[3,3,4,128], index: 4, kind: input, shape index: {}]   ;;  %s4274_s5 = inlined_call_operand.hbm [shape: f32[3,3,128,128], index: 5, kind: input, shape index: {}]   ;;  %s4275_s6 = inlined_call_operand.hbm [shape: f32[3,3,128,128], index: 6, kind: input, shape index: {}]   ;;  %s4276_s7 = inlined_call_operand.vmem [shape: f32[3,2,128], index: 7, kind: input, shape index: {}]   ;;  %s4277_s8 = inlined_call_operand.vmem [shape: f32[3,128,4], index: 8, kind: input, shape index: {}]   ;;  %s4278_s9 = inlined_call_operand.vmem [shape: f32[3,5,2], index: 9, kind: input, shape index: {}]   ;;  %s4279_s10 = inlined_call_operand.hbm [shape: f32[4,6], index: 10, kind: output, shape index: {}]  }
   0x1   :  { %16 = vsyncpa [#allocation6], 0  ;;  %s43_s15 = sshll.u32 %s4274_s5, 4  ;;  %s44_s15 = int_to_ptr.hbm [resolvable:$true] %s43_s15 }
   0x2   :  { %17 = vsyncpa [#allocation4], 0  ;;  %s2891_s16 = smov [#allocation5]   ;;  %s26_s20 = sshll.u32 %s4271_s2, 4  ;;  %s27_s20 = int_to_ptr.hbm [resolvable:$true] %s26_s20 }
   0x3   :  { %s45_s17 = sshll.u32 %s2891_s16, 4  ;;  %s2892_s21 = smov 128   ;;  %s46_s17 = int_to_ptr.vmem [resolvable:$true] %s45_s17 }
   0x4   :  { %s2893_s22 = smov 8   ;;  %s2894_s23 = smov [#allocation2]  }
   0x5   :  { %51 = dma.hbm_to_vmem [thread:$0]  %s44_s15, 18432, %s46_s17, [#allocation6], %s2892_s21, %s2892_s21, %s2893_s22  }
   0x6   :  { %s28_s24 = sshll.u32 %s2894_s23, 4  ;;  %s2895_s25 = smov 512   ;;  %s29_s24 = int_to_ptr.vmem [resolvable:$true] %s28_s24 }
   0x7   :  { %s2896_s26 = smov 32   ;;  %s56_s28 = sshll.u32 %s4275_s6, 4  ;;  %s57_s28 = int_to_ptr.hbm [resolvable:$true] %s56_s28 }
   0x8   :  { %34 = dma.hbm_to_vmem [thread:$0]  %s27_s20, 8192, %s29_s24, [#allocation3], %s2895_s25, %s2895_s25, %s2896_s26  }
   0x9   :  { %s2897_s29 = smov [#allocation7]  }
   0xa   :  { %s58_s30 = sshll.u32 %s2897_s29, 4  ;;  %s59_s30 = int_to_ptr.vmem [resolvable:$true] %s58_s30 }
   0xb   :  { %64 = dma.hbm_to_vmem [thread:$0]  %s57_s28, 18432, %s59_s30, [#allocation6], %s2892_s21, %s2892_s21, %s2893_s22  }
   0xc   :  { %2885 = dma.done.wait [#allocation3], 8192  }
   0xd   :  { %2886 = vsyncadd [#allocation3], 4294959104 }
   0xe   :  { %2887 = dma.done.wait [#allocation6], 36864  }
   0xf   :  { %2888 = vsyncadd [#allocation6], 4294930432  ;;  %v87_v0 = vld [vmem:[%s4270_s1 + $0x20] sm:$0xff]  ;;  %v88_v1 = vld [vmem:[%s4270_s1 + $0x28] sm:$0xff]  ;;  %vm169_vm0 = vcmask 130048   ;;  %s2901_s25 = smov 2  }
  0x10   :  { %v89_v2 = vld [vmem:[%s4270_s1 + $0x30] sm:$0xff]  ;;  %196 = vmatpush.msra.mxu0 %v87_v0  ;;  %225 = vmatpush.msra.mxu1 %v88_v1  ;;  %v90_v3 = vld [vmem:[%s4270_s1 + $0x38] sm:$0xff]  ;;  %v83_v4 = vld [vmem:[%s4270_s1] sm:$0xff]  ;;  %s2903_s26 = smov [#allocation8]   ;;  %s2523_s27 = sshll.u32 %s4279_s10, 4  ;;  %s2524_s27 = int_to_ptr.hbm [resolvable:$true] %s2523_s27 }
  0x11   :  { %v84_v5 = vld [vmem:[%s4270_s1 + $0x8] sm:$0xff]  ;;  %254 = vmatpush.msra.mxu2 %v89_v2  ;;  %283 = vmatpush.msra.mxu3 %v90_v3  ;;  %v85_v6 = vld [vmem:[%s4270_s1 + $0x10] sm:$0xff]  ;;  %v86_v7 = vld [vmem:[%s4270_s1 + $0x18] sm:$0xff] }
  0x12   :  { %v155_v8 = vld [vmem:[%s4269_s0] sm:$0xff]  ;;  %197 = vmatpush.msra.mxu0 %v83_v4  ;;  %226 = vmatpush.msra.mxu1 %v84_v5  ;;  %v2997_v10 = vld [vmem:[#allocation2 + $0x1e8] sm:$0xff]  ;;  %v3001_v11 = vld [vmem:[#allocation2 + $0x1f0] sm:$0xff] }
  0x13   :  { %255 = vmatpush.msra.mxu2 %v85_v6  ;;  %284 = vmatpush.msra.mxu3 %v86_v7  ;;  %v2995_v9 = vld [vmem:[#allocation2 + $0x1e0] sm:$0xff]  ;;  %v3003_v12 = vld [vmem:[#allocation2 + $0x1f8] sm:$0xff]  ;;  %v3009_v14 = vld [vmem:[#allocation2 + $0x1c8] sm:$0xff] }
  0x14   :  { %2534 = vmatmul.msk.f32.vlgmr.msra.gmra.mxu0 %vm169_vm0, %v155_v8  ;;  %2538 = vmatmul.msk.f32.vlgmr.msra.gmra.mxu1 %vm169_vm0, %v155_v8  ;;  %v3007_v13 = vld [vmem:[#allocation2 + $0x1c0] sm:$0xff]  ;;  %v3013_v15 = vld [vmem:[#allocation2 + $0x1d0] sm:$0xff]  ;;  %v3015_v16 = vld [vmem:[#allocation2 + $0x1d8] sm:$0xff] }
  0x15   :  { %2542 = vmatmul.msk.f32.vlgmr.msra.gmra.mxu2 %vm169_vm0, %v155_v8  ;;  %2546 = vmatmul.msk.f32.vlgmr.msra.gmra.mxu3 %vm169_vm0, %v155_v8  ;;  %v3019_v17 = vld [vmem:[#allocation2 + $0x1a0] sm:$0xff]  ;;  %v3021_v18 = vld [vmem:[#allocation2 + $0x1a8] sm:$0xff]  ;;  %v3025_v19 = vld [vmem:[#allocation2 + $0x1b0] sm:$0xff] }
  0x16   :  { %298 = vmatpush.msrb.mxu0 %v2995_v9  ;;  %318 = vmatpush.msrb.mxu1 %v2997_v10  ;;  %v3027_v20 = vld [vmem:[#allocation2 + $0x1b8] sm:$0xff]  ;;  %v3031_v21 = vld [vmem:[#allocation2 + $0x180] sm:$0xff]  ;;  %v3033_v22 = vld [vmem:[#allocation2 + $0x188] sm:$0xff] }
  0x17   :  { %338 = vmatpush.msrb.mxu2 %v3001_v11  ;;  %358 = vmatpush.msrb.mxu3 %v3003_v12  ;;  %v3037_v23 = vld [vmem:[#allocation2 + $0x190] sm:$0xff]  ;;  %v3039_v24 = vld [vmem:[#allocation2 + $0x198] sm:$0xff]  ;;  %v156_v25 = vld [vmem:[%s4269_s0 + $0x8] sm:$0xff] }
  0x18   :  { %299 = vmatpush.msrb.mxu0 %v3007_v13  ;;  %319 = vmatpush.msrb.mxu1 %v3009_v14  ;;  %v3050_v26 = vld [vmem:[#allocation2 + $0x160] sm:$0xff]  ;;  %v3052_v27 = vld [vmem:[#allocation2 + $0x168] sm:$0xff]  ;;  %v3056_v28 = vld [vmem:[#allocation2 + $0x170] sm:$0xff] }
  0x19   :  { %339 = vmatpush.msrb.mxu2 %v3013_v15  ;;  %359 = vmatpush.msrb.mxu3 %v3015_v16  ;;  %v3058_v29 = vld [vmem:[#allocation2 + $0x178] sm:$0xff]  ;;  %v3062_v30 = vld [vmem:[#allocation2 + $0x140] sm:$0xff]  ;;  %v3064_v31 = vld [vmem:[#allocation2 + $0x148] sm:$0xff] }
  0x1a   :  { %300 = vmatpush.msrb.mxu0 %v3019_v17  ;;  %320 = vmatpush.msrb.mxu1 %v3021_v18  ;;  %v3068_v32 = vld [vmem:[#allocation2 + $0x150] sm:$0xff]  ;;  %v3070_v33 = vld [vmem:[#allocation2 + $0x158] sm:$0xff]  ;;  %v3074_v34 = vld [vmem:[#allocation2 + $0x120] sm:$0xff] }
  0x1b   :  { %340 = vmatpush.msrb.mxu2 %v3025_v19  ;;  %360 = vmatpush.msrb.mxu3 %v3027_v20  ;;  %v3076_v35 = vld [vmem:[#allocation2 + $0x128] sm:$0xff]  ;;  %v3080_v36 = vld [vmem:[#allocation2 + $0x130] sm:$0xff]  ;;  %v3082_v37 = vld [vmem:[#allocation2 + $0x138] sm:$0xff] }
  0x1c   :  { %301 = vmatpush.msrb.mxu0 %v3031_v21  ;;  %321 = vmatpush.msrb.mxu1 %v3033_v22  ;;  %v3086_v38 = vld [vmem:[#allocation2 + $0x100] sm:$0xff]  ;;  %v3088_v39 = vld [vmem:[#allocation2 + $0x108] sm:$0xff]  ;;  %v3092_v40 = vld [vmem:[#allocation2 + $0x110] sm:$0xff] }
  0x1d   :  { %341 = vmatpush.msrb.mxu2 %v3037_v23  ;;  %361 = vmatpush.msrb.mxu3 %v3039_v24  ;;  %v3094_v41 = vld [vmem:[#allocation2 + $0x118] sm:$0xff]  ;;  %v157_v42 = vld [vmem:[%s4269_s0 + $0x10] sm:$0xff]  ;;  %v3105_v43 = vld [vmem:[#allocation2 + $0xe0] sm:$0xff] }
  0x1e   :  { %2535 = vmatmul.msk.f32.gmra.mxu0 %vm169_vm0, %v156_v25  ;;  %2539 = vmatmul.msk.f32.gmra.mxu1 %vm169_vm0, %v156_v25  ;;  %v3107_v44 = vld [vmem:[#allocation2 + $0xe8] sm:$0xff]  ;;  %v3111_v45 = vld [vmem:[#allocation2 + $0xf0] sm:$0xff]  ;;  %v3113_v46 = vld [vmem:[#allocation2 + $0xf8] sm:$0xff] }
  0x1f   :  { %2543 = vmatmul.msk.f32.gmra.mxu2 %vm169_vm0, %v156_v25  ;;  %2547 = vmatmul.msk.f32.gmra.mxu3 %vm169_vm0, %v156_v25  ;;  %v3117_v47 = vld [vmem:[#allocation2 + $0xc0] sm:$0xff]  ;;  %v3119_v48 = vld [vmem:[#allocation2 + $0xc8] sm:$0xff]  ;;  %v3123_v49 = vld [vmem:[#allocation2 + $0xd0] sm:$0xff] }
  0x20   :  { %302 = vmatpush.msrb.mxu0 %v3050_v26  ;;  %322 = vmatpush.msrb.mxu1 %v3052_v27  ;;  %4401 = vst [vmem:[#allocation12_spill] sm:$0xff] %v3123_v49  ;;  %v3125_v50 = vld [vmem:[#allocation2 + $0xd8] sm:$0xff]  ;;  %v3129_v51 = vld [vmem:[#allocation2 + $0xa0] sm:$0xff]  ;;  %v3131_v52 = vld [vmem:[#allocation2 + $0xa8] sm:$0xff] }
  0x21   :  { %342 = vmatpush.msrb.mxu2 %v3056_v28  ;;  %362 = vmatpush.msrb.mxu3 %v3058_v29  ;;  %4402 = vst [vmem:[#allocation13_spill] sm:$0xff] %v3125_v50  ;;  %v3135_v53 = vld [vmem:[#allocation2 + $0xb0] sm:$0xff]  ;;  %v3137_v54 = vld [vmem:[#allocation2 + $0xb8] sm:$0xff]  ;;  %v3141_v55 = vld [vmem:[#allocation2 + $0x80] sm:$0xff] }
  0x22   :  { %303 = vmatpush.msrb.mxu0 %v3062_v30  ;;  %323 = vmatpush.msrb.mxu1 %v3064_v31  ;;  %4403 = vst [vmem:[#allocation14_spill] sm:$0xff] %v3129_v51  ;;  %v3143_v56 = vld [vmem:[#allocation2 + $0x88] sm:$0xff]  ;;  %v3147_v57 = vld [vmem:[#allocation2 + $0x90] sm:$0xff]  ;;  %v3149_v58 = vld [vmem:[#allocation2 + $0x98] sm:$0xff] }
  0x23   :  { %343 = vmatpush.msrb.mxu2 %v3068_v32  ;;  %363 = vmatpush.msrb.mxu3 %v3070_v33  ;;  %4404 = vst [vmem:[#allocation15_spill] sm:$0xff] %v3131_v52  ;;  %v158_v59 = vld [vmem:[%s4269_s0 + $0x18] sm:$0xff]  ;;  %v3160_v60 = vld [vmem:[#allocation2 + $0x60] sm:$0xff]  ;;  %v3162_v61 = vld [vmem:[#allocation2 + $0x68] sm:$0xff] }
  0x24   :  { %304 = vmatpush.msrb.mxu0 %v3074_v34  ;;  %324 = vmatpush.msrb.mxu1 %v3076_v35  ;;  %4405 = vst [vmem:[#allocation16_spill] sm:$0xff] %v3135_v53  ;;  %v3166_v62 = vld [vmem:[#allocation2 + $0x70] sm:$0xff]  ;;  %v3168_v63 = vld [vmem:[#allocation2 + $0x78] sm:$0xff]  ;;  %v3172_v0 = vld [vmem:[#allocation2 + $0x40] sm:$0xff] }
  0x25   :  { %344 = vmatpush.msrb.mxu2 %v3080_v36  ;;  %364 = vmatpush.msrb.mxu3 %v3082_v37  ;;  %4406 = vst [vmem:[#allocation17_spill] sm:$0xff] %v3137_v54  ;;  %v3174_v1 = vld [vmem:[#allocation2 + $0x48] sm:$0xff]  ;;  %v3178_v2 = vld [vmem:[#allocation2 + $0x50] sm:$0xff]  ;;  %v3180_v3 = vld [vmem:[#allocation2 + $0x58] sm:$0xff] }
  0x26   :  { %305 = vmatpush.msrb.mxu0 %v3086_v38  ;;  %325 = vmatpush.msrb.mxu1 %v3088_v39  ;;  %4407 = vst [vmem:[#allocation18_spill] sm:$0xff] %v3141_v55  ;;  %v3184_v4 = vld [vmem:[#allocation2 + $0x20] sm:$0xff]  ;;  %v3186_v5 = vld [vmem:[#allocation2 + $0x28] sm:$0xff]  ;;  %v3190_v6 = vld [vmem:[#allocation2 + $0x30] sm:$0xff] }
  0x27   :  { %345 = vmatpush.msrb.mxu2 %v3092_v40  ;;  %365 = vmatpush.msrb.mxu3 %v3094_v41  ;;  %4408 = vst [vmem:[#allocation19_spill] sm:$0xff] %v3143_v56  ;;  %v3192_v7 = vld [vmem:[#allocation2 + $0x38] sm:$0xff]  ;;  %v3196_v8 = vld [vmem:[#allocation2] sm:$0xff]  ;;  %v3198_v25 = vld [vmem:[#allocation2 + $0x8] sm:$0xff] }
  0x28   :  { %2536 = vmatmul.msk.f32.gmra.mxu0 %vm169_vm0, %v157_v42  ;;  %2540 = vmatmul.msk.f32.gmra.mxu1 %vm169_vm0, %v157_v42  ;;  %4409 = vst [vmem:[#allocation20_spill] sm:$0xff] %v3147_v57 }
  0x29   :  { %2544 = vmatmul.msk.f32.gmra.mxu2 %vm169_vm0, %v157_v42  ;;  %2548 = vmatmul.msk.f32.gmra.mxu3 %vm169_vm0, %v157_v42  ;;  %4410 = vst [vmem:[#allocation21_spill] sm:$0xff] %v3149_v58  ;;  %v3202_v42 = vld [vmem:[#allocation2 + $0x10] sm:$0xff] }
  0x2a   :  { %306 = vmatpush.msrb.mxu0 %v3105_v43  ;;  %326 = vmatpush.msrb.mxu1 %v3107_v44  ;;  %4411 = vst [vmem:[#allocation22_spill] sm:$0xff] %v3160_v60 }
  0x2b   :  { %346 = vmatpush.msrb.mxu2 %v3111_v45  ;;  %366 = vmatpush.msrb.mxu3 %v3113_v46  ;;  %4412 = vst [vmem:[#allocation23_spill] sm:$0xff] %v3162_v61 }
  0x2c   :  { %307 = vmatpush.msrb.mxu0 %v3117_v47  ;;  %327 = vmatpush.msrb.mxu1 %v3119_v48  ;;  %4413 = vst [vmem:[#allocation24_spill] sm:$0xff] %v3166_v62 }
  0x2d   :  { %347 = vmatpush.msrb.mxu2 %v3123_v49  ;;  %367 = vmatpush.msrb.mxu3 %v3125_v50  ;;  %4414 = vst [vmem:[#allocation25_spill] sm:$0xff] %v3168_v63 }
  0x2e   :  { %308 = vmatpush.msrb.mxu0 %v3129_v51  ;;  %328 = vmatpush.msrb.mxu1 %v3131_v52  ;;  %4415 = vst [vmem:[#allocation26_spill] sm:$0xff] %v3172_v0 }
  0x2f   :  { %348 = vmatpush.msrb.mxu2 %v3135_v53  ;;  %368 = vmatpush.msrb.mxu3 %v3137_v54  ;;  %4416 = vst [vmem:[#allocation27_spill] sm:$0xff] %v3174_v1 }
  0x30   :  { %309 = vmatpush.msrb.mxu0 %v3141_v55  ;;  %329 = vmatpush.msrb.mxu1 %v3143_v56  ;;  %4417 = vst [vmem:[#allocation28_spill] sm:$0xff] %v3178_v2 }
  0x31   :  { %349 = vmatpush.msrb.mxu2 %v3147_v57  ;;  %369 = vmatpush.msrb.mxu3 %v3149_v58  ;;  %4418 = vst [vmem:[#allocation29_spill] sm:$0xff] %v3180_v3 }
  0x32   :  { %2537 = vmatmul.msk.f32.gmra.mxu0 %vm169_vm0, %v158_v59  ;;  %2541 = vmatmul.msk.f32.gmra.mxu1 %vm169_vm0, %v158_v59  ;;  %4419 = vst [vmem:[#allocation30_spill] sm:$0xff] %v3184_v4 }
  0x33   :  { %2545 = vmatmul.msk.f32.gmra.mxu2 %vm169_vm0, %v158_v59  ;;  %2549 = vmatmul.msk.f32.gmra.mxu3 %vm169_vm0, %v158_v59  ;;  %4420 = vst [vmem:[#allocation31_spill] sm:$0xff] %v3186_v5  ;;  %v3204_v59 = vld [vmem:[#allocation2 + $0x18] sm:$0xff] }
  0x34   :  { %310 = vmatpush.msrb.mxu0 %v3160_v60  ;;  %330 = vmatpush.msrb.mxu1 %v3162_v61  ;;  %4421 = vst [vmem:[#allocation32_spill] sm:$0xff] %v3190_v6 }
  0x35   :  { %350 = vmatpush.msrb.mxu2 %v3166_v62  ;;  %370 = vmatpush.msrb.mxu3 %v3168_v63  ;;  %4422 = vst [vmem:[#allocation33_spill] sm:$0xff] %v3192_v7 }
  0x36   :  { %311 = vmatpush.msrb.mxu0 %v3172_v0  ;;  %331 = vmatpush.msrb.mxu1 %v3174_v1  ;;  %4423 = vst [vmem:[#allocation34_spill] sm:$0xff] %v3196_v8 }
  0x37   :  { %351 = vmatpush.msrb.mxu2 %v3178_v2  ;;  %371 = vmatpush.msrb.mxu3 %v3180_v3  ;;  %4424 = vst [vmem:[#allocation35_spill] sm:$0xff] %v3198_v25  ;;  %v2898_v3 = vmov 0.0  }
  0x38   :  { %312 = vmatpush.msrb.mxu0 %v3184_v4  ;;  %332 = vmatpush.msrb.mxu1 %v3186_v5  ;;  %4425 = vst [vmem:[#allocation36_spill] sm:$0xff] %v3202_v42 }
  0x39   :  { %4426 = vst [vmem:[#allocation37_spill] sm:$0xff] %v3204_v59  ;;  %352 = vmatpush.msrb.mxu2 %v3190_v6  ;;  %372 = vmatpush.msrb.mxu3 %v3192_v7 }
  0x3a   :  { %313 = vmatpush.msrb.mxu0 %v3196_v8  ;;  %333 = vmatpush.msrb.mxu1 %v3198_v25 }
  0x3b   :  { %353 = vmatpush.msrb.mxu2 %v3202_v42  ;;  %373 = vmatpush.msrb.mxu3 %v3204_v59 }
  0x3c   :  { %314 = vmatmul.f32.vlgmr.msrb.gmra.mxu0 %v2898_v3  ;;  %334 = vmatmul.f32.vlgmr.msrb.gmra.mxu1 %v2898_v3 }
  0x3d   :  { %354 = vmatmul.f32.vlgmr.msrb.gmra.mxu2 %v2898_v3  ;;  %374 = vmatmul.f32.vlgmr.msrb.gmra.mxu3 %v2898_v3  ;;  %v4427_v3 = vld [vmem:[#allocation29_spill] sm:$0xff] }
  0x3e   :  { %453 = vmatpush.msra.mxu0 %v2995_v9  ;;  %473 = vmatpush.msra.mxu1 %v2997_v10 }
  0x3f   :  { %493 = vmatpush.msra.mxu2 %v3001_v11  ;;  %513 = vmatpush.msra.mxu3 %v3003_v12 }
  0x40   :  { %454 = vmatpush.msra.mxu0 %v3007_v13  ;;  %474 = vmatpush.msra.mxu1 %v3009_v14 }
  0x41   :  { %494 = vmatpush.msra.mxu2 %v3013_v15  ;;  %514 = vmatpush.msra.mxu3 %v3015_v16 }
  0x42   :  { %455 = vmatpush.msra.mxu0 %v3019_v17  ;;  %475 = vmatpush.msra.mxu1 %v3021_v18 }
  0x43   :  { %495 = vmatpush.msra.mxu2 %v3025_v19  ;;  %515 = vmatpush.msra.mxu3 %v3027_v20 }
  0x44   :  { %456 = vmatpush.msra.mxu0 %v3031_v21  ;;  %476 = vmatpush.msra.mxu1 %v3033_v22 }
  0x45   :  { %496 = vmatpush.msra.mxu2 %v3037_v23  ;;  %516 = vmatpush.msra.mxu3 %v3039_v24 }
  0x46   :  { %457 = vmatpush.msra.mxu0 %v3050_v26  ;;  %477 = vmatpush.msra.mxu1 %v3052_v27 }
  0x47   :  { %497 = vmatpush.msra.mxu2 %v3056_v28  ;;  %517 = vmatpush.msra.mxu3 %v3058_v29 }
  0x48   :  { %458 = vmatpush.msra.mxu0 %v3062_v30  ;;  %478 = vmatpush.msra.mxu1 %v3064_v31 }
  0x49   :  { %498 = vmatpush.msra.mxu2 %v3068_v32  ;;  %518 = vmatpush.msra.mxu3 %v3070_v33 }
  0x4a   :  { %459 = vmatpush.msra.mxu0 %v3074_v34  ;;  %479 = vmatpush.msra.mxu1 %v3076_v35 }
  0x4b   :  { %499 = vmatpush.msra.mxu2 %v3080_v36  ;;  %519 = vmatpush.msra.mxu3 %v3082_v37 }
  0x4c   :  { %460 = vmatpush.msra.mxu0 %v3086_v38  ;;  %480 = vmatpush.msra.mxu1 %v3088_v39 }
  0x4d   :  { %500 = vmatpush.msra.mxu2 %v3092_v40  ;;  %520 = vmatpush.msra.mxu3 %v3094_v41 }
  0x4e   :  { %461 = vmatpush.msra.mxu0 %v3105_v43  ;;  %481 = vmatpush.msra.mxu1 %v3107_v44 }
  0x4f   :  { %501 = vmatpush.msra.mxu2 %v3111_v45  ;;  %521 = vmatpush.msra.mxu3 %v3113_v46 }
  0x50   :  { %462 = vmatpush.msra.mxu0 %v3117_v47  ;;  %482 = vmatpush.msra.mxu1 %v3119_v48 }
  0x51   :  { %502 = vmatpush.msra.mxu2 %v3123_v49  ;;  %522 = vmatpush.msra.mxu3 %v3125_v50 }
  0x52   :  { %463 = vmatpush.msra.mxu0 %v3129_v51  ;;  %483 = vmatpush.msra.mxu1 %v3131_v52 }
  0x53   :  { %503 = vmatpush.msra.mxu2 %v3135_v53  ;;  %523 = vmatpush.msra.mxu3 %v3137_v54 }
  0x54   :  { %464 = vmatpush.msra.mxu0 %v3141_v55  ;;  %484 = vmatpush.msra.mxu1 %v3143_v56 }
  0x55   :  { %504 = vmatpush.msra.mxu2 %v3147_v57  ;;  %524 = vmatpush.msra.mxu3 %v3149_v58 }
  0x56   :  { %465 = vmatpush.msra.mxu0 %v3160_v60  ;;  %485 = vmatpush.msra.mxu1 %v3162_v61 }
  0x57   :  { %505 = vmatpush.msra.mxu2 %v3166_v62  ;;  %525 = vmatpush.msra.mxu3 %v3168_v63 }
  0x58   :  { %466 = vmatpush.msra.mxu0 %v3172_v0  ;;  %486 = vmatpush.msra.mxu1 %v3174_v1 }
  0x59   :  { %506 = vmatpush.msra.mxu2 %v3178_v2  ;;  %526 = vmatpush.msra.mxu3 %v4427_v3 }
  0x5a   :  { %467 = vmatpush.msra.mxu0 %v3184_v4  ;;  %487 = vmatpush.msra.mxu1 %v3186_v5 }
  0x5b   :  { %507 = vmatpush.msra.mxu2 %v3190_v6  ;;  %527 = vmatpush.msra.mxu3 %v3192_v7 }
  0x5c   :  { %468 = vmatpush.msra.mxu0 %v3196_v8  ;;  %488 = vmatpush.msra.mxu1 %v3198_v25 }
  0x5d   :  { %508 = vmatpush.msra.mxu2 %v3202_v42  ;;  %528 = vmatpush.msra.mxu3 %v3204_v59 }
  0x5e   :  { %596 = vmatpush.msrb.mxu0 %v2995_v9  ;;  %616 = vmatpush.msrb.mxu1 %v2997_v10 }
  0x5f   :  { %636 = vmatpush.msrb.mxu2 %v3001_v11  ;;  %656 = vmatpush.msrb.mxu3 %v3003_v12 }
  0x60   :  { %597 = vmatpush.msrb.mxu0 %v3007_v13  ;;  %617 = vmatpush.msrb.mxu1 %v3009_v14 }
  0x61   :  { %637 = vmatpush.msrb.mxu2 %v3013_v15  ;;  %657 = vmatpush.msrb.mxu3 %v3015_v16 }
  0x62   :  { %598 = vmatpush.msrb.mxu0 %v3019_v17  ;;  %618 = vmatpush.msrb.mxu1 %v3021_v18 }
  0x63   :  { %638 = vmatpush.msrb.mxu2 %v3025_v19  ;;  %658 = vmatpush.msrb.mxu3 %v3027_v20 }
  0x64   :  { %599 = vmatpush.msrb.mxu0 %v3031_v21  ;;  %619 = vmatpush.msrb.mxu1 %v3033_v22 }
  0x65   :  { %639 = vmatpush.msrb.mxu2 %v3037_v23  ;;  %659 = vmatpush.msrb.mxu3 %v3039_v24 }
  0x66   :  { %600 = vmatpush.msrb.mxu0 %v3050_v26  ;;  %620 = vmatpush.msrb.mxu1 %v3052_v27 }
  0x67   :  { %640 = vmatpush.msrb.mxu2 %v3056_v28  ;;  %660 = vmatpush.msrb.mxu3 %v3058_v29 }
  0x68   :  { %601 = vmatpush.msrb.mxu0 %v3062_v30  ;;  %621 = vmatpush.msrb.mxu1 %v3064_v31 }
  0x69   :  { %641 = vmatpush.msrb.mxu2 %v3068_v32  ;;  %661 = vmatpush.msrb.mxu3 %v3070_v33 }
  0x6a   :  { %602 = vmatpush.msrb.mxu0 %v3074_v34  ;;  %622 = vmatpush.msrb.mxu1 %v3076_v35 }
  0x6b   :  { %642 = vmatpush.msrb.mxu2 %v3080_v36  ;;  %662 = vmatpush.msrb.mxu3 %v3082_v37 }
  0x6c   :  { %603 = vmatpush.msrb.mxu0 %v3086_v38  ;;  %623 = vmatpush.msrb.mxu1 %v3088_v39 }
  0x6d   :  { %643 = vmatpush.msrb.mxu2 %v3092_v40  ;;  %663 = vmatpush.msrb.mxu3 %v3094_v41 }
  0x6e   :  { %604 = vmatpush.msrb.mxu0 %v3105_v43  ;;  %624 = vmatpush.msrb.mxu1 %v3107_v44 }
  0x6f   :  { %644 = vmatpush.msrb.mxu2 %v3111_v45  ;;  %664 = vmatpush.msrb.mxu3 %v3113_v46 }
  0x70   :  { %605 = vmatpush.msrb.mxu0 %v3117_v47  ;;  %625 = vmatpush.msrb.mxu1 %v3119_v48 }
  0x71   :  { %645 = vmatpush.msrb.mxu2 %v3123_v49  ;;  %665 = vmatpush.msrb.mxu3 %v3125_v50 }
  0x72   :  { %606 = vmatpush.msrb.mxu0 %v3129_v51  ;;  %626 = vmatpush.msrb.mxu1 %v3131_v52 }
  0x73   :  { %646 = vmatpush.msrb.mxu2 %v3135_v53  ;;  %666 = vmatpush.msrb.mxu3 %v3137_v54 }
  0x74   :  { %607 = vmatpush.msrb.mxu0 %v3141_v55  ;;  %627 = vmatpush.msrb.mxu1 %v3143_v56 }
  0x75   :  { %647 = vmatpush.msrb.mxu2 %v3147_v57  ;;  %667 = vmatpush.msrb.mxu3 %v3149_v58 }
  0x76   :  { %608 = vmatpush.msrb.mxu0 %v3160_v60  ;;  %628 = vmatpush.msrb.mxu1 %v3162_v61 }
  0x77   :  { %648 = vmatpush.msrb.mxu2 %v3166_v62  ;;  %668 = vmatpush.msrb.mxu3 %v3168_v63 }
  0x78   :  { %609 = vmatpush.msrb.mxu0 %v3172_v0  ;;  %629 = vmatpush.msrb.mxu1 %v3174_v1 }
  0x79   :  { %649 = vmatpush.msrb.mxu2 %v3178_v2  ;;  %669 = vmatpush.msrb.mxu3 %v4427_v3 }
  0x7a   :  { %610 = vmatpush.msrb.mxu0 %v3184_v4  ;;  %630 = vmatpush.msrb.mxu1 %v3186_v5  ;;  %v159_v4 = vld [vmem:[%s4272_s3] sm:$0xf] }
  0x7b   :  { %650 = vmatpush.msrb.mxu2 %v3190_v6  ;;  %670 = vmatpush.msrb.mxu3 %v3192_v7  ;;  %v161_v0 = vperm.slane %v159_v4, 0  ;;  %v162_v6 = vperm.slane %v159_v4, 1 }
  0x7c   :  { %611 = vmatpush.msrb.mxu0 %v3196_v8  ;;  %631 = vmatpush.msrb.mxu1 %v3198_v25  ;;  %v163_v25 = vperm.slane %v159_v4, 2 }
  0x7d   :  { %651 = vmatpush.msrb.mxu2 %v3202_v42  ;;  %671 = vmatpush.msrb.mxu3 %v3204_v59  ;;  %v164_v42 = vperm.slane %v159_v4, 3 }
  0x91   :  { %v199_v1 = vpop.f32.mrf.mxu0  ;;  %v228_v2 = vpop.f32.mrf.mxu1 }
  0x98   :  { %v257_v3 = vpop.f32.mrf.mxu2  ;;  %v286_v5 = vpop.f32.mrf.mxu3 }
  0x9b   :  { %v202_v63 = vpop.f32.mrf.mxu0  ;;  %v231_v7 = vpop.f32.mrf.mxu1 }
  0x9c   :  { %v3343_v62 = vadd.f32 %v202_v63, %v161_v0  ;;  %v3345_v8 = vadd.f32 %v231_v7, %v162_v6 }
  0x9e   :  { %4428 = vst [vmem:[#allocation38_spill] sm:$0xff] %v3343_v62 }
  0x9f   :  { %4429 = vst [vmem:[#allocation39_spill] sm:$0xff] %v3345_v8 }
  0xa2   :  { %v260_v61 = vpop.f32.mrf.mxu2  ;;  %v289_v59 = vpop.f32.mrf.mxu3 }
  0xa3   :  { %v3347_v60 = vadd.f32 %v260_v61, %v163_v25  ;;  %v3349_v58 = vadd.f32 %v289_v59, %v164_v42 }
  0xa5   :  { %4430 = vst [vmem:[#allocation40_spill] sm:$0xff] %v3347_v60  ;;  %v205_v57 = vpop.f32.mrf.mxu0  ;;  %v234_v56 = vpop.f32.mrf.mxu1 }
  0xa6   :  { %4431 = vst [vmem:[#allocation41_spill] sm:$0xff] %v3349_v58  ;;  %v3351_v55 = vadd.f32 %v205_v57, %v161_v0  ;;  %v3353_v54 = vadd.f32 %v234_v56, %v162_v6  ;;  %v3367_v56 = vadd.f32 %v199_v1, %v161_v0 }
  0xa8   :  { %4432 = vst [vmem:[#allocation42_spill] sm:$0xff] %v3351_v55 }
  0xa9   :  { %4433 = vst [vmem:[#allocation43_spill] sm:$0xff] %v3353_v54  ;;  %v3369_v54 = vadd.f32 %v228_v2, %v162_v6 }
  0xaa   :  { %4440 = vst [vmem:[#allocation50_spill] sm:$0xff] %v3367_v56 }
  0xab   :  { %4441 = vst [vmem:[#allocation51_spill] sm:$0xff] %v3369_v54 }
  0xac   :  { %v263_v53 = vpop.f32.mrf.mxu2  ;;  %v292_v52 = vpop.f32.mrf.mxu3 }
  0xad   :  { %v3355_v63 = vadd.f32 %v263_v53, %v163_v25  ;;  %v3357_v7 = vadd.f32 %v292_v52, %v164_v42 }
  0xaf   :  { %4434 = vst [vmem:[#allocation44_spill] sm:$0xff] %v3355_v63  ;;  %v208_v8 = vpop.f32.mrf.mxu0  ;;  %v237_v4 = vpop.f32.mrf.mxu1 }
  0xb0   :  { %4435 = vst [vmem:[#allocation45_spill] sm:$0xff] %v3357_v7  ;;  %v3359_v62 = vadd.f32 %v208_v8, %v161_v0  ;;  %v3361_v61 = vadd.f32 %v237_v4, %v162_v6  ;;  %v3373_v4 = vadd.f32 %v286_v5, %v164_v42 }
  0xb2   :  { %4436 = vst [vmem:[#allocation46_spill] sm:$0xff] %v3359_v62 }
  0xb3   :  { %4437 = vst [vmem:[#allocation47_spill] sm:$0xff] %v3361_v61 }
  0xb4   :  { %4442 = vst [vmem:[#allocation52_spill] sm:$0xff] %v3373_v4 }
  0xb6   :  { %v266_v59 = vpop.f32.mrf.mxu2  ;;  %v295_v60 = vpop.f32.mrf.mxu3 }
  0xb7   :  { %v3363_v58 = vadd.f32 %v266_v59, %v163_v25  ;;  %v3365_v57 = vadd.f32 %v295_v60, %v164_v42 }
  0xb9   :  { %4438 = vst [vmem:[#allocation48_spill] sm:$0xff] %v3363_v58  ;;  %v315_v53 = vpop.f32.mrf.mxu0  ;;  %v335_v63 = vpop.f32.mrf.mxu1 }
  0xba   :  { %4439 = vst [vmem:[#allocation49_spill] sm:$0xff] %v3365_v57  ;;  %v316_v52 = vadd.f32 %v315_v53, %v3367_v56  ;;  %v336_v7 = vadd.f32 %v335_v63, %v3369_v54  ;;  %v3376_v63 = vadd.f32 %v257_v3, %v163_v25 }
  0xbc   :  { %v2550_v8 = vmul.f32 -1.442695, %v316_v52  ;;  %v2551_v62 = vmul.f32 -1.442695, %v336_v7  ;;  %4443 = vst [vmem:[#allocation53_spill] sm:$0xff] %v3376_v63 }
  0xbe   :  { %2597 = vpow2.f32 %v2550_v8 }
  0xbf   :  { %2599 = vpow2.f32 %v2551_v62 }
  0xc0   :  { %v375_v59 = vpop.f32.mrf.mxu3  ;;  %v355_v53 = vpop.f32.mrf.mxu2 }
  0xc1   :  { %v376_v60 = vadd.f32 %v375_v59, %v3373_v4  ;;  %v356_v5 = vadd.f32 %v355_v53, %v3376_v63 }
  0xc3   :  { %v2552_v58 = vmul.f32 -1.442695, %v376_v60 }
  0xc4   :  { %v2598_v0 = vpop.eup %2597 }
  0xc5   :  { %v2600_v1 = vpop.eup %2599  ;;  %v381_v2 = vadd.f32 1.0, %v2598_v0  ;;  %2601 = vpow2.f32 %v2552_v58 }
  0xc6   :  { %v400_v6 = vadd.f32 1.0, %v2600_v1 }
  0xc7   :  { %2603 = vrcp.f32 %v381_v2  ;;  %v393_v61 = vand.u32 2147483648, %v381_v2  ;;  %v391_v1 = vand.u32 2147483647, %v381_v2  ;;  %vm387_vm3 = vweird.f32 %v381_v2 }
  0xc8   :  { %2605 = vrcp.f32 %v400_v6  ;;  %v412_v58 = vand.u32 2147483648, %v400_v6  ;;  %v410_v25 = vand.u32 2147483647, %v400_v6  ;;  %vm406_vm4 = vweird.f32 %v400_v6 }
  0xc9   :  { %v394_v53 = vor.u32 1.1754944e-38, %v393_v61  ;;  %vm392_vm6 = vcmp.eq.f32.partialorder %v391_v1, 8.507059e+37 }
  0xca   :  { %v413_v54 = vor.u32 1.1754944e-38, %v412_v58  ;;  %vm411_vm8 = vcmp.eq.f32.partialorder %v410_v25, 8.507059e+37 }
  0xcb   :  { %v2602_v57 = vpop.eup %2601 }
  0xcc   :  { %v420_v7 = vadd.f32 1.0, %v2602_v57 }
  0xcd   :  { %v2604_v52 = vpop.eup %2603 }
  0xce   :  { %v2606_v62 = vpop.eup %2605  ;;  %v383_v42 = vmul.f32 %v2604_v52, %v381_v2  ;;  %2607 = vrcp.f32 %v420_v7  ;;  %vm388_vm1 = vweird.f32 %v2604_v52  ;;  %vm426_vm10 = vweird.f32 %v420_v7 }
  0xcf   :  { %v402_v8 = vmul.f32 %v2606_v62, %v400_v6  ;;  %2609 = vtanh.f32 %v356_v5  ;;  %vm407_vm2 = vweird.f32 %v2606_v62  ;;  %vm389_vm5 = vmor %vm387_vm3, %vm388_vm1  ;;  %v430_v61 = vand.u32 2147483647, %v420_v7 }
  0xd0   :  { %v384_v59 = vsub.f32 1.0, %v383_v42  ;;  %vm408_vm7 = vmor %vm406_vm4, %vm407_vm2 }
  0xd1   :  { %v403_v60 = vsub.f32 1.0, %v402_v8  ;;  %vm431_vm12 = vcmp.eq.f32.partialorder %v430_v61, 8.507059e+37 }
  0xd2   :  { %v385_v0 = vmul.f32 %v2604_v52, %v384_v59 }
  0xd3   :  { %v404_v55 = vmul.f32 %v2606_v62, %v403_v60 }
  0xd4   :  { %v2608_v3 = vpop.eup %2607  ;;  %v386_v57 = vadd.f32 %v2604_v52, %v385_v0 }
  0xd5   :  { %v405_v63 = vadd.f32 %v2606_v62, %v404_v55  ;;  %v422_v4 = vmul.f32 %v2608_v3, %v420_v7  ;;  %v2610_v5 = vpop.eup %2609  ;;  %vm427_vm9 = vweird.f32 %v2608_v3  ;;  %v432_v55 = vand.u32 2147483648, %v420_v7 }
  0xd6   :  { %v390_v42 = vsel %vm389_vm5, %v2604_v52, %v386_v57  ;;  %vm428_vm11 = vmor %vm426_vm10, %vm427_vm9 }
  0xd7   :  { %v395_v8 = vsel %vm392_vm6, %v394_v53, %v390_v42  ;;  %v409_v59 = vsel %vm408_vm7, %v2606_v62, %v405_v63  ;;  %v423_v56 = vsub.f32 1.0, %v422_v4  ;;  %v433_v52 = vor.u32 1.1754944e-38, %v432_v55  ;;  %v4472_v42 = vld [vmem:[#allocation52_spill] sm:$0xff] }
  0xd8   :  { %v414_v60 = vsel %vm411_vm8, %v413_v54, %v409_v59  ;;  %v437_v51 = vmul.f32 %v2610_v5, %v395_v8  ;;  %v448_v5 = vrot.slane %v4472_v42, 4 }
  0xd9   :  { %v436_v50 = vmul.f32 0.0, %v414_v60  ;;  %v424_v49 = vmul.f32 %v2608_v3, %v423_v56  ;;  %v4471_v56 = vld [vmem:[#allocation51_spill] sm:$0xff] }
  0xda   :  { %v446_v7 = vrot.slane %v4471_v56, 4 }
  0xdb   :  { %v3379_v0 = vadd.f32 %v437_v51, %v436_v50  ;;  %v425_v2 = vadd.f32 %v2608_v3, %v424_v49  ;;  %v4468_v49 = vld [vmem:[#allocation36_spill] sm:$0xff]  ;;  %v4469_v50 = vld [vmem:[#allocation37_spill] sm:$0xff]  ;;  %v4470_v51 = vld [vmem:[#allocation50_spill] sm:$0xff] }
  0xdc   :  { %v445_v54 = vrot.slane %v4470_v51, 4 }
  0xdd   :  { %2611 = vtanh.f32 %v3379_v0  ;;  %v429_v6 = vsel %vm428_vm11, %v2608_v3, %v425_v2 }
  0xde   :  { %v434_v62 = vsel %vm431_vm12, %v433_v52, %v429_v6 }
  0xe3   :  { %v2612_v63 = vpop.eup %2611 }
  0xe4   :  { %v440_v4 = vmul.f32 %v2612_v63, %v434_v62  ;;  %v4473_v62 = vld [vmem:[#allocation53_spill] sm:$0xff] }
  0xe6   :  { %469 = vmatmul.f32.vlgmr.msra.gmra.mxu0 %v440_v4  ;;  %489 = vmatmul.f32.vlgmr.msra.gmra.mxu1 %v440_v4 }
  0xe7   :  { %509 = vmatmul.f32.vlgmr.msra.gmra.mxu2 %v440_v4  ;;  %529 = vmatmul.f32.vlgmr.msra.gmra.mxu3 %v440_v4  ;;  %v447_v4 = vrot.slane %v4473_v62, 4 }
  0xe8   :  { %751 = vmatpush.msra.mxu0 %v2995_v9  ;;  %771 = vmatpush.msra.mxu1 %v2997_v10  ;;  %v4444_v9 = vld [vmem:[#allocation12_spill] sm:$0xff]  ;;  %v4445_v10 = vld [vmem:[#allocation13_spill] sm:$0xff] }
  0xe9   :  { %791 = vmatpush.msra.mxu2 %v3001_v11  ;;  %811 = vmatpush.msra.mxu3 %v3003_v12  ;;  %v4446_v11 = vld [vmem:[#allocation14_spill] sm:$0xff]  ;;  %v4447_v12 = vld [vmem:[#allocation15_spill] sm:$0xff] }
  0xea   :  { %752 = vmatpush.msra.mxu0 %v3007_v13  ;;  %772 = vmatpush.msra.mxu1 %v3009_v14  ;;  %v4448_v13 = vld [vmem:[#allocation16_spill] sm:$0xff]  ;;  %v4449_v14 = vld [vmem:[#allocation17_spill] sm:$0xff] }
  0xeb   :  { %792 = vmatpush.msra.mxu2 %v3013_v15  ;;  %812 = vmatpush.msra.mxu3 %v3015_v16  ;;  %v4450_v15 = vld [vmem:[#allocation18_spill] sm:$0xff]  ;;  %v4451_v16 = vld [vmem:[#allocation19_spill] sm:$0xff] }
  0xec   :  { %753 = vmatpush.msra.mxu0 %v3019_v17  ;;  %773 = vmatpush.msra.mxu1 %v3021_v18  ;;  %v4452_v17 = vld [vmem:[#allocation20_spill] sm:$0xff]  ;;  %v4453_v18 = vld [vmem:[#allocation21_spill] sm:$0xff] }
  0xed   :  { %793 = vmatpush.msra.mxu2 %v3025_v19  ;;  %813 = vmatpush.msra.mxu3 %v3027_v20  ;;  %v4454_v19 = vld [vmem:[#allocation22_spill] sm:$0xff]  ;;  %v4455_v20 = vld [vmem:[#allocation23_spill] sm:$0xff] }
  0xee   :  { %754 = vmatpush.msra.mxu0 %v3031_v21  ;;  %774 = vmatpush.msra.mxu1 %v3033_v22  ;;  %v4456_v21 = vld [vmem:[#allocation24_spill] sm:$0xff]  ;;  %v4457_v22 = vld [vmem:[#allocation25_spill] sm:$0xff] }
  0xef   :  { %794 = vmatpush.msra.mxu2 %v3037_v23  ;;  %814 = vmatpush.msra.mxu3 %v3039_v24  ;;  %v4458_v23 = vld [vmem:[#allocation26_spill] sm:$0xff]  ;;  %v4459_v24 = vld [vmem:[#allocation27_spill] sm:$0xff] }
  0xf0   :  { %755 = vmatpush.msra.mxu0 %v3050_v26  ;;  %775 = vmatpush.msra.mxu1 %v3052_v27  ;;  %v4460_v26 = vld [vmem:[#allocation28_spill] sm:$0xff]  ;;  %v4461_v27 = vld [vmem:[#allocation29_spill] sm:$0xff] }
  0xf1   :  { %795 = vmatpush.msra.mxu2 %v3056_v28  ;;  %815 = vmatpush.msra.mxu3 %v3058_v29  ;;  %v4462_v28 = vld [vmem:[#allocation30_spill] sm:$0xff]  ;;  %v4463_v29 = vld [vmem:[#allocation31_spill] sm:$0xff] }
  0xf2   :  { %756 = vmatpush.msra.mxu0 %v3062_v30  ;;  %776 = vmatpush.msra.mxu1 %v3064_v31  ;;  %v4464_v30 = vld [vmem:[#allocation32_spill] sm:$0xff]  ;;  %v4465_v31 = vld [vmem:[#allocation33_spill] sm:$0xff] }
  0xf3   :  { %796 = vmatpush.msra.mxu2 %v3068_v32  ;;  %816 = vmatpush.msra.mxu3 %v3070_v33  ;;  %v4466_v32 = vld [vmem:[#allocation34_spill] sm:$0xff]  ;;  %v4467_v33 = vld [vmem:[#allocation35_spill] sm:$0xff] }
  0xf4   :  { %757 = vmatpush.msra.mxu0 %v3074_v34  ;;  %777 = vmatpush.msra.mxu1 %v3076_v35 }
  0xf5   :  { %797 = vmatpush.msra.mxu2 %v3080_v36  ;;  %817 = vmatpush.msra.mxu3 %v3082_v37 }
  0xf6   :  { %758 = vmatpush.msra.mxu0 %v3086_v38  ;;  %778 = vmatpush.msra.mxu1 %v3088_v39 }
  0xf7   :  { %798 = vmatpush.msra.mxu2 %v3092_v40  ;;  %818 = vmatpush.msra.mxu3 %v3094_v41 }
  0xf8   :  { %759 = vmatpush.msra.mxu0 %v3105_v43  ;;  %779 = vmatpush.msra.mxu1 %v3107_v44 }
  0xf9   :  { %799 = vmatpush.msra.mxu2 %v3111_v45  ;;  %819 = vmatpush.msra.mxu3 %v3113_v46 }
  0xfa   :  { %760 = vmatpush.msra.mxu0 %v3117_v47  ;;  %780 = vmatpush.msra.mxu1 %v3119_v48 }
  0xfb   :  { %800 = vmatpush.msra.mxu2 %v4444_v9  ;;  %820 = vmatpush.msra.mxu3 %v4445_v10 }
  0xfc   :  { %761 = vmatpush.msra.mxu0 %v4446_v11  ;;  %781 = vmatpush.msra.mxu1 %v4447_v12 }
  0xfd   :  { %801 = vmatpush.msra.mxu2 %v4448_v13  ;;  %821 = vmatpush.msra.mxu3 %v4449_v14 }
  0xfe   :  { %762 = vmatpush.msra.mxu0 %v4450_v15  ;;  %782 = vmatpush.msra.mxu1 %v4451_v16 }
  0xff   :  { %802 = vmatpush.msra.mxu2 %v4452_v17  ;;  %822 = vmatpush.msra.mxu3 %v4453_v18 }
 0x100   :  { %763 = vmatpush.msra.mxu0 %v4454_v19  ;;  %783 = vmatpush.msra.mxu1 %v4455_v20 }
 0x101   :  { %803 = vmatpush.msra.mxu2 %v4456_v21  ;;  %823 = vmatpush.msra.mxu3 %v4457_v22 }
 0x102   :  { %764 = vmatpush.msra.mxu0 %v4458_v23  ;;  %784 = vmatpush.msra.mxu1 %v4459_v24 }
 0x103   :  { %804 = vmatpush.msra.mxu2 %v4460_v26  ;;  %824 = vmatpush.msra.mxu3 %v4461_v27 }
 0x104   :  { %765 = vmatpush.msra.mxu0 %v4462_v28  ;;  %785 = vmatpush.msra.mxu1 %v4463_v29 }
 0x105   :  { %805 = vmatpush.msra.mxu2 %v4464_v30  ;;  %825 = vmatpush.msra.mxu3 %v4465_v31 }
 0x106   :  { %766 = vmatpush.msra.mxu0 %v4466_v32  ;;  %786 = vmatpush.msra.mxu1 %v4467_v33 }
 0x107   :  { %806 = vmatpush.msra.mxu2 %v4468_v49  ;;  %826 = vmatpush.msra.mxu3 %v4469_v50 }
 0x163   :  { %v470_v58 = vpop.f32.mrf.mxu0  ;;  %v490_v1 = vpop.f32.mrf.mxu1 }
 0x164   :  { %v471_v25 = vadd.f32 %v470_v58, %v445_v54  ;;  %v491_v3 = vadd.f32 %v490_v1, %v446_v7 }
 0x166   :  { %v2553_v57 = vmul.f32 -1.442695, %v471_v25  ;;  %v2554_v53 = vmul.f32 -1.442695, %v491_v3 }
 0x168   :  { %2613 = vpow2.f32 %v2553_v57 }
 0x169   :  { %2615 = vpow2.f32 %v2554_v53 }
 0x16a   :  { %v530_v8 = vpop.f32.mrf.mxu3  ;;  %v510_v52 = vpop.f32.mrf.mxu2 }
 0x16b   :  { %v531_v59 = vadd.f32 %v530_v8, %v448_v5  ;;  %v511_v56 = vadd.f32 %v510_v52, %v447_v4 }
 0x16d   :  { %v2555_v60 = vmul.f32 -1.442695, %v531_v59 }
 0x16e   :  { %v2614_v2 = vpop.eup %2613 }
 0x16f   :  { %v2616_v55 = vpop.eup %2615  ;;  %v536_v61 = vadd.f32 1.0, %v2614_v2  ;;  %2617 = vpow2.f32 %v2555_v60 }
 0x170   :  { %v555_v6 = vadd.f32 1.0, %v2616_v55 }
 0x171   :  { %2619 = vrcp.f32 %v536_v61  ;;  %v548_v57 = vand.u32 2147483648, %v536_v61  ;;  %v546_v5 = vand.u32 2147483647, %v536_v61  ;;  %vm542_vm15 = vweird.f32 %v536_v61 }
 0x172   :  { %2621 = vrcp.f32 %v555_v6  ;;  %v567_v53 = vand.u32 2147483648, %v555_v6  ;;  %v565_v59 = vand.u32 2147483647, %v555_v6  ;;  %vm561_vm0 = vweird.f32 %v555_v6 }
 0x173   :  { %v549_v55 = vor.u32 1.1754944e-38, %v548_v57  ;;  %vm547_vm3 = vcmp.eq.f32.partialorder %v546_v5, 8.507059e+37 }
 0x174   :  { %v568_v62 = vor.u32 1.1754944e-38, %v567_v53  ;;  %vm566_vm4 = vcmp.eq.f32.partialorder %v565_v59, 8.507059e+37 }
 0x175   :  { %v2618_v63 = vpop.eup %2617 }
 0x176   :  { %v575_v51 = vadd.f32 1.0, %v2618_v63 }
 0x177   :  { %v2620_v54 = vpop.eup %2619 }
 0x178   :  { %v2622_v7 = vpop.eup %2621  ;;  %v538_v58 = vmul.f32 %v2620_v54, %v536_v61  ;;  %2623 = vrcp.f32 %v575_v51  ;;  %vm543_vm13 = vweird.f32 %v2620_v54  ;;  %v587_v57 = vand.u32 2147483648, %v575_v51 }
 0x179   :  { %v557_v1 = vmul.f32 %v2622_v7, %v555_v6  ;;  %2625 = vtanh.f32 %v511_v56  ;;  %vm562_vm14 = vweird.f32 %v2622_v7  ;;  %vm544_vm1 = vmor %vm542_vm15, %vm543_vm13  ;;  %vm581_vm6 = vweird.f32 %v575_v51 }
 0x17a   :  { %v539_v25 = vsub.f32 1.0, %v538_v58  ;;  %vm563_vm2 = vmor %vm561_vm0, %vm562_vm14  ;;  %v588_v5 = vor.u32 1.1754944e-38, %v587_v57  ;;  %v3508_v57 = vld [vmem:[#allocation2 + $0x170] sm:$0xff] }
 0x17b   :  { %v558_v3 = vsub.f32 1.0, %v557_v1 }
 0x17c   :  { %v540_v42 = vmul.f32 %v2620_v54, %v539_v25 }
 0x17d   :  { %v559_v8 = vmul.f32 %v2622_v7, %v558_v3 }
 0x17e   :  { %v2624_v60 = vpop.eup %2623  ;;  %v541_v2 = vadd.f32 %v2620_v54, %v540_v42 }
 0x17f   :  { %v560_v52 = vadd.f32 %v2622_v7, %v559_v8  ;;  %v577_v63 = vmul.f32 %v2624_v60, %v575_v51  ;;  %v2626_v56 = vpop.eup %2625  ;;  %vm582_vm5 = vweird.f32 %v2624_v60 }
 0x180   :  { %v545_v4 = vsel %vm544_vm1, %v2620_v54, %v541_v2  ;;  %v585_v54 = vand.u32 2147483647, %v575_v51  ;;  %vm583_vm7 = vmor %vm581_vm6, %vm582_vm5  ;;  %v3463_v51 = vld [vmem:[#allocation2 + $0x1f8] sm:$0xff]  ;;  %v3469_v2 = vld [vmem:[#allocation2 + $0x1c8] sm:$0xff] }
 0x181   :  { %v550_v58 = vsel %vm547_vm3, %v549_v55, %v545_v4  ;;  %v564_v1 = vsel %vm563_vm2, %v2622_v7, %v560_v52  ;;  %v578_v25 = vsub.f32 1.0, %v577_v63  ;;  %v3472_v55 = vld [vmem:[#allocation2 + $0x1d0] sm:$0xff]  ;;  %v3475_v52 = vld [vmem:[#allocation2 + $0x1d8] sm:$0xff]  ;;  %v3478_v63 = vld [vmem:[#allocation2 + $0x1a0] sm:$0xff] }
 0x182   :  { %v569_v3 = vsel %vm566_vm4, %v568_v62, %v564_v1  ;;  %v592_v50 = vmul.f32 %v2626_v56, %v550_v58  ;;  %vm586_vm8 = vcmp.eq.f32.partialorder %v585_v54, 8.507059e+37  ;;  %v3481_v62 = vld [vmem:[#allocation2 + $0x1a8] sm:$0xff]  ;;  %v3484_v4 = vld [vmem:[#allocation2 + $0x1b0] sm:$0xff]  ;;  %v3487_v56 = vld [vmem:[#allocation2 + $0x1b8] sm:$0xff] }
 0x183   :  { %v591_v49 = vmul.f32 %v569_v3, %v3379_v0  ;;  %v579_v42 = vmul.f32 %v2624_v60, %v578_v25  ;;  %v3454_v0 = vld [vmem:[#allocation2 + $0x1e0] sm:$0xff]  ;;  %v3493_v1 = vld [vmem:[#allocation2 + $0x188] sm:$0xff]  ;;  %v3496_v25 = vld [vmem:[#allocation2 + $0x190] sm:$0xff] }
 0x184   :  { %v3490_v58 = vld [vmem:[#allocation2 + $0x180] sm:$0xff]  ;;  %v3499_v3 = vld [vmem:[#allocation2 + $0x198] sm:$0xff] }
 0x185   :  { %v3451_v61 = vadd.f32 %v592_v50, %v591_v49  ;;  %v580_v6 = vadd.f32 %v2624_v60, %v579_v42  ;;  %v3457_v49 = vld [vmem:[#allocation2 + $0x1e8] sm:$0xff]  ;;  %v3460_v50 = vld [vmem:[#allocation2 + $0x1f0] sm:$0xff]  ;;  %v3502_v42 = vld [vmem:[#allocation2 + $0x160] sm:$0xff] }
 0x186   :  { %v3511_v54 = vld [vmem:[#allocation2 + $0x178] sm:$0xff] }
 0x187   :  { %2627 = vtanh.f32 %v3451_v61  ;;  %v584_v53 = vsel %vm583_vm7, %v2624_v60, %v580_v6  ;;  %v3466_v60 = vld [vmem:[#allocation2 + $0x1c0] sm:$0xff]  ;;  %v3505_v6 = vld [vmem:[#allocation2 + $0x168] sm:$0xff] }
 0x188   :  { %v589_v8 = vsel %vm586_vm8, %v588_v5, %v584_v53  ;;  %v3514_v53 = vld [vmem:[#allocation2 + $0x140] sm:$0xff]  ;;  %v3517_v5 = vld [vmem:[#allocation2 + $0x148] sm:$0xff] }
 0x18d   :  { %v2628_v7 = vpop.eup %2627 }
 0x18e   :  { %v595_v59 = vmul.f32 %v2628_v7, %v589_v8  ;;  %v3520_v7 = vld [vmem:[#allocation2 + $0x150] sm:$0xff]  ;;  %v3523_v8 = vld [vmem:[#allocation2 + $0x158] sm:$0xff] }
 0x190   :  { %612 = vmatmul.f32.vlgmr.msrb.gmra.mxu0 %v595_v59  ;;  %632 = vmatmul.f32.vlgmr.msrb.gmra.mxu1 %v595_v59 }
 0x191   :  { %652 = vmatmul.f32.vlgmr.msrb.gmra.mxu2 %v595_v59  ;;  %672 = vmatmul.f32.vlgmr.msrb.gmra.mxu3 %v595_v59 }
 0x192   :  { %894 = vmatpush.msrb.mxu0 %v3454_v0  ;;  %914 = vmatpush.msrb.mxu1 %v3457_v49 }
 0x193   :  { %934 = vmatpush.msrb.mxu2 %v3460_v50  ;;  %954 = vmatpush.msrb.mxu3 %v3463_v51 }
 0x194   :  { %895 = vmatpush.msrb.mxu0 %v3466_v60  ;;  %915 = vmatpush.msrb.mxu1 %v3469_v2 }
 0x195   :  { %935 = vmatpush.msrb.mxu2 %v3472_v55  ;;  %955 = vmatpush.msrb.mxu3 %v3475_v52 }
 0x196   :  { %896 = vmatpush.msrb.mxu0 %v3478_v63  ;;  %916 = vmatpush.msrb.mxu1 %v3481_v62 }
 0x197   :  { %936 = vmatpush.msrb.mxu2 %v3484_v4  ;;  %956 = vmatpush.msrb.mxu3 %v3487_v56 }
 0x198   :  { %897 = vmatpush.msrb.mxu0 %v3490_v58  ;;  %917 = vmatpush.msrb.mxu1 %v3493_v1 }
 0x199   :  { %937 = vmatpush.msrb.mxu2 %v3496_v25  ;;  %957 = vmatpush.msrb.mxu3 %v3499_v3 }
 0x19a   :  { %898 = vmatpush.msrb.mxu0 %v3502_v42  ;;  %918 = vmatpush.msrb.mxu1 %v3505_v6 }
 0x19b   :  { %938 = vmatpush.msrb.mxu2 %v3508_v57  ;;  %958 = vmatpush.msrb.mxu3 %v3511_v54 }
 0x19c   :  { %899 = vmatpush.msrb.mxu0 %v3514_v53  ;;  %919 = vmatpush.msrb.mxu1 %v3517_v5 }
 0x19d   :  { %939 = vmatpush.msrb.mxu2 %v3520_v7  ;;  %959 = vmatpush.msrb.mxu3 %v3523_v8 }
 0x19e   :  { %900 = vmatpush.msrb.mxu0 %v3074_v34  ;;  %920 = vmatpush.msrb.mxu1 %v3076_v35  ;;  %v4474_v34 = vld [vmem:[#allocation36_spill] sm:$0xff]  ;;  %v4475_v35 = vld [vmem:[#allocation37_spill] sm:$0xff] }
 0x19f   :  { %940 = vmatpush.msrb.mxu2 %v3080_v36  ;;  %960 = vmatpush.msrb.mxu3 %v3082_v37 }
 0x1a0   :  { %901 = vmatpush.msrb.mxu0 %v3086_v38  ;;  %921 = vmatpush.msrb.mxu1 %v3088_v39  ;;  %v4476_v38 = vld [vmem:[#allocation38_spill] sm:$0xff] }
 0x1a1   :  { %941 = vmatpush.msrb.mxu2 %v3092_v40  ;;  %961 = vmatpush.msrb.mxu3 %v3094_v41  ;;  %v4477_v40 = vld [vmem:[#allocation39_spill] sm:$0xff] }
 0x1a2   :  { %902 = vmatpush.msrb.mxu0 %v3105_v43  ;;  %922 = vmatpush.msrb.mxu1 %v3107_v44 }
 0x1a3   :  { %942 = vmatpush.msrb.mxu2 %v3111_v45  ;;  %962 = vmatpush.msrb.mxu3 %v3113_v46  ;;  %v4478_v46 = vld [vmem:[#allocation41_spill] sm:$0xff] }
 0x1a4   :  { %903 = vmatpush.msrb.mxu0 %v3117_v47  ;;  %923 = vmatpush.msrb.mxu1 %v3119_v48 }
 0x1a5   :  { %943 = vmatpush.msrb.mxu2 %v4444_v9  ;;  %963 = vmatpush.msrb.mxu3 %v4445_v10 }
 0x1a6   :  { %904 = vmatpush.msrb.mxu0 %v4446_v11  ;;  %924 = vmatpush.msrb.mxu1 %v4447_v12 }
 0x1a7   :  { %944 = vmatpush.msrb.mxu2 %v4448_v13  ;;  %964 = vmatpush.msrb.mxu3 %v4449_v14 }
 0x1a8   :  { %905 = vmatpush.msrb.mxu0 %v4450_v15  ;;  %925 = vmatpush.msrb.mxu1 %v4451_v16 }
 0x1a9   :  { %945 = vmatpush.msrb.mxu2 %v4452_v17  ;;  %965 = vmatpush.msrb.mxu3 %v4453_v18  ;;  %v4479_v17 = vld [vmem:[#allocation40_spill] sm:$0xff] }
 0x1aa   :  { %906 = vmatpush.msrb.mxu0 %v4454_v19  ;;  %926 = vmatpush.msrb.mxu1 %v4455_v20 }
 0x1ab   :  { %946 = vmatpush.msrb.mxu2 %v4456_v21  ;;  %966 = vmatpush.msrb.mxu3 %v4457_v22 }
 0x1ac   :  { %907 = vmatpush.msrb.mxu0 %v4458_v23  ;;  %927 = vmatpush.msrb.mxu1 %v4459_v24 }
 0x1ad   :  { %947 = vmatpush.msrb.mxu2 %v4460_v26  ;;  %967 = vmatpush.msrb.mxu3 %v4461_v27 }
 0x1ae   :  { %908 = vmatpush.msrb.mxu0 %v4462_v28  ;;  %928 = vmatpush.msrb.mxu1 %v4463_v29 }
 0x1af   :  { %948 = vmatpush.msrb.mxu2 %v4464_v30  ;;  %968 = vmatpush.msrb.mxu3 %v4465_v31 }
 0x1b0   :  { %909 = vmatpush.msrb.mxu0 %v4466_v32  ;;  %929 = vmatpush.msrb.mxu1 %v4467_v33 }
 0x1b1   :  { %949 = vmatpush.msrb.mxu2 %v4474_v34  ;;  %969 = vmatpush.msrb.mxu3 %v4475_v35 }
 0x20d   :  { %v613_v36 = vpop.f32.mrf.mxu0  ;;  %v633_v37 = vpop.f32.mrf.mxu1 }
 0x20e   :  { %v614_v39 = vadd.f32 %v613_v36, %v4476_v38  ;;  %v634_v41 = vadd.f32 %v633_v37, %v4477_v40 }
 0x210   :  { %v2556_v43 = vmul.f32 -1.442695, %v614_v39  ;;  %v2557_v44 = vmul.f32 -1.442695, %v634_v41 }
 0x212   :  { %2629 = vpow2.f32 %v2556_v43 }
 0x213   :  { %2631 = vpow2.f32 %v2557_v44 }
 0x214   :  { %v673_v45 = vpop.f32.mrf.mxu3  ;;  %v653_v13 = vpop.f32.mrf.mxu2 }
 0x215   :  { %v674_v47 = vadd.f32 %v673_v45, %v4478_v46  ;;  %v654_v18 = vadd.f32 %v653_v13, %v4479_v17 }
 0x217   :  { %v2558_v48 = vmul.f32 -1.442695, %v674_v47 }
 0x218   :  { %v2630_v9 = vpop.eup %2629 }
 0x219   :  { %v2632_v10 = vpop.eup %2631  ;;  %v679_v11 = vadd.f32 1.0, %v2630_v9  ;;  %2633 = vpow2.f32 %v2558_v48 }
 0x21a   :  { %v698_v12 = vadd.f32 1.0, %v2632_v10 }
 0x21b   :  { %2635 = vrcp.f32 %v679_v11  ;;  %v691_v24 = vand.u32 2147483648, %v679_v11  ;;  %v689_v28 = vand.u32 2147483647, %v679_v11  ;;  %vm685_vm11 = vweird.f32 %v679_v11 }
 0x21c   :  { %2637 = vrcp.f32 %v698_v12  ;;  %v710_v26 = vand.u32 2147483648, %v698_v12  ;;  %v708_v30 = vand.u32 2147483647, %v698_v12  ;;  %vm704_vm12 = vweird.f32 %v698_v12 }
 0x21d   :  { %v692_v33 = vor.u32 1.1754944e-38, %v691_v24  ;;  %vm690_vm15 = vcmp.eq.f32.partialorder %v689_v28, 8.507059e+37  ;;  %v3616_v24 = vld [vmem:[#allocation2 + $0x110] sm:$0xff]  ;;  %v3625_v28 = vld [vmem:[#allocation2 + $0xe8] sm:$0xff] }
 0x21e   :  { %v711_v35 = vor.u32 1.1754944e-38, %v710_v26  ;;  %vm709_vm0 = vcmp.eq.f32.partialorder %v708_v30, 8.507059e+37  ;;  %v3619_v26 = vld [vmem:[#allocation2 + $0x118] sm:$0xff] }
 0x21f   :  { %v2634_v14 = vpop.eup %2633  ;;  %v3631_v30 = vld [vmem:[#allocation2 + $0xf8] sm:$0xff] }
 0x220   :  { %v718_v15 = vadd.f32 1.0, %v2634_v14 }
 0x221   :  { %v2636_v16 = vpop.eup %2635 }
 0x222   :  { %v2638_v19 = vpop.eup %2637  ;;  %v681_v20 = vmul.f32 %v2636_v16, %v679_v11  ;;  %2639 = vrcp.f32 %v718_v15  ;;  %vm686_vm9 = vweird.f32 %v2636_v16  ;;  %v730_v11 = vand.u32 2147483648, %v718_v15 }
 0x223   :  { %v700_v21 = vmul.f32 %v2638_v19, %v698_v12  ;;  %2641 = vtanh.f32 %v654_v18  ;;  %vm705_vm10 = vweird.f32 %v2638_v19  ;;  %vm687_vm13 = vmor %vm685_vm11, %vm686_vm9  ;;  %vm724_vm2 = vweird.f32 %v718_v15 }
 0x224   :  { %v682_v22 = vsub.f32 1.0, %v681_v20  ;;  %vm706_vm14 = vmor %vm704_vm12, %vm705_vm10  ;;  %v728_v12 = vand.u32 2147483647, %v718_v15  ;;  %v731_v14 = vor.u32 1.1754944e-38, %v730_v11  ;;  %v3604_v20 = vld [vmem:[#allocation2 + $0x130] sm:$0xff]  ;;  %v3682_v11 = vld [vmem:[#allocation2 + $0x40] sm:$0xff] }
 0x225   :  { %v701_v23 = vsub.f32 1.0, %v700_v21  ;;  %v3607_v21 = vld [vmem:[#allocation2 + $0x138] sm:$0xff]  ;;  %4494 = vst [vmem:[#allocation26_spill] sm:$0xff] %v3682_v11 }
 0x226   :  { %v683_v27 = vmul.f32 %v2636_v16, %v682_v22  ;;  %vm729_vm4 = vcmp.eq.f32.partialorder %v728_v12, 8.507059e+37  ;;  %v3610_v22 = vld [vmem:[#allocation2 + $0x100] sm:$0xff]  ;;  %v3685_v12 = vld [vmem:[#allocation2 + $0x48] sm:$0xff] }
 0x227   :  { %v702_v29 = vmul.f32 %v2638_v19, %v701_v23  ;;  %v3613_v23 = vld [vmem:[#allocation2 + $0x108] sm:$0xff]  ;;  %4495 = vst [vmem:[#allocation27_spill] sm:$0xff] %v3685_v12 }
 0x228   :  { %v2640_v31 = vpop.eup %2639  ;;  %v684_v32 = vadd.f32 %v2636_v16, %v683_v27  ;;  %v3622_v27 = vld [vmem:[#allocation2 + $0xe0] sm:$0xff] }
 0x229   :  { %v703_v59 = vadd.f32 %v2638_v19, %v702_v29  ;;  %v720_v34 = vmul.f32 %v2640_v31, %v718_v15  ;;  %v2642_v37 = vpop.eup %2641  ;;  %vm725_vm1 = vweird.f32 %v2640_v31  ;;  %v3601_v15 = vld [vmem:[#allocation2 + $0x128] sm:$0xff]  ;;  %v3628_v29 = vld [vmem:[#allocation2 + $0xf0] sm:$0xff] }
 0x22a   :  { %v688_v36 = vsel %vm687_vm13, %v2636_v16, %v684_v32  ;;  %vm726_vm3 = vmor %vm724_vm2, %vm725_vm1  ;;  %v3637_v32 = vld [vmem:[#allocation2 + $0xc8] sm:$0xff] }
 0x22b   :  { %v693_v39 = vsel %vm690_vm15, %v692_v33, %v688_v36  ;;  %v707_v41 = vsel %vm706_vm14, %v2638_v19, %v703_v59  ;;  %v721_v43 = vsub.f32 1.0, %v720_v34  ;;  %v3640_v33 = vld [vmem:[#allocation2 + $0xd0] sm:$0xff]  ;;  %v3643_v59 = vld [vmem:[#allocation2 + $0xd8] sm:$0xff]  ;;  %v3646_v34 = vld [vmem:[#allocation2 + $0xa0] sm:$0xff] }
 0x22c   :  { %v712_v44 = vsel %vm709_vm0, %v711_v35, %v707_v41  ;;  %v735_v45 = vmul.f32 %v2642_v37, %v693_v39  ;;  %4480 = vst [vmem:[#allocation12_spill] sm:$0xff] %v3640_v33  ;;  %v3649_v35 = vld [vmem:[#allocation2 + $0xa8] sm:$0xff]  ;;  %v3652_v36 = vld [vmem:[#allocation2 + $0xb0] sm:$0xff]  ;;  %v3655_v37 = vld [vmem:[#allocation2 + $0xb8] sm:$0xff] }
 0x22d   :  { %v734_v47 = vmul.f32 %v712_v44, %v3451_v61  ;;  %v722_v48 = vmul.f32 %v2640_v31, %v721_v43  ;;  %v3598_v61 = vld [vmem:[#allocation2 + $0x120] sm:$0xff]  ;;  %4481 = vst [vmem:[#allocation13_spill] sm:$0xff] %v3643_v59  ;;  %v3661_v41 = vld [vmem:[#allocation2 + $0x88] sm:$0xff]  ;;  %v3664_v43 = vld [vmem:[#allocation2 + $0x90] sm:$0xff] }
 0x22e   :  { %4482 = vst [vmem:[#allocation14_spill] sm:$0xff] %v3646_v34  ;;  %v3658_v39 = vld [vmem:[#allocation2 + $0x80] sm:$0xff]  ;;  %v3667_v44 = vld [vmem:[#allocation2 + $0x98] sm:$0xff] }
 0x22f   :  { %v3571_v9 = vadd.f32 %v735_v45, %v734_v47  ;;  %v723_v10 = vadd.f32 %v2640_v31, %v722_v48  ;;  %4483 = vst [vmem:[#allocation15_spill] sm:$0xff] %v3649_v35  ;;  %v3670_v45 = vld [vmem:[#allocation2 + $0x60] sm:$0xff]  ;;  %v3673_v47 = vld [vmem:[#allocation2 + $0x68] sm:$0xff]  ;;  %v3676_v48 = vld [vmem:[#allocation2 + $0x70] sm:$0xff] }
 0x230   :  { %4484 = vst [vmem:[#allocation16_spill] sm:$0xff] %v3652_v36 }
 0x231   :  { %2643 = vtanh.f32 %v3571_v9  ;;  %v727_v13 = vsel %vm726_vm3, %v2640_v31, %v723_v10  ;;  %v3634_v31 = vld [vmem:[#allocation2 + $0xc0] sm:$0xff]  ;;  %4485 = vst [vmem:[#allocation17_spill] sm:$0xff] %v3655_v37  ;;  %v3679_v10 = vld [vmem:[#allocation2 + $0x78] sm:$0xff] }
 0x232   :  { %v732_v18 = vsel %vm729_vm4, %v731_v14, %v727_v13  ;;  %4486 = vst [vmem:[#allocation18_spill] sm:$0xff] %v3658_v39  ;;  %v3688_v13 = vld [vmem:[#allocation2 + $0x50] sm:$0xff]  ;;  %v3691_v14 = vld [vmem:[#allocation2 + $0x58] sm:$0xff] }
 0x233   :  { %4487 = vst [vmem:[#allocation19_spill] sm:$0xff] %v3661_v41 }
 0x234   :  { %4488 = vst [vmem:[#allocation20_spill] sm:$0xff] %v3664_v43 }
 0x235   :  { %4489 = vst [vmem:[#allocation21_spill] sm:$0xff] %v3667_v44 }
 0x236   :  { %4490 = vst [vmem:[#allocation22_spill] sm:$0xff] %v3670_v45 }
 0x237   :  { %v2644_v16 = vpop.eup %2643  ;;  %4491 = vst [vmem:[#allocation23_spill] sm:$0xff] %v3673_v47 }
 0x238   :  { %v738_v19 = vmul.f32 %v2644_v16, %v732_v18  ;;  %4492 = vst [vmem:[#allocation24_spill] sm:$0xff] %v3676_v48  ;;  %v3694_v16 = vld [vmem:[#allocation2 + $0x20] sm:$0xff]  ;;  %v3697_v18 = vld [vmem:[#allocation2 + $0x28] sm:$0xff] }
 0x239   :  { %4493 = vst [vmem:[#allocation25_spill] sm:$0xff] %v3679_v10 }
 0x23a   :  { %767 = vmatmul.f32.vlgmr.msra.gmra.mxu0 %v738_v19  ;;  %787 = vmatmul.f32.vlgmr.msra.gmra.mxu1 %v738_v19  ;;  %4496 = vst [vmem:[#allocation28_spill] sm:$0xff] %v3688_v13 }
 0x23b   :  { %807 = vmatmul.f32.vlgmr.msra.gmra.mxu2 %v738_v19  ;;  %827 = vmatmul.f32.vlgmr.msra.gmra.mxu3 %v738_v19  ;;  %4497 = vst [vmem:[#allocation29_spill] sm:$0xff] %v3691_v14  ;;  %v3700_v19 = vld [vmem:[#allocation2 + $0x30] sm:$0xff] }
 0x23c   :  { %1049 = vmatpush.msra.mxu0 %v3454_v0  ;;  %1069 = vmatpush.msra.mxu1 %v3457_v49  ;;  %4498 = vst [vmem:[#allocation30_spill] sm:$0xff] %v3694_v16 }
 0x23d   :  { %1089 = vmatpush.msra.mxu2 %v3460_v50  ;;  %1109 = vmatpush.msra.mxu3 %v3463_v51  ;;  %4499 = vst [vmem:[#allocation31_spill] sm:$0xff] %v3697_v18 }
 0x23e   :  { %1050 = vmatpush.msra.mxu0 %v3466_v60  ;;  %1070 = vmatpush.msra.mxu1 %v3469_v2  ;;  %4500 = vst [vmem:[#allocation32_spill] sm:$0xff] %v3700_v19 }
 0x23f   :  { %1090 = vmatpush.msra.mxu2 %v3472_v55  ;;  %1110 = vmatpush.msra.mxu3 %v3475_v52 }
 0x240   :  { %1051 = vmatpush.msra.mxu0 %v3478_v63  ;;  %1071 = vmatpush.msra.mxu1 %v3481_v62 }
 0x241   :  { %1091 = vmatpush.msra.mxu2 %v3484_v4  ;;  %1111 = vmatpush.msra.mxu3 %v3487_v56 }
 0x242   :  { %1052 = vmatpush.msra.mxu0 %v3490_v58  ;;  %1072 = vmatpush.msra.mxu1 %v3493_v1 }
 0x243   :  { %1092 = vmatpush.msra.mxu2 %v3496_v25  ;;  %1112 = vmatpush.msra.mxu3 %v3499_v3 }
 0x244   :  { %1053 = vmatpush.msra.mxu0 %v3502_v42  ;;  %1073 = vmatpush.msra.mxu1 %v3505_v6 }
 0x245   :  { %1093 = vmatpush.msra.mxu2 %v3508_v57  ;;  %1113 = vmatpush.msra.mxu3 %v3511_v54 }
 0x246   :  { %1054 = vmatpush.msra.mxu0 %v3514_v53  ;;  %1074 = vmatpush.msra.mxu1 %v3517_v5 }
 0x247   :  { %1094 = vmatpush.msra.mxu2 %v3520_v7  ;;  %1114 = vmatpush.msra.mxu3 %v3523_v8 }
 0x248   :  { %1055 = vmatpush.msra.mxu0 %v3598_v61  ;;  %1075 = vmatpush.msra.mxu1 %v3601_v15 }
 0x249   :  { %1095 = vmatpush.msra.mxu2 %v3604_v20  ;;  %1115 = vmatpush.msra.mxu3 %v3607_v21 }
 0x24a   :  { %1056 = vmatpush.msra.mxu0 %v3610_v22  ;;  %1076 = vmatpush.msra.mxu1 %v3613_v23 }
 0x24b   :  { %1096 = vmatpush.msra.mxu2 %v3616_v24  ;;  %1116 = vmatpush.msra.mxu3 %v3619_v26 }
 0x24c   :  { %1057 = vmatpush.msra.mxu0 %v3622_v27  ;;  %1077 = vmatpush.msra.mxu1 %v3625_v28 }
 0x24d   :  { %1097 = vmatpush.msra.mxu2 %v3628_v29  ;;  %1117 = vmatpush.msra.mxu3 %v3631_v30 }
 0x24e   :  { %1058 = vmatpush.msra.mxu0 %v3634_v31  ;;  %1078 = vmatpush.msra.mxu1 %v3637_v32 }
 0x24f   :  { %1098 = vmatpush.msra.mxu2 %v3640_v33  ;;  %1118 = vmatpush.msra.mxu3 %v3643_v59 }
 0x250   :  { %1059 = vmatpush.msra.mxu0 %v3646_v34  ;;  %1079 = vmatpush.msra.mxu1 %v3649_v35 }
 0x251   :  { %1099 = vmatpush.msra.mxu2 %v3652_v36  ;;  %1119 = vmatpush.msra.mxu3 %v3655_v37 }
 0x252   :  { %1060 = vmatpush.msra.mxu0 %v3658_v39  ;;  %1080 = vmatpush.msra.mxu1 %v3661_v41 }
 0x253   :  { %1100 = vmatpush.msra.mxu2 %v3664_v43  ;;  %1120 = vmatpush.msra.mxu3 %v3667_v44 }
 0x254   :  { %1061 = vmatpush.msra.mxu0 %v3670_v45  ;;  %1081 = vmatpush.msra.mxu1 %v3673_v47 }
 0x255   :  { %1101 = vmatpush.msra.mxu2 %v3676_v48  ;;  %1121 = vmatpush.msra.mxu3 %v3679_v10 }
 0x256   :  { %1062 = vmatpush.msra.mxu0 %v3682_v11  ;;  %1082 = vmatpush.msra.mxu1 %v3685_v12  ;;  %v3703_v12 = vld [vmem:[#allocation2 + $0x38] sm:$0xff] }
 0x257   :  { %1102 = vmatpush.msra.mxu2 %v3688_v13  ;;  %1122 = vmatpush.msra.mxu3 %v3691_v14  ;;  %4501 = vst [vmem:[#allocation33_spill] sm:$0xff] %v3703_v12  ;;  %v3706_v13 = vld [vmem:[#allocation2] sm:$0xff]  ;;  %v3709_v14 = vld [vmem:[#allocation2 + $0x8] sm:$0xff] }
 0x258   :  { %1063 = vmatpush.msra.mxu0 %v3694_v16  ;;  %1083 = vmatpush.msra.mxu1 %v3697_v18  ;;  %4502 = vst [vmem:[#allocation34_spill] sm:$0xff] %v3706_v13  ;;  %v3712_v16 = vld [vmem:[#allocation2 + $0x10] sm:$0xff]  ;;  %v3715_v18 = vld [vmem:[#allocation2 + $0x18] sm:$0xff] }
 0x259   :  { %1103 = vmatpush.msra.mxu2 %v3700_v19  ;;  %1123 = vmatpush.msra.mxu3 %v3703_v12  ;;  %4503 = vst [vmem:[#allocation35_spill] sm:$0xff] %v3709_v14  ;;  %v743_v19 = vrot.slane %v4476_v38, 4  ;;  %v744_v12 = vrot.slane %v4477_v40, 4 }
 0x25a   :  { %1064 = vmatpush.msra.mxu0 %v3706_v13  ;;  %1084 = vmatpush.msra.mxu1 %v3709_v14  ;;  %4504 = vst [vmem:[#allocation50_spill] sm:$0xff] %v3712_v16  ;;  %v746_v14 = vrot.slane %v4478_v46, 4 }
 0x25b   :  { %1104 = vmatpush.msra.mxu2 %v3712_v16  ;;  %4505 = vst [vmem:[#allocation51_spill] sm:$0xff] %v3715_v18  ;;  %1124 = vmatpush.msra.mxu3 %v3715_v18 }
 0x2b7   :  { %v768_v11 = vpop.f32.mrf.mxu0  ;;  %v788_v10 = vpop.f32.mrf.mxu1 }
 0x2b8   :  { %v769_v48 = vadd.f32 %v768_v11, %v743_v19  ;;  %v789_v13 = vadd.f32 %v788_v10, %v744_v12  ;;  %v745_v10 = vrot.slane %v4479_v17, 4 }
 0x2ba   :  { %v2559_v47 = vmul.f32 -1.442695, %v769_v48  ;;  %v2560_v45 = vmul.f32 -1.442695, %v789_v13 }
 0x2bc   :  { %2645 = vpow2.f32 %v2559_v47 }
 0x2bd   :  { %2647 = vpow2.f32 %v2560_v45 }
 0x2be   :  { %v828_v44 = vpop.f32.mrf.mxu3  ;;  %v808_v40 = vpop.f32.mrf.mxu2 }
 0x2bf   :  { %v829_v16 = vadd.f32 %v828_v44, %v746_v14  ;;  %v809_v47 = vadd.f32 %v808_v40, %v745_v10 }
 0x2c1   :  { %v2561_v43 = vmul.f32 -1.442695, %v829_v16 }
 0x2c2   :  { %v2646_v41 = vpop.eup %2645 }
 0x2c3   :  { %v2648_v39 = vpop.eup %2647  ;;  %v834_v18 = vadd.f32 1.0, %v2646_v41  ;;  %2649 = vpow2.f32 %v2561_v43 }
 0x2c4   :  { %v853_v38 = vadd.f32 1.0, %v2648_v39 }
 0x2c5   :  { %2651 = vrcp.f32 %v834_v18  ;;  %v846_v14 = vand.u32 2147483648, %v834_v18  ;;  %v844_v39 = vand.u32 2147483647, %v834_v18  ;;  %vm840_vm7 = vweird.f32 %v834_v18 }
 0x2c6   :  { %2653 = vrcp.f32 %v853_v38  ;;  %v865_v41 = vand.u32 2147483648, %v853_v38  ;;  %v863_v19 = vand.u32 2147483647, %v853_v38  ;;  %vm859_vm8 = vweird.f32 %v853_v38 }
 0x2c7   :  { %vm845_vm11 = vcmp.eq.f32.partialorder %v844_v39, 8.507059e+37 }
 0x2c8   :  { %vm864_vm12 = vcmp.eq.f32.partialorder %v863_v19, 8.507059e+37 }
 0x2c9   :  { %v2650_v37 = vpop.eup %2649 }
 0x2ca   :  { %v873_v48 = vadd.f32 1.0, %v2650_v37  ;;  %v847_v37 = vor.u32 1.1754944e-38, %v846_v14 }
 0x2cb   :  { %v2652_v11 = vpop.eup %2651 }
 0x2cc   :  { %v2654_v45 = vpop.eup %2653  ;;  %v836_v12 = vmul.f32 %v2652_v11, %v834_v18  ;;  %2655 = vrcp.f32 %v873_v48  ;;  %vm841_vm5 = vweird.f32 %v2652_v11  ;;  %v885_v14 = vand.u32 2147483648, %v873_v48 }
 0x2cd   :  { %v855_v46 = vmul.f32 %v2654_v45, %v853_v38  ;;  %2657 = vtanh.f32 %v809_v47  ;;  %vm860_vm6 = vweird.f32 %v2654_v45  ;;  %vm842_vm9 = vmor %vm840_vm7, %vm841_vm5  ;;  %vm879_vm14 = vweird.f32 %v873_v48 }
 0x2ce   :  { %v837_v44 = vsub.f32 1.0, %v836_v12  ;;  %vm861_vm10 = vmor %vm859_vm8, %vm860_vm6  ;;  %v866_v12 = vor.u32 1.1754944e-38, %v865_v41  ;;  %v886_v39 = vor.u32 1.1754944e-38, %v885_v14  ;;  %v4524_v14 = vld [vmem:[#allocation30_spill] sm:$0xff] }
 0x2cf   :  { %v856_v13 = vsub.f32 1.0, %v855_v46 }
 0x2d0   :  { %v838_v43 = vmul.f32 %v2652_v11, %v837_v44 }
 0x2d1   :  { %v857_v16 = vmul.f32 %v2654_v45, %v856_v13 }
 0x2d2   :  { %v2656_v36 = vpop.eup %2655  ;;  %v839_v17 = vadd.f32 %v2652_v11, %v838_v43 }
 0x2d3   :  { %v858_v40 = vadd.f32 %v2654_v45, %v857_v16  ;;  %v875_v10 = vmul.f32 %v2656_v36, %v873_v48  ;;  %v2658_v47 = vpop.eup %2657  ;;  %vm880_vm13 = vweird.f32 %v2656_v36 }
 0x2d4   :  { %v843_v46 = vsel %vm842_vm9, %v2652_v11, %v839_v17  ;;  %v883_v11 = vand.u32 2147483647, %v873_v48  ;;  %vm881_vm15 = vmor %vm879_vm14, %vm880_vm13  ;;  %v4512_v48 = vld [vmem:[#allocation18_spill] sm:$0xff]  ;;  %v4513_v17 = vld [vmem:[#allocation19_spill] sm:$0xff] }
 0x2d5   :  { %v848_v35 = vsel %vm845_vm11, %v847_v37, %v843_v46  ;;  %v862_v44 = vsel %vm861_vm10, %v2654_v45, %v858_v40  ;;  %v876_v34 = vsub.f32 1.0, %v875_v10  ;;  %v4514_v37 = vld [vmem:[#allocation20_spill] sm:$0xff]  ;;  %v4515_v40 = vld [vmem:[#allocation21_spill] sm:$0xff]  ;;  %v4516_v10 = vld [vmem:[#allocation22_spill] sm:$0xff] }
 0x2d6   :  { %v867_v13 = vsel %vm864_vm12, %v866_v12, %v862_v44  ;;  %v890_v59 = vmul.f32 %v2658_v47, %v848_v35  ;;  %vm884_vm0 = vcmp.eq.f32.partialorder %v883_v11, 8.507059e+37  ;;  %v4510_v35 = vld [vmem:[#allocation16_spill] sm:$0xff]  ;;  %v4517_v12 = vld [vmem:[#allocation23_spill] sm:$0xff]  ;;  %v4519_v47 = vld [vmem:[#allocation25_spill] sm:$0xff] }
 0x2d7   :  { %v889_v33 = vmul.f32 %v867_v13, %v3571_v9  ;;  %v877_v43 = vmul.f32 %v2656_v36, %v876_v34  ;;  %v4506_v9 = vld [vmem:[#allocation12_spill] sm:$0xff]  ;;  %v4509_v34 = vld [vmem:[#allocation15_spill] sm:$0xff]  ;;  %v4520_v44 = vld [vmem:[#allocation26_spill] sm:$0xff] }
 0x2d8   :  { %v4518_v46 = vld [vmem:[#allocation24_spill] sm:$0xff]  ;;  %v4521_v13 = vld [vmem:[#allocation27_spill] sm:$0xff] }
 0x2d9   :  { %v3723_v18 = vadd.f32 %v890_v59, %v889_v33  ;;  %v878_v38 = vadd.f32 %v2656_v36, %v877_v43  ;;  %v4507_v33 = vld [vmem:[#allocation13_spill] sm:$0xff]  ;;  %v4508_v59 = vld [vmem:[#allocation14_spill] sm:$0xff]  ;;  %v4522_v43 = vld [vmem:[#allocation28_spill] sm:$0xff] }
 0x2da   :  { %v4525_v11 = vld [vmem:[#allocation31_spill] sm:$0xff] }
 0x2db   :  { %2659 = vtanh.f32 %v3723_v18  ;;  %v882_v41 = vsel %vm881_vm15, %v2656_v36, %v878_v38  ;;  %v4511_v36 = vld [vmem:[#allocation17_spill] sm:$0xff] }
 0x2dc   :  { %v887_v16 = vsel %vm884_vm0, %v886_v39, %v882_v41  ;;  %v4523_v38 = vld [vmem:[#allocation29_spill] sm:$0xff]  ;;  %v4526_v41 = vld [vmem:[#allocation32_spill] sm:$0xff] }
 0x2dd   :  { %v4527_v39 = vld [vmem:[#allocation33_spill] sm:$0xff] }
 0x2e1   :  { %v2660_v45 = vpop.eup %2659 }
 0x2e2   :  { %v893_v19 = vmul.f32 %v2660_v45, %v887_v16  ;;  %v4528_v45 = vld [vmem:[#allocation34_spill] sm:$0xff]  ;;  %v4529_v16 = vld [vmem:[#allocation35_spill] sm:$0xff] }
 0x2e4   :  { %910 = vmatmul.f32.vlgmr.msrb.gmra.mxu0 %v893_v19  ;;  %930 = vmatmul.f32.vlgmr.msrb.gmra.mxu1 %v893_v19 }
 0x2e5   :  { %950 = vmatmul.f32.vlgmr.msrb.gmra.mxu2 %v893_v19  ;;  %970 = vmatmul.f32.vlgmr.msrb.gmra.mxu3 %v893_v19  ;;  %v4530_v19 = vld [vmem:[#allocation50_spill] sm:$0xff] }
 0x2e6   :  { %1192 = vmatpush.msrb.mxu0 %v3454_v0  ;;  %1212 = vmatpush.msrb.mxu1 %v3457_v49 }
 0x2e7   :  { %1232 = vmatpush.msrb.mxu2 %v3460_v50  ;;  %1252 = vmatpush.msrb.mxu3 %v3463_v51 }
 0x2e8   :  { %1193 = vmatpush.msrb.mxu0 %v3466_v60  ;;  %1213 = vmatpush.msrb.mxu1 %v3469_v2 }
 0x2e9   :  { %1233 = vmatpush.msrb.mxu2 %v3472_v55  ;;  %1253 = vmatpush.msrb.mxu3 %v3475_v52 }
 0x2ea   :  { %1194 = vmatpush.msrb.mxu0 %v3478_v63  ;;  %1214 = vmatpush.msrb.mxu1 %v3481_v62 }
 0x2eb   :  { %1234 = vmatpush.msrb.mxu2 %v3484_v4  ;;  %1254 = vmatpush.msrb.mxu3 %v3487_v56 }
 0x2ec   :  { %1195 = vmatpush.msrb.mxu0 %v3490_v58  ;;  %1215 = vmatpush.msrb.mxu1 %v3493_v1 }
 0x2ed   :  { %1235 = vmatpush.msrb.mxu2 %v3496_v25  ;;  %1255 = vmatpush.msrb.mxu3 %v3499_v3 }
 0x2ee   :  { %1196 = vmatpush.msrb.mxu0 %v3502_v42  ;;  %1216 = vmatpush.msrb.mxu1 %v3505_v6 }
 0x2ef   :  { %1236 = vmatpush.msrb.mxu2 %v3508_v57  ;;  %1256 = vmatpush.msrb.mxu3 %v3511_v54 }
 0x2f0   :  { %1197 = vmatpush.msrb.mxu0 %v3514_v53  ;;  %1217 = vmatpush.msrb.mxu1 %v3517_v5 }
 0x2f1   :  { %1237 = vmatpush.msrb.mxu2 %v3520_v7  ;;  %1257 = vmatpush.msrb.mxu3 %v3523_v8 }
 0x2f2   :  { %1198 = vmatpush.msrb.mxu0 %v3598_v61  ;;  %1218 = vmatpush.msrb.mxu1 %v3601_v15 }
 0x2f3   :  { %1238 = vmatpush.msrb.mxu2 %v3604_v20  ;;  %1258 = vmatpush.msrb.mxu3 %v3607_v21 }
 0x2f4   :  { %1199 = vmatpush.msrb.mxu0 %v3610_v22  ;;  %1219 = vmatpush.msrb.mxu1 %v3613_v23 }
 0x2f5   :  { %1239 = vmatpush.msrb.mxu2 %v3616_v24  ;;  %1259 = vmatpush.msrb.mxu3 %v3619_v26 }
 0x2f6   :  { %1200 = vmatpush.msrb.mxu0 %v3622_v27  ;;  %1220 = vmatpush.msrb.mxu1 %v3625_v28 }
 0x2f7   :  { %1240 = vmatpush.msrb.mxu2 %v3628_v29  ;;  %1260 = vmatpush.msrb.mxu3 %v3631_v30 }
 0x2f8   :  { %1201 = vmatpush.msrb.mxu0 %v3634_v31  ;;  %1221 = vmatpush.msrb.mxu1 %v3637_v32 }
 0x2f9   :  { %1241 = vmatpush.msrb.mxu2 %v4506_v9  ;;  %1261 = vmatpush.msrb.mxu3 %v4507_v33 }
 0x2fa   :  { %1202 = vmatpush.msrb.mxu0 %v4508_v59  ;;  %1222 = vmatpush.msrb.mxu1 %v4509_v34 }
 0x2fb   :  { %1242 = vmatpush.msrb.mxu2 %v4510_v35  ;;  %1262 = vmatpush.msrb.mxu3 %v4511_v36 }
 0x2fc   :  { %1203 = vmatpush.msrb.mxu0 %v4512_v48  ;;  %1223 = vmatpush.msrb.mxu1 %v4513_v17 }
 0x2fd   :  { %1243 = vmatpush.msrb.mxu2 %v4514_v37  ;;  %1263 = vmatpush.msrb.mxu3 %v4515_v40 }
 0x2fe   :  { %1204 = vmatpush.msrb.mxu0 %v4516_v10  ;;  %1224 = vmatpush.msrb.mxu1 %v4517_v12 }
 0x2ff   :  { %1244 = vmatpush.msrb.mxu2 %v4518_v46  ;;  %1264 = vmatpush.msrb.mxu3 %v4519_v47  ;;  %v4532_v47 = vld [vmem:[#allocation42_spill] sm:$0xff]  ;;  %v4533_v46 = vld [vmem:[#allocation43_spill] sm:$0xff] }
 0x300   :  { %1205 = vmatpush.msrb.mxu0 %v4520_v44  ;;  %1225 = vmatpush.msrb.mxu1 %v4521_v13  ;;  %v4531_v44 = vld [vmem:[#allocation51_spill] sm:$0xff] }
 0x301   :  { %1245 = vmatpush.msrb.mxu2 %v4522_v43  ;;  %1265 = vmatpush.msrb.mxu3 %v4523_v38 }
 0x302   :  { %1206 = vmatpush.msrb.mxu0 %v4524_v14  ;;  %1226 = vmatpush.msrb.mxu1 %v4525_v11 }
 0x303   :  { %1246 = vmatpush.msrb.mxu2 %v4526_v41  ;;  %1266 = vmatpush.msrb.mxu3 %v4527_v39  ;;  %v4534_v39 = vld [vmem:[#allocation45_spill] sm:$0xff] }
 0x304   :  { %1207 = vmatpush.msrb.mxu0 %v4528_v45  ;;  %1227 = vmatpush.msrb.mxu1 %v4529_v16 }
 0x305   :  { %1247 = vmatpush.msrb.mxu2 %v4530_v19  ;;  %1267 = vmatpush.msrb.mxu3 %v4531_v44 }
 0x361   :  { %v911_v13 = vpop.f32.mrf.mxu0  ;;  %v931_v43 = vpop.f32.mrf.mxu1 }
 0x362   :  { %v912_v38 = vadd.f32 %v911_v13, %v4532_v47  ;;  %v932_v14 = vadd.f32 %v931_v43, %v4533_v46  ;;  %v4535_v43 = vld [vmem:[#allocation44_spill] sm:$0xff] }
 0x364   :  { %v2562_v12 = vmul.f32 -1.442695, %v912_v38  ;;  %v2563_v11 = vmul.f32 -1.442695, %v932_v14 }
 0x366   :  { %2661 = vpow2.f32 %v2562_v12 }
 0x367   :  { %2663 = vpow2.f32 %v2563_v11 }
 0x368   :  { %v971_v41 = vpop.f32.mrf.mxu3  ;;  %v951_v44 = vpop.f32.mrf.mxu2 }
 0x369   :  { %v972_v10 = vadd.f32 %v971_v41, %v4534_v39  ;;  %v952_v38 = vadd.f32 %v951_v44, %v4535_v43 }
 0x36b   :  { %v2564_v45 = vmul.f32 -1.442695, %v972_v10 }
 0x36c   :  { %v2662_v40 = vpop.eup %2661 }
 0x36d   :  { %v2664_v16 = vpop.eup %2663  ;;  %v977_v37 = vadd.f32 1.0, %v2662_v40  ;;  %2665 = vpow2.f32 %v2564_v45 }
 0x36e   :  { %v996_v19 = vadd.f32 1.0, %v2664_v16 }
 0x36f   :  { %2667 = vrcp.f32 %v977_v37  ;;  %v989_v10 = vand.u32 2147483648, %v977_v37  ;;  %v987_v45 = vand.u32 2147483647, %v977_v37  ;;  %vm983_vm3 = vweird.f32 %v977_v37 }
 0x370   :  { %2669 = vrcp.f32 %v996_v19  ;;  %v1008_v39 = vand.u32 2147483648, %v996_v19  ;;  %v1006_v48 = vand.u32 2147483647, %v996_v19  ;;  %vm1002_vm4 = vweird.f32 %v996_v19 }
 0x371   :  { %v990_v44 = vor.u32 1.1754944e-38, %v989_v10  ;;  %vm988_vm7 = vcmp.eq.f32.partialorder %v987_v45, 8.507059e+37 }
 0x372   :  { %vm1007_vm8 = vcmp.eq.f32.partialorder %v1006_v48, 8.507059e+37 }
 0x373   :  { %v2666_v17 = vpop.eup %2665 }
 0x374   :  { %v1016_v13 = vadd.f32 1.0, %v2666_v17 }
 0x375   :  { %v2668_v47 = vpop.eup %2667 }
 0x376   :  { %v2670_v14 = vpop.eup %2669  ;;  %v979_v12 = vmul.f32 %v2668_v47, %v977_v37  ;;  %2671 = vrcp.f32 %v1016_v13  ;;  %vm984_vm1 = vweird.f32 %v2668_v47  ;;  %v1028_v10 = vand.u32 2147483648, %v1016_v13 }
 0x377   :  { %v998_v11 = vmul.f32 %v2670_v14, %v996_v19  ;;  %2673 = vtanh.f32 %v952_v38  ;;  %vm1003_vm2 = vweird.f32 %v2670_v14  ;;  %vm985_vm5 = vmor %vm983_vm3, %vm984_vm1  ;;  %vm1022_vm10 = vweird.f32 %v1016_v13 }
 0x378   :  { %v980_v46 = vsub.f32 1.0, %v979_v12  ;;  %vm1004_vm6 = vmor %vm1002_vm4, %vm1003_vm2  ;;  %v1009_v12 = vor.u32 1.1754944e-38, %v1008_v39  ;;  %v1029_v45 = vor.u32 1.1754944e-38, %v1028_v10 }
 0x379   :  { %v999_v41 = vsub.f32 1.0, %v998_v11 }
 0x37a   :  { %v981_v40 = vmul.f32 %v2668_v47, %v980_v46 }
 0x37b   :  { %v1000_v16 = vmul.f32 %v2670_v14, %v999_v41 }
 0x37c   :  { %v2672_v36 = vpop.eup %2671  ;;  %v982_v17 = vadd.f32 %v2668_v47, %v981_v40 }
 0x37d   :  { %v1001_v43 = vadd.f32 %v2670_v14, %v1000_v16  ;;  %v1018_v35 = vmul.f32 %v2672_v36, %v1016_v13  ;;  %v2674_v38 = vpop.eup %2673  ;;  %vm1023_vm9 = vweird.f32 %v2672_v36 }
 0x37e   :  { %v986_v11 = vsel %vm985_vm5, %v2668_v47, %v982_v17  ;;  %v1026_v47 = vand.u32 2147483647, %v1016_v13  ;;  %vm1024_vm11 = vmor %vm1022_vm10, %vm1023_vm9  ;;  %v4565_v17 = vld [vmem:[#allocation44_spill] sm:$0xff] }
 0x37f   :  { %v991_v34 = vsel %vm988_vm7, %v990_v44, %v986_v11  ;;  %v1005_v46 = vsel %vm1004_vm6, %v2670_v14, %v1001_v43  ;;  %v1019_v59 = vsub.f32 1.0, %v1018_v35  ;;  %v1043_v44 = vrot.slane %v4565_v17, 4 }
 0x380   :  { %v1010_v41 = vsel %vm1007_vm8, %v1009_v12, %v1005_v46  ;;  %v1033_v33 = vmul.f32 %v2674_v38, %v991_v34  ;;  %vm1027_vm12 = vcmp.eq.f32.partialorder %v1026_v47, 8.507059e+37 }
 0x381   :  { %v1032_v9 = vmul.f32 %v1010_v41, %v3723_v18  ;;  %v1020_v40 = vmul.f32 %v2672_v36, %v1019_v59 }
 0x383   :  { %v3795_v37 = vadd.f32 %v1033_v33, %v1032_v9  ;;  %v1021_v19 = vadd.f32 %v2672_v36, %v1020_v40 }
 0x385   :  { %2675 = vtanh.f32 %v3795_v37  ;;  %v1025_v39 = vsel %vm1024_vm11, %v2672_v36, %v1021_v19 }
 0x386   :  { %v1030_v35 = vsel %vm1027_vm12, %v1029_v45, %v1025_v39 }
 0x38b   :  { %v2676_v48 = vpop.eup %2675 }
 0x38c   :  { %v1036_v43 = vmul.f32 %v2676_v48, %v1030_v35 }
 0x38e   :  { %1065 = vmatmul.f32.vlgmr.msra.gmra.mxu0 %v1036_v43  ;;  %1085 = vmatmul.f32.vlgmr.msra.gmra.mxu1 %v1036_v43 }
 0x38f   :  { %1105 = vmatmul.f32.vlgmr.msra.gmra.mxu2 %v1036_v43  ;;  %1125 = vmatmul.f32.vlgmr.msra.gmra.mxu3 %v1036_v43 }
 0x390   :  { %1347 = vmatpush.msra.mxu0 %v3454_v0  ;;  %1367 = vmatpush.msra.mxu1 %v3457_v49  ;;  %v4536_v0 = vld [vmem:[#allocation12_spill] sm:$0xff]  ;;  %v4537_v49 = vld [vmem:[#allocation13_spill] sm:$0xff] }
 0x391   :  { %1387 = vmatpush.msra.mxu2 %v3460_v50  ;;  %1407 = vmatpush.msra.mxu3 %v3463_v51  ;;  %v4538_v50 = vld [vmem:[#allocation14_spill] sm:$0xff]  ;;  %v4539_v51 = vld [vmem:[#allocation15_spill] sm:$0xff] }
 0x392   :  { %1348 = vmatpush.msra.mxu0 %v3466_v60  ;;  %1368 = vmatpush.msra.mxu1 %v3469_v2  ;;  %v4540_v60 = vld [vmem:[#allocation16_spill] sm:$0xff]  ;;  %v4541_v2 = vld [vmem:[#allocation17_spill] sm:$0xff] }
 0x393   :  { %1388 = vmatpush.msra.mxu2 %v3472_v55  ;;  %1408 = vmatpush.msra.mxu3 %v3475_v52  ;;  %v4542_v55 = vld [vmem:[#allocation18_spill] sm:$0xff]  ;;  %v4543_v52 = vld [vmem:[#allocation19_spill] sm:$0xff] }
 0x394   :  { %1349 = vmatpush.msra.mxu0 %v3478_v63  ;;  %1369 = vmatpush.msra.mxu1 %v3481_v62  ;;  %v4544_v63 = vld [vmem:[#allocation20_spill] sm:$0xff]  ;;  %v4545_v62 = vld [vmem:[#allocation21_spill] sm:$0xff] }
 0x395   :  { %1389 = vmatpush.msra.mxu2 %v3484_v4  ;;  %1409 = vmatpush.msra.mxu3 %v3487_v56  ;;  %v4546_v4 = vld [vmem:[#allocation22_spill] sm:$0xff]  ;;  %v4547_v56 = vld [vmem:[#allocation23_spill] sm:$0xff] }
 0x396   :  { %1350 = vmatpush.msra.mxu0 %v3490_v58  ;;  %1370 = vmatpush.msra.mxu1 %v3493_v1  ;;  %v4548_v58 = vld [vmem:[#allocation24_spill] sm:$0xff]  ;;  %v4549_v1 = vld [vmem:[#allocation25_spill] sm:$0xff] }
 0x397   :  { %1390 = vmatpush.msra.mxu2 %v3496_v25  ;;  %1410 = vmatpush.msra.mxu3 %v3499_v3  ;;  %v4550_v25 = vld [vmem:[#allocation26_spill] sm:$0xff]  ;;  %v4551_v3 = vld [vmem:[#allocation27_spill] sm:$0xff] }
 0x398   :  { %1351 = vmatpush.msra.mxu0 %v3502_v42  ;;  %1371 = vmatpush.msra.mxu1 %v3505_v6  ;;  %v4552_v42 = vld [vmem:[#allocation28_spill] sm:$0xff]  ;;  %v4553_v6 = vld [vmem:[#allocation29_spill] sm:$0xff] }
 0x399   :  { %1391 = vmatpush.msra.mxu2 %v3508_v57  ;;  %1411 = vmatpush.msra.mxu3 %v3511_v54  ;;  %v4554_v57 = vld [vmem:[#allocation30_spill] sm:$0xff]  ;;  %v4555_v54 = vld [vmem:[#allocation31_spill] sm:$0xff] }
 0x39a   :  { %1352 = vmatpush.msra.mxu0 %v3514_v53  ;;  %1372 = vmatpush.msra.mxu1 %v3517_v5  ;;  %v4556_v53 = vld [vmem:[#allocation32_spill] sm:$0xff]  ;;  %v4557_v5 = vld [vmem:[#allocation33_spill] sm:$0xff] }
 0x39b   :  { %1392 = vmatpush.msra.mxu2 %v3520_v7  ;;  %1412 = vmatpush.msra.mxu3 %v3523_v8  ;;  %v4558_v7 = vld [vmem:[#allocation34_spill] sm:$0xff]  ;;  %v4559_v8 = vld [vmem:[#allocation35_spill] sm:$0xff] }
 0x39c   :  { %1353 = vmatpush.msra.mxu0 %v3598_v61  ;;  %1373 = vmatpush.msra.mxu1 %v3601_v15  ;;  %v4560_v61 = vld [vmem:[#allocation50_spill] sm:$0xff]  ;;  %v4561_v15 = vld [vmem:[#allocation51_spill] sm:$0xff] }
 0x39d   :  { %1393 = vmatpush.msra.mxu2 %v3604_v20  ;;  %1413 = vmatpush.msra.mxu3 %v3607_v21  ;;  %v4562_v20 = vld [vmem:[#allocation42_spill] sm:$0xff] }
 0x39e   :  { %1354 = vmatpush.msra.mxu0 %v3610_v22  ;;  %1374 = vmatpush.msra.mxu1 %v3613_v23  ;;  %v1041_v21 = vrot.slane %v4562_v20, 4  ;;  %v4563_v22 = vld [vmem:[#allocation43_spill] sm:$0xff] }
 0x39f   :  { %1394 = vmatpush.msra.mxu2 %v3616_v24  ;;  %1414 = vmatpush.msra.mxu3 %v3619_v26  ;;  %v1042_v23 = vrot.slane %v4563_v22, 4 }
 0x3a0   :  { %1355 = vmatpush.msra.mxu0 %v3622_v27  ;;  %1375 = vmatpush.msra.mxu1 %v3625_v28 }
 0x3a1   :  { %1395 = vmatpush.msra.mxu2 %v3628_v29  ;;  %1415 = vmatpush.msra.mxu3 %v3631_v30 }
 0x3a2   :  { %1356 = vmatpush.msra.mxu0 %v3634_v31  ;;  %1376 = vmatpush.msra.mxu1 %v3637_v32  ;;  %v4564_v31 = vld [vmem:[#allocation45_spill] sm:$0xff] }
 0x3a3   :  { %1396 = vmatpush.msra.mxu2 %v4536_v0  ;;  %1416 = vmatpush.msra.mxu3 %v4537_v49  ;;  %v1044_v32 = vrot.slane %v4564_v31, 4 }
 0x3a4   :  { %1357 = vmatpush.msra.mxu0 %v4538_v50  ;;  %1377 = vmatpush.msra.mxu1 %v4539_v51 }
 0x3a5   :  { %1397 = vmatpush.msra.mxu2 %v4540_v60  ;;  %1417 = vmatpush.msra.mxu3 %v4541_v2 }
 0x3a6   :  { %1358 = vmatpush.msra.mxu0 %v4542_v55  ;;  %1378 = vmatpush.msra.mxu1 %v4543_v52 }
 0x3a7   :  { %1398 = vmatpush.msra.mxu2 %v4544_v63  ;;  %1418 = vmatpush.msra.mxu3 %v4545_v62 }
 0x3a8   :  { %1359 = vmatpush.msra.mxu0 %v4546_v4  ;;  %1379 = vmatpush.msra.mxu1 %v4547_v56 }
 0x3a9   :  { %1399 = vmatpush.msra.mxu2 %v4548_v58  ;;  %1419 = vmatpush.msra.mxu3 %v4549_v1 }
 0x3aa   :  { %1360 = vmatpush.msra.mxu0 %v4550_v25  ;;  %1380 = vmatpush.msra.mxu1 %v4551_v3 }
 0x3ab   :  { %1400 = vmatpush.msra.mxu2 %v4552_v42  ;;  %1420 = vmatpush.msra.mxu3 %v4553_v6 }
 0x3ac   :  { %1361 = vmatpush.msra.mxu0 %v4554_v57  ;;  %1381 = vmatpush.msra.mxu1 %v4555_v54 }
 0x3ad   :  { %1401 = vmatpush.msra.mxu2 %v4556_v53  ;;  %1421 = vmatpush.msra.mxu3 %v4557_v5 }
 0x3ae   :  { %1362 = vmatpush.msra.mxu0 %v4558_v7  ;;  %1382 = vmatpush.msra.mxu1 %v4559_v8 }
 0x3af   :  { %1402 = vmatpush.msra.mxu2 %v4560_v61  ;;  %1422 = vmatpush.msra.mxu3 %v4561_v15  ;;  %v4566_v15 = vld [vmem:[#allocation46_spill] sm:$0xff] }
 0x40b   :  { %v1066_v24 = vpop.f32.mrf.mxu0  ;;  %v1086_v26 = vpop.f32.mrf.mxu1 }
 0x40c   :  { %v1067_v27 = vadd.f32 %v1066_v24, %v1041_v21  ;;  %v1087_v28 = vadd.f32 %v1086_v26, %v1042_v23  ;;  %v4567_v21 = vld [vmem:[#allocation47_spill] sm:$0xff] }
 0x40e   :  { %v2565_v29 = vmul.f32 -1.442695, %v1067_v27  ;;  %v2566_v30 = vmul.f32 -1.442695, %v1087_v28  ;;  %v4568_v27 = vld [vmem:[#allocation49_spill] sm:$0xff] }
 0x410   :  { %2677 = vpow2.f32 %v2565_v29 }
 0x411   :  { %2679 = vpow2.f32 %v2566_v30 }
 0x412   :  { %v1126_v18 = vpop.f32.mrf.mxu3  ;;  %v1106_v14 = vpop.f32.mrf.mxu2 }
 0x413   :  { %v1127_v9 = vadd.f32 %v1126_v18, %v1044_v32  ;;  %v1107_v38 = vadd.f32 %v1106_v14, %v1043_v44 }
 0x415   :  { %v2567_v33 = vmul.f32 -1.442695, %v1127_v9 }
 0x416   :  { %v2678_v59 = vpop.eup %2677 }
 0x417   :  { %v2680_v34 = vpop.eup %2679  ;;  %v1132_v36 = vadd.f32 1.0, %v2678_v59  ;;  %2681 = vpow2.f32 %v2567_v33 }
 0x418   :  { %v1151_v13 = vadd.f32 1.0, %v2680_v34 }
 0x419   :  { %2683 = vrcp.f32 %v1132_v36  ;;  %v1144_v47 = vand.u32 2147483648, %v1132_v36  ;;  %v1142_v48 = vand.u32 2147483647, %v1132_v36  ;;  %vm1138_vm15 = vweird.f32 %v1132_v36 }
 0x41a   :  { %2685 = vrcp.f32 %v1151_v13  ;;  %v1163_v39 = vand.u32 2147483648, %v1151_v13  ;;  %v1161_v43 = vand.u32 2147483647, %v1151_v13  ;;  %vm1157_vm0 = vweird.f32 %v1151_v13 }
 0x41b   :  { %v1145_v50 = vor.u32 1.1754944e-38, %v1144_v47  ;;  %vm1143_vm3 = vcmp.eq.f32.partialorder %v1142_v48, 8.507059e+37 }
 0x41c   :  { %v1164_v2 = vor.u32 1.1754944e-38, %v1163_v39  ;;  %vm1162_vm4 = vcmp.eq.f32.partialorder %v1161_v43, 8.507059e+37 }
 0x41d   :  { %v2682_v16 = vpop.eup %2681 }
 0x41e   :  { %v1171_v12 = vadd.f32 1.0, %v2682_v16 }
 0x41f   :  { %v2684_v11 = vpop.eup %2683 }
 0x420   :  { %v2686_v46 = vpop.eup %2685  ;;  %v1134_v41 = vmul.f32 %v2684_v11, %v1132_v36  ;;  %2687 = vrcp.f32 %v1171_v12  ;;  %vm1139_vm13 = vweird.f32 %v2684_v11  ;;  %v1183_v6 = vand.u32 2147483648, %v1171_v12  ;;  %v4569_v36 = vld [vmem:[#allocation48_spill] sm:$0xff] }
 0x421   :  { %v1153_v40 = vmul.f32 %v2686_v46, %v1151_v13  ;;  %2689 = vtanh.f32 %v1107_v38  ;;  %vm1158_vm14 = vweird.f32 %v2686_v46  ;;  %vm1140_vm1 = vmor %vm1138_vm15, %vm1139_vm13  ;;  %vm1177_vm6 = vweird.f32 %v1171_v12 }
 0x422   :  { %v1135_v19 = vsub.f32 1.0, %v1134_v41  ;;  %vm1159_vm2 = vmor %vm1157_vm0, %vm1158_vm14  ;;  %v1181_v57 = vand.u32 2147483647, %v1171_v12  ;;  %v1184_v53 = vor.u32 1.1754944e-38, %v1183_v6 }
 0x423   :  { %v1154_v10 = vsub.f32 1.0, %v1153_v40 }
 0x424   :  { %v1136_v45 = vmul.f32 %v2684_v11, %v1135_v19  ;;  %vm1182_vm8 = vcmp.eq.f32.partialorder %v1181_v57, 8.507059e+37  ;;  %v1539_v57 = vld [vmem:[#allocation5 + $0x1f8] sm:$0xff] }
 0x425   :  { %v1155_v35 = vmul.f32 %v2686_v46, %v1154_v10 }
 0x426   :  { %v2688_v0 = vpop.eup %2687  ;;  %v1137_v49 = vadd.f32 %v2684_v11, %v1136_v45 }
 0x427   :  { %v1156_v51 = vadd.f32 %v2686_v46, %v1155_v35  ;;  %v1173_v60 = vmul.f32 %v2688_v0, %v1171_v12  ;;  %v2690_v52 = vpop.eup %2689  ;;  %vm1178_vm5 = vweird.f32 %v2688_v0 }
 0x428   :  { %v1141_v55 = vsel %vm1140_vm1, %v2684_v11, %v1137_v49  ;;  %vm1179_vm7 = vmor %vm1177_vm6, %vm1178_vm5 }
 0x429   :  { %v1146_v63 = vsel %vm1143_vm3, %v1145_v50, %v1141_v55  ;;  %v1160_v62 = vsel %vm1159_vm2, %v2686_v46, %v1156_v51  ;;  %v1174_v4 = vsub.f32 1.0, %v1173_v60 }
 0x42a   :  { %v1165_v56 = vsel %vm1162_vm4, %v1164_v2, %v1160_v62  ;;  %v1188_v58 = vmul.f32 %v2690_v52, %v1146_v63 }
 0x42b   :  { %v1187_v1 = vmul.f32 %v1165_v56, %v3795_v37  ;;  %v1175_v25 = vmul.f32 %v2688_v0, %v1174_v4 }
 0x42d   :  { %v3867_v3 = vadd.f32 %v1188_v58, %v1187_v1  ;;  %v1176_v42 = vadd.f32 %v2688_v0, %v1175_v25 }
 0x42f   :  { %2691 = vtanh.f32 %v3867_v3  ;;  %v1180_v54 = vsel %vm1179_vm7, %v2688_v0, %v1176_v42 }
 0x430   :  { %v1185_v7 = vsel %vm1182_vm8, %v1184_v53, %v1180_v54  ;;  %v1555_v54 = vld [vmem:[#allocation5 + $0x378] sm:$0xff]  ;;  %v1522_v53 = vld [vmem:[#allocation5 + $0x70] sm:$0xff] }
 0x435   :  { %v2692_v5 = vpop.eup %2691 }
 0x436   :  { %v1191_v8 = vmul.f32 %v2692_v5, %v1185_v7  ;;  %v1538_v5 = vld [vmem:[#allocation5 + $0x1f0] sm:$0xff] }
 0x437   :  { %v1554_v7 = vld [vmem:[#allocation5 + $0x370] sm:$0xff] }
 0x438   :  { %1208 = vmatmul.f32.vlgmr.msrb.gmra.mxu0 %v1191_v8  ;;  %1228 = vmatmul.f32.vlgmr.msrb.gmra.mxu1 %v1191_v8 }
 0x439   :  { %1248 = vmatmul.f32.vlgmr.msrb.gmra.mxu2 %v1191_v8  ;;  %1268 = vmatmul.f32.vlgmr.msrb.gmra.mxu3 %v1191_v8  ;;  %v1521_v8 = vld [vmem:[#allocation5 + $0x68] sm:$0xff] }
 0x43a   :  { %1576 = vmatpush.msrb.mxu1 %v1539_v57  ;;  %1596 = vmatpush.msrb.mxu2 %v1555_v54  ;;  %v1540_v54 = vld [vmem:[#allocation5 + $0x300] sm:$0xff] }
 0x43c   :  { %1577 = vmatpush.msrb.mxu1 %v1538_v5  ;;  %1597 = vmatpush.msrb.mxu2 %v1554_v7  ;;  %v1341_v5 = vrot.slane %v4569_v36, 4 }
 0x4b5   :  { %v1209_v37 = vpop.f32.mrf.mxu0  ;;  %v1229_v61 = vpop.f32.mrf.mxu1 }
 0x4b6   :  { %v1210_v20 = vadd.f32 %v1209_v37, %v4566_v15  ;;  %v1230_v22 = vadd.f32 %v1229_v61, %v4567_v21  ;;  %v1537_v37 = vld [vmem:[#allocation5 + $0x1e8] sm:$0xff] }
 0x4b7   :  { %v1553_v61 = vld [vmem:[#allocation5 + $0x368] sm:$0xff]  ;;  %1578 = vmatpush.msrb.mxu1 %v1537_v37 }
 0x4b8   :  { %v2568_v23 = vmul.f32 -1.442695, %v1210_v20  ;;  %v2569_v24 = vmul.f32 -1.442695, %v1230_v22  ;;  %1598 = vmatpush.msrb.mxu2 %v1553_v61  ;;  %v1520_v20 = vld [vmem:[#allocation5 + $0x60] sm:$0xff]  ;;  %v1646_v61 = vld [vmem:[#allocation7 + $0x78] sm:$0xff] }
 0x4b9   :  { %v1536_v22 = vld [vmem:[#allocation5 + $0x1e0] sm:$0xff]  ;;  %1679 = vmatpush.msrb.mxu3 %v1646_v61  ;;  %v1670_v61 = vld [vmem:[#allocation7 + $0x338] sm:$0xff] }
 0x4ba   :  { %2693 = vpow2.f32 %v2568_v23  ;;  %v1552_v23 = vld [vmem:[#allocation5 + $0x360] sm:$0xff]  ;;  %1579 = vmatpush.msrb.mxu1 %v1536_v22  ;;  %v1645_v22 = vld [vmem:[#allocation7 + $0x70] sm:$0xff] }
 0x4bb   :  { %2695 = vpow2.f32 %v2569_v24  ;;  %1599 = vmatpush.msrb.mxu2 %v1552_v23  ;;  %v1519_v24 = vld [vmem:[#allocation5 + $0x58] sm:$0xff]  ;;  %1680 = vmatpush.msrb.mxu3 %v1645_v22  ;;  %v1636_v22 = vld [vmem:[#allocation7 + $0x28] sm:$0xff] }
 0x4bc   :  { %v1269_v26 = vpop.f32.mrf.mxu3  ;;  %v1249_v9 = vpop.f32.mrf.mxu2 }
 0x4bd   :  { %v1270_v28 = vadd.f32 %v1269_v26, %v4568_v27  ;;  %v1250_v13 = vadd.f32 %v1249_v9, %v4569_v36  ;;  %v1535_v26 = vld [vmem:[#allocation5 + $0x1d8] sm:$0xff]  ;;  %v1661_v36 = vld [vmem:[#allocation7 + $0x1f0] sm:$0xff] }
 0x4be   :  { %1580 = vmatpush.msrb.mxu1 %v1535_v26 }
 0x4bf   :  { %v2570_v29 = vmul.f32 -1.442695, %v1270_v28  ;;  %v1551_v28 = vld [vmem:[#allocation5 + $0x358] sm:$0xff] }
 0x4c0   :  { %v2694_v30 = vpop.eup %2693  ;;  %1600 = vmatpush.msrb.mxu2 %v1551_v28  ;;  %v1644_v28 = vld [vmem:[#allocation7 + $0x68] sm:$0xff] }
 0x4c1   :  { %v2696_v31 = vpop.eup %2695  ;;  %v1275_v32 = vadd.f32 1.0, %v2694_v30  ;;  %2697 = vpow2.f32 %v2570_v29  ;;  %v1518_v29 = vld [vmem:[#allocation5 + $0x50] sm:$0xff]  ;;  %1681 = vmatpush.msrb.mxu3 %v1644_v28 }
 0x4c2   :  { %v1294_v18 = vadd.f32 1.0, %v2696_v31  ;;  %v1534_v30 = vld [vmem:[#allocation5 + $0x1d0] sm:$0xff] }
 0x4c3   :  { %2699 = vrcp.f32 %v1275_v32  ;;  %v1287_v11 = vand.u32 2147483648, %v1275_v32  ;;  %v1285_v41 = vand.u32 2147483647, %v1275_v32  ;;  %vm1281_vm11 = vweird.f32 %v1275_v32  ;;  %v1550_v31 = vld [vmem:[#allocation5 + $0x350] sm:$0xff]  ;;  %1581 = vmatpush.msrb.mxu1 %v1534_v30 }
 0x4c4   :  { %2701 = vrcp.f32 %v1294_v18  ;;  %v1306_v38 = vand.u32 2147483648, %v1294_v18  ;;  %v1304_v19 = vand.u32 2147483647, %v1294_v18  ;;  %vm1300_vm12 = vweird.f32 %v1294_v18  ;;  %1601 = vmatpush.msrb.mxu2 %v1550_v31  ;;  %v1678_v31 = vld [vmem:[#allocation7 + $0x378] sm:$0xff] }
 0x4c5   :  { %v1288_v39 = vor.u32 1.1754944e-38, %v1287_v11  ;;  %vm1286_vm15 = vcmp.eq.f32.partialorder %v1285_v41, 8.507059e+37  ;;  %v1342_v41 = vrot.slane %v4568_v27, 4 }
 0x4c6   :  { %v1307_v35 = vor.u32 1.1754944e-38, %v1306_v38  ;;  %vm1305_vm0 = vcmp.eq.f32.partialorder %v1304_v19, 8.507059e+37  ;;  %v1531_v38 = vld [vmem:[#allocation5 + $0x1b8] sm:$0xff]  ;;  %v1530_v19 = vld [vmem:[#allocation5 + $0x1b0] sm:$0xff] }
 0x4c7   :  { %v2698_v33 = vpop.eup %2697 }
 0x4c8   :  { %v1314_v59 = vadd.f32 1.0, %v2698_v33 }
 0x4c9   :  { %v2700_v34 = vpop.eup %2699 }
 0x4ca   :  { %v2702_v14 = vpop.eup %2701  ;;  %v1277_v16 = vmul.f32 %v2700_v34, %v1275_v32  ;;  %2703 = vrcp.f32 %v1314_v59  ;;  %vm1282_vm9 = vweird.f32 %v2700_v34  ;;  %v1326_v4 = vand.u32 2147483648, %v1314_v59 }
 0x4cb   :  { %v1296_v17 = vmul.f32 %v2702_v14, %v1294_v18  ;;  %2705 = vtanh.f32 %v1250_v13  ;;  %vm1301_vm10 = vweird.f32 %v2702_v14  ;;  %vm1283_vm13 = vmor %vm1281_vm11, %vm1282_vm9  ;;  %vm1320_vm2 = vweird.f32 %v1314_v59  ;;  %v1549_v13 = vld [vmem:[#allocation5 + $0x348] sm:$0xff] }
 0x4cc   :  { %v1278_v44 = vsub.f32 1.0, %v1277_v16  ;;  %vm1302_vm14 = vmor %vm1300_vm12, %vm1301_vm10  ;;  %v1324_v56 = vand.u32 2147483647, %v1314_v59  ;;  %v1327_v1 = vor.u32 1.1754944e-38, %v1326_v4  ;;  %v1339_v32 = vrot.slane %v4566_v15, 4  ;;  %1602 = vmatpush.msrb.mxu2 %v1549_v13  ;;  %v1526_v4 = vld [vmem:[#allocation5 + $0x190] sm:$0xff] }
 0x4cd   :  { %v1297_v12 = vsub.f32 1.0, %v1296_v17  ;;  %v1340_v18 = vrot.slane %v4567_v21, 4  ;;  %v1516_v17 = vld [vmem:[#allocation5 + $0x40] sm:$0xff]  ;;  %v1515_v21 = vld [vmem:[#allocation5 + $0x38] sm:$0xff] }
 0x4ce   :  { %v1279_v46 = vmul.f32 %v2700_v34, %v1278_v44  ;;  %vm1325_vm4 = vcmp.eq.f32.partialorder %v1324_v56, 8.507059e+37  ;;  %v1532_v44 = vld [vmem:[#allocation5 + $0x1c0] sm:$0xff] }
 0x4cf   :  { %v1298_v40 = vmul.f32 %v2702_v14, %v1297_v12  ;;  %v1548_v12 = vld [vmem:[#allocation5 + $0x340] sm:$0xff] }
 0x4d0   :  { %v2704_v10 = vpop.eup %2703  ;;  %v1280_v47 = vadd.f32 %v2700_v34, %v1279_v46  ;;  %1603 = vmatpush.msrb.mxu2 %v1548_v12  ;;  %v1547_v46 = vld [vmem:[#allocation5 + $0x338] sm:$0xff] }
 0x4d1   :  { %v1299_v45 = vadd.f32 %v2702_v14, %v1298_v40  ;;  %v1316_v48 = vmul.f32 %v2704_v10, %v1314_v59  ;;  %v2706_v0 = vpop.eup %2705  ;;  %vm1321_vm1 = vweird.f32 %v2704_v10  ;;  %v1517_v59 = vld [vmem:[#allocation5 + $0x48] sm:$0xff]  ;;  %v1514_v40 = vld [vmem:[#allocation5 + $0x30] sm:$0xff]  ;;  %v1642_v12 = vld [vmem:[#allocation7 + $0x58] sm:$0xff] }
 0x4d2   :  { %v1284_v43 = vsel %vm1283_vm13, %v2700_v34, %v1280_v47  ;;  %vm1322_vm3 = vmor %vm1320_vm2, %vm1321_vm1  ;;  %v1533_v34 = vld [vmem:[#allocation5 + $0x1c8] sm:$0xff]  ;;  %1604 = vmatpush.msrb.mxu2 %v1547_v46  ;;  %v1669_v46 = vld [vmem:[#allocation7 + $0x330] sm:$0xff]  ;;  %vm2279_vm1 = vcmask 1043456   ;;  %vm2510_vm2 = vcmask 15360  }
 0x4d3   :  { %v1289_v49 = vsel %vm1286_vm15, %v1288_v39, %v1284_v43  ;;  %v1303_v50 = vsel %vm1302_vm14, %v2702_v14, %v1299_v45  ;;  %v1317_v51 = vsub.f32 1.0, %v1316_v48  ;;  %1582 = vmatpush.msrb.mxu1 %v1533_v34  ;;  %v1513_v45 = vld [vmem:[#allocation5 + $0x28] sm:$0xff] }
 0x4d4   :  { %v1308_v60 = vsel %vm1305_vm0, %v1307_v35, %v1303_v50  ;;  %v1331_v2 = vmul.f32 %v2706_v0, %v1289_v49  ;;  %v1529_v48 = vld [vmem:[#allocation5 + $0x1a8] sm:$0xff]  ;;  %v1512_v0 = vld [vmem:[#allocation5 + $0x20] sm:$0xff] }
 0x4d5   :  { %v1330_v55 = vmul.f32 %v1308_v60, %v3867_v3  ;;  %v1318_v52 = vmul.f32 %v2704_v10, %v1317_v51  ;;  %v1523_v3 = vld [vmem:[#allocation5 + $0x78] sm:$0xff]  ;;  %1583 = vmatpush.msrb.mxu1 %v1532_v44  ;;  %v1545_v35 = vld [vmem:[#allocation5 + $0x328] sm:$0xff]  ;;  %v1528_v49 = vld [vmem:[#allocation5 + $0x1a0] sm:$0xff] }
 0x4d6   :  { %1556 = vmatpush.msrb.mxu0 %v1523_v3  ;;  %v1544_v50 = vld [vmem:[#allocation5 + $0x320] sm:$0xff]  ;;  %v1511_v51 = vld [vmem:[#allocation5 + $0x18] sm:$0xff] }
 0x4d7   :  { %v3875_v63 = vadd.f32 %v1331_v2, %v1330_v55  ;;  %v1319_v62 = vadd.f32 %v2704_v10, %v1318_v52  ;;  %1584 = vmatpush.msrb.mxu1 %v1531_v38  ;;  %v1527_v60 = vld [vmem:[#allocation5 + $0x198] sm:$0xff]  ;;  %v1524_v3 = vld [vmem:[#allocation5 + $0x180] sm:$0xff] }
 0x4d8   :  { %1557 = vmatpush.msrb.mxu0 %v1522_v53  ;;  %v1543_v2 = vld [vmem:[#allocation5 + $0x318] sm:$0xff]  ;;  %v1675_v38 = vld [vmem:[#allocation7 + $0x360] sm:$0xff] }
 0x4d9   :  { %2707 = vtanh.f32 %v3875_v63  ;;  %v1323_v58 = vsel %vm1322_vm3, %v2704_v10, %v1319_v62  ;;  %v1546_v10 = vld [vmem:[#allocation5 + $0x330] sm:$0xff]  ;;  %1585 = vmatpush.msrb.mxu1 %v1530_v19  ;;  %vm2512_vm3 = vcmask 31744  }
 0x4da   :  { %v1328_v42 = vsel %vm1325_vm4, %v1327_v1, %v1323_v58  ;;  %1558 = vmatpush.msrb.mxu0 %v1521_v8  ;;  %1605 = vmatpush.msrb.mxu2 %v1546_v10  ;;  %v1510_v62 = vld [vmem:[#allocation5 + $0x10] sm:$0xff]  ;;  %v1509_v1 = vld [vmem:[#allocation5 + $0x8] sm:$0xff]  ;;  %vm2514_vm4 = vcmask 48132  }
 0x4db   :  { %1586 = vmatpush.msrb.mxu1 %v1529_v48  ;;  %v1542_v58 = vld [vmem:[#allocation5 + $0x310] sm:$0xff] }
 0x4dc   :  { %1559 = vmatpush.msrb.mxu0 %v1520_v20  ;;  %1606 = vmatpush.msrb.mxu2 %v1545_v35  ;;  %v1662_v20 = vld [vmem:[#allocation7 + $0x1f8] sm:$0xff]  ;;  %v1641_v10 = vld [vmem:[#allocation7 + $0x50] sm:$0xff] }
 0x4dd   :  { %1587 = vmatpush.msrb.mxu1 %v1528_v49  ;;  %v1674_v35 = vld [vmem:[#allocation7 + $0x358] sm:$0xff] }
 0x4de   :  { %1560 = vmatpush.msrb.mxu0 %v1519_v24  ;;  %1607 = vmatpush.msrb.mxu2 %v1544_v50 }
 0x4df   :  { %v2708_v25 = vpop.eup %2707  ;;  %1588 = vmatpush.msrb.mxu1 %v1527_v60 }
 0x4e0   :  { %v1334_v6 = vmul.f32 %v2708_v25, %v1328_v42  ;;  %1561 = vmatpush.msrb.mxu0 %v1518_v29  ;;  %1608 = vmatpush.msrb.mxu2 %v1543_v2  ;;  %v1525_v25 = vld [vmem:[#allocation5 + $0x188] sm:$0xff] }
 0x4e1   :  { %1589 = vmatpush.msrb.mxu1 %v1526_v4  ;;  %v1541_v42 = vld [vmem:[#allocation5 + $0x308] sm:$0xff]  ;;  %v1639_v4 = vld [vmem:[#allocation7 + $0x40] sm:$0xff] }
 0x4e2   :  { %1363 = vmatmul.f32.vlgmr.msra.gmra.mxu0 %v1334_v6  ;;  %1383 = vmatmul.f32.vlgmr.msra.gmra.mxu1 %v1334_v6  ;;  %v1660_v29 = vld [vmem:[#allocation7 + $0x1e8] sm:$0xff] }
 0x4e3   :  { %1403 = vmatmul.f32.vlgmr.msra.gmra.mxu2 %v1334_v6  ;;  %1423 = vmatmul.f32.vlgmr.msra.gmra.mxu3 %v1334_v6  ;;  %v1508_v6 = vld [vmem:[#allocation5] sm:$0xff] }
 0x4e4   :  { %1562 = vmatpush.msrb.mxu0 %v1517_v59  ;;  %1609 = vmatpush.msrb.mxu2 %v1542_v58  ;;  %v1677_v59 = vld [vmem:[#allocation7 + $0x370] sm:$0xff]  ;;  %v1672_v58 = vld [vmem:[#allocation7 + $0x348] sm:$0xff] }
 0x4e5   :  { %1590 = vmatpush.msrb.mxu1 %v1525_v25  ;;  %v1638_v25 = vld [vmem:[#allocation7 + $0x38] sm:$0xff] }
 0x4e6   :  { %1563 = vmatpush.msrb.mxu0 %v1516_v17  ;;  %1610 = vmatpush.msrb.mxu2 %v1541_v42  ;;  %v1654_v42 = vld [vmem:[#allocation7 + $0x1b8] sm:$0xff] }
 0x4e7   :  { %1591 = vmatpush.msrb.mxu1 %v1524_v3  ;;  %v1671_v3 = vld [vmem:[#allocation7 + $0x340] sm:$0xff] }
 0x4e8   :  { %1564 = vmatpush.msrb.mxu0 %v1515_v21  ;;  %1611 = vmatpush.msrb.mxu2 %v1540_v54  ;;  %v3946_v54 = vld [vmem:[%s4273_s4 + $0xc] sm:$0xf] }
 0x4e9   :  { %1719 = vmatpush.msra.mxu1 %v1678_v31 }
 0x4ea   :  { %1565 = vmatpush.msrb.mxu0 %v1514_v40 }
 0x4eb   :  { %1720 = vmatpush.msra.mxu1 %v1677_v59 }
 0x4ec   :  { %1566 = vmatpush.msrb.mxu0 %v1513_v45 }
 0x4ee   :  { %1567 = vmatpush.msrb.mxu0 %v1512_v0 }
 0x4f0   :  { %1568 = vmatpush.msrb.mxu0 %v1511_v51  ;;  %v1656_v51 = vld [vmem:[#allocation7 + $0x1c8] sm:$0xff] }
 0x4f2   :  { %1569 = vmatpush.msrb.mxu0 %v1510_v62 }
 0x4f4   :  { %1570 = vmatpush.msrb.mxu0 %v1509_v1 }
 0x4f6   :  { %1571 = vmatpush.msrb.mxu0 %v1508_v6 }
 0x4f8   :  { %1699 = vmatpush.msra.mxu0 %v1662_v20  ;;  %v1786_v20 = vld [vmem:[#allocation5 + $0x240] sm:$0xff] }
 0x4fa   :  { %1700 = vmatpush.msra.mxu0 %v1661_v36  ;;  %v1635_v36 = vld [vmem:[#allocation7 + $0x20] sm:$0xff] }
 0x4fc   :  { %1701 = vmatpush.msra.mxu0 %v1660_v29  ;;  %v1494_v29 = vperm.slane %v3946_v54, 0 }
 0x55f   :  { %v1364_v9 = vpop.f32.mrf.mxu0  ;;  %v1384_v33 = vpop.f32.mrf.mxu1 }
 0x560   :  { %v1365_v14 = vadd.f32 %v1364_v9, %v1339_v32  ;;  %v1385_v16 = vadd.f32 %v1384_v33, %v1340_v18  ;;  %v1643_v9 = vld [vmem:[#allocation7 + $0x60] sm:$0xff] }
 0x561   :  { %v1659_v33 = vld [vmem:[#allocation7 + $0x1e0] sm:$0xff]  ;;  %1682 = vmatpush.msrb.mxu3 %v1643_v9 }
 0x562   :  { %v2571_v11 = vmul.f32 -1.442695, %v1365_v14  ;;  %v2572_v15 = vmul.f32 -1.442695, %v1385_v16  ;;  %v1676_v16 = vld [vmem:[#allocation7 + $0x368] sm:$0xff]  ;;  %1702 = vmatpush.msra.mxu0 %v1659_v33  ;;  %v1500_v33 = vperm.slane %v3946_v54, 1 }
 0x563   :  { %1721 = vmatpush.msra.mxu1 %v1676_v16  ;;  %1683 = vmatpush.msrb.mxu3 %v1642_v12 }
 0x564   :  { %2709 = vpow2.f32 %v2571_v11  ;;  %v1658_v11 = vld [vmem:[#allocation7 + $0x1d8] sm:$0xff] }
 0x565   :  { %2711 = vpow2.f32 %v2572_v15  ;;  %1703 = vmatpush.msra.mxu0 %v1658_v11  ;;  %1722 = vmatpush.msra.mxu1 %v1675_v38  ;;  %v1650_v38 = vld [vmem:[#allocation7 + $0x198] sm:$0xff] }
 0x566   :  { %v1424_v47 = vpop.f32.mrf.mxu3  ;;  %v1404_v57 = vpop.f32.mrf.mxu2  ;;  %1684 = vmatpush.msrb.mxu3 %v1641_v10  ;;  %v1632_v10 = vld [vmem:[#allocation7 + $0x8] sm:$0xff] }
 0x567   :  { %v1425_v39 = vadd.f32 %v1424_v47, %v1342_v41  ;;  %v1405_v37 = vadd.f32 %v1404_v57, %v1341_v5  ;;  %v1657_v47 = vld [vmem:[#allocation7 + $0x1d0] sm:$0xff]  ;;  %1723 = vmatpush.msra.mxu1 %v1674_v35  ;;  %v3941_v57 = vld [vmem:[%s4273_s4] sm:$0xf]  ;;  %v1666_v35 = vld [vmem:[#allocation7 + $0x318] sm:$0xff] }
 0x568   :  { %1704 = vmatpush.msra.mxu0 %v1657_v47  ;;  %v1653_v5 = vld [vmem:[#allocation7 + $0x1b0] sm:$0xff]  ;;  %v1493_v28 = vperm.slane %v3941_v57, 0  ;;  %v1499_v9 = vperm.slane %v3941_v57, 1  ;;  %v1648_v47 = vld [vmem:[#allocation7 + $0x188] sm:$0xff] }
 0x569   :  { %v2573_v43 = vmul.f32 -1.442695, %v1425_v39  ;;  %v1667_v39 = vld [vmem:[#allocation7 + $0x320] sm:$0xff] }
 0x56a   :  { %v2710_v27 = vpop.eup %2709  ;;  %1705 = vmatpush.msra.mxu0 %v1656_v51  ;;  %v1777_v51 = vld [vmem:[#allocation5 + $0xf8] sm:$0xff] }
 0x56b   :  { %v2712_v55 = vpop.eup %2711  ;;  %v3881_v52 = vadd.f32 1.0, %v2710_v27  ;;  %2713 = vpow2.f32 %v2573_v43  ;;  %v1640_v27 = vld [vmem:[#allocation7 + $0x48] sm:$0xff]  ;;  %1810 = vmatpush.msra.mxu2 %v1777_v51  ;;  %v1794_v51 = vld [vmem:[#allocation5 + $0x380] sm:$0xff] }
 0x56c   :  { %v3883_v56 = vadd.f32 1.0, %v2712_v55  ;;  %v1673_v55 = vld [vmem:[#allocation7 + $0x350] sm:$0xff]  ;;  %1685 = vmatpush.msrb.mxu3 %v1640_v27 }
 0x56d   :  { %2715 = vrcp.f32 %v3881_v52  ;;  %v1442_v18 = vand.u32 2147483648, %v3881_v52  ;;  %v1440_v14 = vand.u32 2147483647, %v3881_v52  ;;  %vm1436_vm7 = vweird.f32 %v3881_v52  ;;  %1724 = vmatpush.msra.mxu1 %v1673_v55  ;;  %v1792_v27 = vld [vmem:[#allocation5 + $0x270] sm:$0xff] }
 0x56e   :  { %2717 = vrcp.f32 %v3883_v56  ;;  %v1461_v34 = vand.u32 2147483648, %v3883_v56  ;;  %v1459_v44 = vand.u32 2147483647, %v3883_v56  ;;  %vm1455_vm8 = vweird.f32 %v3883_v56  ;;  %1686 = vmatpush.msrb.mxu3 %v1639_v4  ;;  %v1776_v55 = vld [vmem:[#allocation5 + $0xf0] sm:$0xff]  ;;  %v1807_v4 = vld [vmem:[#allocation5 + $0x3e8] sm:$0xff] }
 0x56f   :  { %v1443_v41 = vor.u32 1.1754944e-38, %v1442_v18  ;;  %vm1441_vm11 = vcmp.eq.f32.partialorder %v1440_v14, 8.507059e+37  ;;  %1725 = vmatpush.msra.mxu1 %v1672_v58  ;;  %1811 = vmatpush.msra.mxu2 %v1776_v55  ;;  %v1774_v58 = vld [vmem:[#allocation5 + $0xe0] sm:$0xff]  ;;  %v1916_v55 = vld [vmem:[#allocation7 + $0x270] sm:$0xff] }
 0x570   :  { %v1462_v45 = vor.u32 1.1754944e-38, %v1461_v34  ;;  %vm1460_vm12 = vcmp.eq.f32.partialorder %v1459_v44, 8.507059e+37  ;;  %1687 = vmatpush.msrb.mxu3 %v1638_v25  ;;  %v1789_v25 = vld [vmem:[#allocation5 + $0x258] sm:$0xff] }
 0x571   :  { %v2714_v53 = vpop.eup %2713  ;;  %1726 = vmatpush.msra.mxu1 %v1671_v3  ;;  %v1788_v3 = vld [vmem:[#allocation5 + $0x250] sm:$0xff] }
 0x572   :  { %v3888_v7 = vadd.f32 1.0, %v2714_v53  ;;  %v1637_v53 = vld [vmem:[#allocation7 + $0x30] sm:$0xff] }
 0x573   :  { %v3890_v8 = vpop.eup %2715  ;;  %1688 = vmatpush.msrb.mxu3 %v1637_v53  ;;  %1727 = vmatpush.msra.mxu1 %v1670_v61  ;;  %v1804_v53 = vld [vmem:[#allocation5 + $0x3d0] sm:$0xff]  ;;  %v1803_v61 = vld [vmem:[#allocation5 + $0x3c8] sm:$0xff] }
 0x574   :  { %v3892_v23 = vpop.eup %2717  ;;  %v1432_v24 = vmul.f32 %v3890_v8, %v3881_v52  ;;  %2719 = vrcp.f32 %v3888_v7  ;;  %vm1437_vm5 = vweird.f32 %v3890_v8  ;;  %vm1475_vm14 = vweird.f32 %v3888_v7 }
 0x575   :  { %v1451_v26 = vmul.f32 %v3892_v23, %v3883_v56  ;;  %2721 = vtanh.f32 %v1405_v37  ;;  %vm1456_vm6 = vweird.f32 %v3892_v23  ;;  %vm3914_vm9 = vmor %vm1436_vm7, %vm1437_vm5  ;;  %v1655_v56 = vld [vmem:[#allocation7 + $0x1c0] sm:$0xff]  ;;  %v3953_v37 = vld [vmem:[%s4273_s4 + $0x18] sm:$0xf]  ;;  %1689 = vmatpush.msrb.mxu3 %v1636_v22  ;;  %1728 = vmatpush.msra.mxu1 %v1669_v46 }
 0x576   :  { %v1433_v30 = vsub.f32 1.0, %v1432_v24  ;;  %vm3923_vm10 = vmor %vm1455_vm8, %vm1456_vm6  ;;  %1706 = vmatpush.msra.mxu0 %v1655_v56  ;;  %v1501_v59 = vperm.slane %v3953_v37, 1  ;;  %v1790_v56 = vld [vmem:[#allocation5 + $0x260] sm:$0xff]  ;;  %v1785_v22 = vld [vmem:[#allocation5 + $0x238] sm:$0xff] }
 0x577   :  { %v1452_v32 = vsub.f32 1.0, %v1451_v26  ;;  %v1651_v26 = vld [vmem:[#allocation7 + $0x1a0] sm:$0xff]  ;;  %1690 = vmatpush.msrb.mxu3 %v1635_v36  ;;  %v1622_v36 = vperm.slane %v3941_v57, 3  ;;  %v1800_v46 = vld [vmem:[#allocation5 + $0x3b0] sm:$0xff] }
 0x578   :  { %v1434_v13 = vmul.f32 %v3890_v8, %v1433_v30  ;;  %1707 = vmatpush.msra.mxu0 %v1654_v42  ;;  %v1495_v30 = vperm.slane %v3953_v37, 0  ;;  %v1773_v42 = vld [vmem:[#allocation5 + $0xd8] sm:$0xff] }
 0x579   :  { %v1453_v17 = vmul.f32 %v3892_v23, %v1452_v32 }
 0x57a   :  { %v3907_v15 = vpop.eup %2719  ;;  %v1435_v21 = vadd.f32 %v3890_v8, %v1434_v13  ;;  %1708 = vmatpush.msra.mxu0 %v1653_v5  ;;  %v1787_v5 = vld [vmem:[#allocation5 + $0x248] sm:$0xff] }
 0x57b   :  { %v1454_v40 = vadd.f32 %v3892_v23, %v1453_v17  ;;  %v1471_v19 = vmul.f32 %v3907_v15, %v3888_v7  ;;  %v2722_v43 = vpop.eup %2721  ;;  %vm1476_vm13 = vweird.f32 %v3907_v15 }
 0x57c   :  { %v1439_v48 = vsel %vm3914_vm9, %v3890_v8, %v1435_v21  ;;  %v1479_v8 = vand.u32 2147483647, %v3888_v7  ;;  %vm3957_vm15 = vmor %vm1475_vm14, %vm1476_vm13  ;;  %v1634_v21 = vld [vmem:[#allocation7 + $0x18] sm:$0xff] }
 0x57d   :  { %v1444_v0 = vsel %vm1441_vm11, %v1443_v41, %v1439_v48  ;;  %v1458_v49 = vsel %vm3923_vm10, %v3892_v23, %v1454_v40  ;;  %v1472_v50 = vsub.f32 1.0, %v1471_v19  ;;  %v1652_v23 = vld [vmem:[#allocation7 + $0x1a8] sm:$0xff]  ;;  %1691 = vmatpush.msrb.mxu3 %v1634_v21  ;;  %v1633_v41 = vld [vmem:[#allocation7 + $0x10] sm:$0xff]  ;;  %v1647_v48 = vld [vmem:[#allocation7 + $0x180] sm:$0xff] }
 0x57e   :  { %v1463_v60 = vsel %vm1460_vm12, %v1462_v45, %v1458_v49  ;;  %v1486_v2 = vmul.f32 %v2722_v43, %v1444_v0  ;;  %vm1480_vm0 = vcmp.eq.f32.partialorder %v1479_v8, 8.507059e+37  ;;  %1709 = vmatpush.msra.mxu0 %v1652_v23  ;;  %v1649_v40 = vld [vmem:[#allocation7 + $0x190] sm:$0xff]  ;;  %v1668_v19 = vld [vmem:[#allocation7 + $0x328] sm:$0xff]  ;;  %v1631_v45 = vld [vmem:[#allocation7] sm:$0xff]  ;;  %v1616_v23 = vperm.slane %v3941_v57, 2 }
 0x57f   :  { %v1485_v52 = vmul.f32 %v1463_v60, %v3875_v63  ;;  %v1473_v62 = vmul.f32 %v3907_v15, %v1472_v50  ;;  %v1481_v63 = vand.u32 2147483648, %v3888_v7  ;;  %1692 = vmatpush.msrb.mxu3 %v1633_v41  ;;  %1729 = vmatpush.msra.mxu1 %v1668_v19  ;;  %v1665_v43 = vld [vmem:[#allocation7 + $0x310] sm:$0xff]  ;;  %v1664_v0 = vld [vmem:[#allocation7 + $0x308] sm:$0xff]  ;;  %v1663_v49 = vld [vmem:[#allocation7 + $0x300] sm:$0xff] }
 0x580   :  { %1710 = vmatpush.msra.mxu0 %v1651_v26  ;;  %v1793_v50 = vld [vmem:[#allocation5 + $0x278] sm:$0xff]  ;;  %v1771_v8 = vld [vmem:[#allocation5 + $0xc8] sm:$0xff]  ;;  %v1623_v26 = vperm.slane %v3946_v54, 3 }
 0x581   :  { %v1487_v1 = vadd.f32 %v1486_v2, %v1485_v52  ;;  %v1474_v6 = vadd.f32 %v3907_v15, %v1473_v62  ;;  %v1482_v24 = vor.u32 1.1754944e-38, %v1481_v63  ;;  %1693 = vmatpush.msrb.mxu3 %v1632_v10  ;;  %1730 = vmatpush.msra.mxu1 %v1667_v39  ;;  %v1809_v60 = vld [vmem:[#allocation5 + $0x3f8] sm:$0xff]  ;;  %v1791_v2 = vld [vmem:[#allocation5 + $0x268] sm:$0xff]  ;;  %v1808_v52 = vld [vmem:[#allocation5 + $0x3f0] sm:$0xff] }
 0x582   :  { %1711 = vmatpush.msra.mxu0 %v1650_v38  ;;  %v1775_v62 = vld [vmem:[#allocation5 + $0xe8] sm:$0xff]  ;;  %v1772_v63 = vld [vmem:[#allocation5 + $0xd0] sm:$0xff]  ;;  %v1801_v21 = vld [vmem:[#allocation5 + $0x3b8] sm:$0xff] }
 0x583   :  { %2723 = vtanh.f32 %v1487_v1  ;;  %v1478_v7 = vsel %vm3957_vm15, %v3907_v15, %v1474_v6  ;;  %1694 = vmatpush.msrb.mxu3 %v1631_v45  ;;  %1731 = vmatpush.msra.mxu1 %v1666_v35  ;;  %v1806_v1 = vld [vmem:[#allocation5 + $0x3e0] sm:$0xff]  ;;  %v1805_v6 = vld [vmem:[#allocation5 + $0x3d8] sm:$0xff]  ;;  %v1767_v41 = vld [vmem:[#allocation5 + $0xa8] sm:$0xff] }
 0x584   :  { %v1483_v32 = vsel %vm1480_vm0, %v1482_v24, %v1478_v7  ;;  %1712 = vmatpush.msra.mxu0 %v1649_v40  ;;  %1812 = vmatpush.msra.mxu2 %v1775_v62  ;;  %v1617_v7 = vperm.slane %v3946_v54, 2  ;;  %v1784_v24 = vld [vmem:[#allocation5 + $0x230] sm:$0xff]  ;;  %v1781_v38 = vld [vmem:[#allocation5 + $0x218] sm:$0xff]  ;;  %v1799_v19 = vld [vmem:[#allocation5 + $0x3a8] sm:$0xff] }
 0x585   :  { %1732 = vmatpush.msra.mxu1 %v1665_v43  ;;  %1830 = vmatpush.msra.mxu3 %v1793_v50  ;;  %v1780_v40 = vld [vmem:[#allocation5 + $0x210] sm:$0xff]  ;;  %v1766_v10 = vld [vmem:[#allocation5 + $0xa0] sm:$0xff]  ;;  %v1765_v45 = vld [vmem:[#allocation5 + $0x98] sm:$0xff] }
 0x586   :  { %1713 = vmatpush.msra.mxu0 %v1648_v47  ;;  %1813 = vmatpush.msra.mxu2 %v1774_v58  ;;  %v1779_v47 = vld [vmem:[#allocation5 + $0x208] sm:$0xff]  ;;  %v1798_v39 = vld [vmem:[#allocation5 + $0x3a0] sm:$0xff]  ;;  %v1797_v35 = vld [vmem:[#allocation5 + $0x398] sm:$0xff] }
 0x587   :  { %1733 = vmatpush.msra.mxu1 %v1664_v0  ;;  %1831 = vmatpush.msra.mxu3 %v1792_v27  ;;  %v1764_v43 = vld [vmem:[#allocation5 + $0x90] sm:$0xff]  ;;  %v1795_v50 = vld [vmem:[#allocation5 + $0x388] sm:$0xff]  ;;  %v1762_v27 = vld [vmem:[#allocation5 + $0x80] sm:$0xff] }
 0x588   :  { %1714 = vmatpush.msra.mxu0 %v1647_v48  ;;  %1814 = vmatpush.msra.mxu2 %v1773_v42  ;;  %v1778_v48 = vld [vmem:[#allocation5 + $0x200] sm:$0xff]  ;;  %v1796_v0 = vld [vmem:[#allocation5 + $0x390] sm:$0xff]  ;;  %v1915_v62 = vld [vmem:[#allocation7 + $0x268] sm:$0xff] }
 0x589   :  { %v2724_v31 = vpop.eup %2723  ;;  %1734 = vmatpush.msra.mxu1 %v1663_v49  ;;  %1832 = vmatpush.msra.mxu3 %v1791_v2  ;;  %v1763_v49 = vld [vmem:[#allocation5 + $0x88] sm:$0xff]  ;;  %v1933_v2 = vld [vmem:[#allocation7 + $0x3f8] sm:$0xff]  ;;  %v1900_v58 = vld [vmem:[#allocation7 + $0xf0] sm:$0xff] }
 0x58a   :  { %v3967_v18 = vmul.f32 %v2724_v31, %v1483_v32  ;;  %1815 = vmatpush.msra.mxu2 %v1772_v63  ;;  %v1899_v42 = vld [vmem:[#allocation7 + $0xe8] sm:$0xff]  ;;  %v1898_v63 = vld [vmem:[#allocation7 + $0xe0] sm:$0xff] }
 0x58b   :  { %1833 = vmatpush.msra.mxu3 %v1790_v56  ;;  %v1901_v56 = vld [vmem:[#allocation7 + $0xf8] sm:$0xff] }
 0x58c   :  { %v1496_v34 = vmul.f32 %v1493_v28, %v3967_v18  ;;  %v1497_v13 = vmul.f32 %v1494_v29, %v3967_v18  ;;  %v1498_v14 = vmul.f32 %v1495_v30, %v3967_v18  ;;  %1816 = vmatpush.msra.mxu2 %v1771_v8  ;;  %v1897_v8 = vld [vmem:[#allocation7 + $0xd8] sm:$0xff] }
 0x58d   :  { %1834 = vmatpush.msra.mxu3 %v1789_v25  ;;  %v1930_v25 = vld [vmem:[#allocation7 + $0x3e0] sm:$0xff] }
 0x58e   :  { %v1502_v16 = vadd.f32 %v1499_v9, %v1496_v34  ;;  %v1503_v17 = vadd.f32 %v1500_v33, %v1497_v13  ;;  %v1504_v44 = vadd.f32 %v1501_v59, %v1498_v14  ;;  %v1618_v33 = vperm.slane %v3953_v37, 2 }
 0x58f   :  { %1835 = vmatpush.msra.mxu3 %v1788_v3  ;;  %v1624_v13 = vperm.slane %v3953_v37, 3  ;;  %v1768_v37 = vld [vmem:[#allocation5 + $0xb0] sm:$0xff]  ;;  %v1929_v3 = vld [vmem:[#allocation7 + $0x3d8] sm:$0xff] }
 0x590   :  { %v1505_v12 = vmax.f32 %v1502_v16, 0.0  ;;  %v1506_v11 = vmax.f32 %v1503_v17, 0.0  ;;  %v1507_v15 = vmax.f32 %v1504_v44, 0.0  ;;  %v1770_v17 = vld [vmem:[#allocation5 + $0xc0] sm:$0xff]  ;;  %v1783_v44 = vld [vmem:[#allocation5 + $0x228] sm:$0xff] }
 0x591   :  { %1836 = vmatpush.msra.mxu3 %v1787_v5  ;;  %1817 = vmatpush.msra.mxu2 %v1770_v17  ;;  %v1928_v5 = vld [vmem:[#allocation7 + $0x3d0] sm:$0xff]  ;;  %v4002_v17 = vld [vmem:[%s4273_s4 + $0x1c] sm:$0xf] }
 0x592   :  { %1572 = vmatmul.f32.vlgmr.msrb.gmra.mxu0 %v1505_v12  ;;  %1592 = vmatmul.f32.vlgmr.msrb.gmra.mxu1 %v1506_v11  ;;  %v1802_v12 = vld [vmem:[#allocation5 + $0x3c0] sm:$0xff]  ;;  %v1769_v11 = vld [vmem:[#allocation5 + $0xb8] sm:$0xff] }
 0x593   :  { %1612 = vmatmul.f32.vlgmr.msrb.gmra.mxu2 %v1507_v15  ;;  %1850 = vmatpush.msrb.mxu0 %v1809_v60  ;;  %v1782_v15 = vld [vmem:[#allocation5 + $0x220] sm:$0xff]  ;;  %v1917_v60 = vld [vmem:[#allocation7 + $0x278] sm:$0xff] }
 0x594   :  { %1837 = vmatpush.msra.mxu3 %v1786_v20  ;;  %1818 = vmatpush.msra.mxu2 %v1769_v11  ;;  %v1927_v20 = vld [vmem:[#allocation7 + $0x3c8] sm:$0xff]  ;;  %v1922_v11 = vld [vmem:[#allocation7 + $0x3a0] sm:$0xff] }
 0x595   :  { %1851 = vmatpush.msrb.mxu0 %v1808_v52  ;;  %v1932_v52 = vld [vmem:[#allocation7 + $0x3f0] sm:$0xff]  ;;  %1934 = vmatpush.msrb.mxu1 %v1901_v56  ;;  %v1902_v56 = vld [vmem:[#allocation7 + $0x200] sm:$0xff] }
 0x596   :  { %1838 = vmatpush.msra.mxu3 %v1785_v22  ;;  %1819 = vmatpush.msra.mxu2 %v1768_v37  ;;  %v1896_v22 = vld [vmem:[#allocation7 + $0xd0] sm:$0xff] }
 0x597   :  { %1852 = vmatpush.msrb.mxu0 %v1807_v4  ;;  %v1931_v4 = vld [vmem:[#allocation7 + $0x3e8] sm:$0xff]  ;;  %1935 = vmatpush.msrb.mxu1 %v1900_v58  ;;  %v1918_v58 = vld [vmem:[#allocation7 + $0x380] sm:$0xff] }
 0x598   :  { %1839 = vmatpush.msra.mxu3 %v1784_v24  ;;  %1820 = vmatpush.msra.mxu2 %v1767_v41  ;;  %v1926_v24 = vld [vmem:[#allocation7 + $0x3c0] sm:$0xff]  ;;  %v1748_v41 = vperm.slane %v4002_v17, 0 }
 0x599   :  { %1853 = vmatpush.msrb.mxu0 %v1806_v1  ;;  %v1914_v1 = vld [vmem:[#allocation7 + $0x260] sm:$0xff]  ;;  %1936 = vmatpush.msrb.mxu1 %v1899_v42 }
 0x59a   :  { %1840 = vmatpush.msra.mxu3 %v1783_v44  ;;  %1821 = vmatpush.msra.mxu2 %v1766_v10  ;;  %v1886_v42 = vld [vmem:[#allocation7 + $0x80] sm:$0xff] }
 0x59b   :  { %1854 = vmatpush.msrb.mxu0 %v1805_v6  ;;  %v1913_v6 = vld [vmem:[#allocation7 + $0x258] sm:$0xff]  ;;  %1937 = vmatpush.msrb.mxu1 %v1898_v63 }
 0x59c   :  { %1841 = vmatpush.msra.mxu3 %v1782_v15  ;;  %1822 = vmatpush.msra.mxu2 %v1765_v45  ;;  %v2064_v63 = vld [vmem:[#allocation5 + $0x478] sm:$0xff] }
 0x59d   :  { %1855 = vmatpush.msrb.mxu0 %v1804_v53  ;;  %v1912_v53 = vld [vmem:[#allocation7 + $0x250] sm:$0xff]  ;;  %1938 = vmatpush.msrb.mxu1 %v1897_v8 }
 0x59e   :  { %1842 = vmatpush.msra.mxu3 %v1781_v38  ;;  %1823 = vmatpush.msra.mxu2 %v1764_v43  ;;  %v2063_v8 = vld [vmem:[#allocation5 + $0x470] sm:$0xff] }
 0x59f   :  { %1856 = vmatpush.msrb.mxu0 %v1803_v61  ;;  %v1911_v61 = vld [vmem:[#allocation7 + $0x248] sm:$0xff]  ;;  %1939 = vmatpush.msrb.mxu1 %v1896_v22 }
 0x5a0   :  { %1843 = vmatpush.msra.mxu3 %v1780_v40  ;;  %1824 = vmatpush.msra.mxu2 %v1763_v49  ;;  %v1892_v49 = vld [vmem:[#allocation7 + $0xb0] sm:$0xff]  ;;  %v2062_v22 = vld [vmem:[#allocation5 + $0x468] sm:$0xff] }
 0x5a1   :  { %1857 = vmatpush.msrb.mxu0 %v1802_v12  ;;  %v1906_v12 = vld [vmem:[#allocation7 + $0x220] sm:$0xff] }
 0x5a2   :  { %1844 = vmatpush.msra.mxu3 %v1779_v47  ;;  %1825 = vmatpush.msra.mxu2 %v1762_v27  ;;  %v1921_v27 = vld [vmem:[#allocation7 + $0x398] sm:$0xff] }
 0x5a3   :  { %1858 = vmatpush.msrb.mxu0 %v1801_v21 }
 0x5a4   :  { %1845 = vmatpush.msra.mxu3 %v1778_v48  ;;  %1954 = vmatpush.msrb.mxu2 %v1917_v60  ;;  %v1904_v60 = vld [vmem:[#allocation7 + $0x210] sm:$0xff] }
 0x5a5   :  { %1859 = vmatpush.msrb.mxu0 %v1800_v46 }
 0x5a6   :  { %1955 = vmatpush.msrb.mxu2 %v1916_v55  ;;  %v1890_v55 = vld [vmem:[#allocation7 + $0xa0] sm:$0xff] }
 0x5a7   :  { %1860 = vmatpush.msrb.mxu0 %v1799_v19 }
 0x5a8   :  { %1956 = vmatpush.msrb.mxu2 %v1915_v62  ;;  %v1919_v62 = vld [vmem:[#allocation7 + $0x388] sm:$0xff] }
 0x5a9   :  { %1861 = vmatpush.msrb.mxu0 %v1798_v39  ;;  %v1754_v39 = vperm.slane %v4002_v17, 1 }
 0x5aa   :  { %1957 = vmatpush.msrb.mxu2 %v1914_v1  ;;  %v1888_v1 = vld [vmem:[#allocation7 + $0x90] sm:$0xff] }
 0x5ab   :  { %1862 = vmatpush.msrb.mxu0 %v1797_v35 }
 0x5ac   :  { %1958 = vmatpush.msrb.mxu2 %v1913_v6  ;;  %v2032_v6 = vld [vmem:[#allocation5 + $0x178] sm:$0xff] }
 0x5ad   :  { %1863 = vmatpush.msrb.mxu0 %v1796_v0 }
 0x5ae   :  { %1959 = vmatpush.msrb.mxu2 %v1912_v53  ;;  %v2031_v53 = vld [vmem:[#allocation5 + $0x170] sm:$0xff] }
 0x5af   :  { %1864 = vmatpush.msrb.mxu0 %v1795_v50  ;;  %v1905_v50 = vld [vmem:[#allocation7 + $0x218] sm:$0xff] }
 0x5b0   :  { %1960 = vmatpush.msrb.mxu2 %v1911_v61  ;;  %v2030_v61 = vld [vmem:[#allocation5 + $0x168] sm:$0xff] }
 0x5b1   :  { %1865 = vmatpush.msrb.mxu0 %v1794_v51  ;;  %v1891_v51 = vld [vmem:[#allocation7 + $0xa8] sm:$0xff] }
 0x60f   :  { %v1573_v28 = vpop.f32.mrf.mxu0  ;;  %v1593_v29 = vpop.f32.mrf.mxu1 }
 0x610   :  { %v1619_v30 = vmul.f32 %v1616_v23, %v1573_v28  ;;  %v1620_v31 = vmul.f32 %v1617_v7, %v1593_v29  ;;  %v3984_v23 = vld [vmem:[%s4273_s4 + $0x10] sm:$0xf]  ;;  %v1910_v7 = vld [vmem:[#allocation7 + $0x240] sm:$0xff]  ;;  %v1909_v28 = vld [vmem:[#allocation7 + $0x238] sm:$0xff] }
 0x611   :  { %v1925_v29 = vld [vmem:[#allocation7 + $0x3b8] sm:$0xff]  ;;  %1961 = vmatpush.msrb.mxu2 %v1910_v7  ;;  %v2029_v7 = vld [vmem:[#allocation5 + $0x160] sm:$0xff] }
 0x612   :  { %v1625_v32 = vadd.f32 %v1622_v36, %v1619_v30  ;;  %v1626_v9 = vadd.f32 %v1623_v26, %v1620_v31  ;;  %v1895_v36 = vld [vmem:[#allocation7 + $0xc8] sm:$0xff]  ;;  %v1747_v31 = vperm.slane %v3984_v23, 0 }
 0x613   :  { %1940 = vmatpush.msrb.mxu1 %v1895_v36  ;;  %1962 = vmatpush.msrb.mxu2 %v1909_v28  ;;  %v2061_v36 = vld [vmem:[#allocation5 + $0x460] sm:$0xff]  ;;  %v2044_v28 = vld [vmem:[#allocation5 + $0x2d8] sm:$0xff] }
 0x614   :  { %v1628_v59 = vmax.f32 %v1625_v32, 0.0  ;;  %v1629_v34 = vmax.f32 %v1626_v9, 0.0  ;;  %v1894_v32 = vld [vmem:[#allocation7 + $0xc0] sm:$0xff]  ;;  %v1908_v9 = vld [vmem:[#allocation7 + $0x230] sm:$0xff] }
 0x615   :  { %1941 = vmatpush.msrb.mxu1 %v1894_v32  ;;  %1963 = vmatpush.msrb.mxu2 %v1908_v9  ;;  %v2043_v32 = vld [vmem:[#allocation5 + $0x2d0] sm:$0xff] }
 0x616   :  { %v1613_v14 = vpop.f32.mrf.mxu2  ;;  %1695 = vmatmul.f32.vlgmr.msrb.gmra.mxu3 %v1628_v59  ;;  %1715 = vmatmul.f32.vlgmr.msra.gmra.mxu0 %v1629_v34  ;;  %v1753_v34 = vperm.slane %v3984_v23, 1  ;;  %v2059_v9 = vld [vmem:[#allocation5 + $0x450] sm:$0xff] }
 0x617   :  { %v1621_v57 = vmul.f32 %v1618_v33, %v1613_v14  ;;  %1974 = vmatpush.msrb.mxu3 %v1933_v2  ;;  %v1924_v33 = vld [vmem:[#allocation7 + $0x3b0] sm:$0xff]  ;;  %v3995_v14 = vld [vmem:[%s4273_s4 + $0x4] sm:$0xf]  ;;  %2065 = vmatpush.msra.mxu0 %v2032_v6 }
 0x618   :  { %v1746_v37 = vperm.slane %v3995_v14, 0  ;;  %v1752_v10 = vperm.slane %v3995_v14, 1  ;;  %v1920_v2 = vld [vmem:[#allocation7 + $0x390] sm:$0xff] }
 0x619   :  { %v1627_v16 = vadd.f32 %v1624_v13, %v1621_v57  ;;  %1975 = vmatpush.msrb.mxu3 %v1932_v52  ;;  %v1893_v13 = vld [vmem:[#allocation7 + $0xb8] sm:$0xff]  ;;  %v1907_v57 = vld [vmem:[#allocation7 + $0x228] sm:$0xff]  ;;  %2066 = vmatpush.msra.mxu0 %v2031_v53  ;;  %v2035_v6 = vld [vmem:[#allocation5 + $0x290] sm:$0xff] }
 0x61a   :  { %1942 = vmatpush.msrb.mxu1 %v1893_v13  ;;  %1964 = vmatpush.msrb.mxu2 %v1907_v57  ;;  %v1903_v52 = vld [vmem:[#allocation7 + $0x208] sm:$0xff]  ;;  %v2025_v57 = vld [vmem:[#allocation5 + $0x140] sm:$0xff] }
 0x61b   :  { %v1630_v54 = vmax.f32 %v1627_v16, 0.0  ;;  %1976 = vmatpush.msrb.mxu3 %v1931_v4  ;;  %v1923_v16 = vld [vmem:[#allocation7 + $0x3a8] sm:$0xff]  ;;  %v1889_v4 = vld [vmem:[#allocation7 + $0x98] sm:$0xff]  ;;  %2067 = vmatpush.msra.mxu0 %v2030_v61  ;;  %v2033_v61 = vld [vmem:[#allocation5 + $0x280] sm:$0xff] }
 0x61c   :  { %1965 = vmatpush.msrb.mxu2 %v1906_v12  ;;  %1943 = vmatpush.msrb.mxu1 %v1892_v49  ;;  %v2058_v13 = vld [vmem:[#allocation5 + $0x448] sm:$0xff]  ;;  %v2040_v12 = vld [vmem:[#allocation5 + $0x2b8] sm:$0xff] }
 0x61d   :  { %1735 = vmatmul.f32.vlgmr.msra.gmra.mxu1 %v1630_v54  ;;  %1977 = vmatpush.msrb.mxu3 %v1930_v25  ;;  %v1887_v25 = vld [vmem:[#allocation7 + $0x88] sm:$0xff] }
 0x61e   :  { %1966 = vmatpush.msrb.mxu2 %v1905_v50  ;;  %1944 = vmatpush.msrb.mxu1 %v1891_v51  ;;  %v2034_v53 = vld [vmem:[#allocation5 + $0x288] sm:$0xff] }
 0x61f   :  { %1978 = vmatpush.msrb.mxu3 %v1929_v3  ;;  %v2048_v3 = vld [vmem:[#allocation5 + $0x2f8] sm:$0xff]  ;;  %2068 = vmatpush.msra.mxu0 %v2029_v7 }
 0x620   :  { %1967 = vmatpush.msrb.mxu2 %v1904_v60  ;;  %1945 = vmatpush.msrb.mxu1 %v1890_v55  ;;  %v2022_v55 = vld [vmem:[#allocation5 + $0x128] sm:$0xff]  ;;  %v2172_v7 = vld [vmem:[#allocation7 + $0x2f8] sm:$0xff] }
 0x621   :  { %1979 = vmatpush.msrb.mxu3 %v1928_v5  ;;  %v2047_v5 = vld [vmem:[#allocation5 + $0x2f0] sm:$0xff] }
 0x622   :  { %1968 = vmatpush.msrb.mxu2 %v1903_v52  ;;  %1946 = vmatpush.msrb.mxu1 %v1889_v4  ;;  %v2038_v52 = vld [vmem:[#allocation5 + $0x2a8] sm:$0xff]  ;;  %v2021_v4 = vld [vmem:[#allocation5 + $0x120] sm:$0xff] }
 0x623   :  { %1980 = vmatpush.msrb.mxu3 %v1927_v20  ;;  %v2046_v20 = vld [vmem:[#allocation5 + $0x2e8] sm:$0xff] }
 0x624   :  { %1969 = vmatpush.msrb.mxu2 %v1902_v56  ;;  %1947 = vmatpush.msrb.mxu1 %v1888_v1  ;;  %v2037_v56 = vld [vmem:[#allocation5 + $0x2a0] sm:$0xff]  ;;  %v2036_v1 = vld [vmem:[#allocation5 + $0x298] sm:$0xff] }
 0x625   :  { %1981 = vmatpush.msrb.mxu3 %v1926_v24  ;;  %v2045_v24 = vld [vmem:[#allocation5 + $0x2e0] sm:$0xff] }
 0x626   :  { %1948 = vmatpush.msrb.mxu1 %v1887_v25  ;;  %v2052_v25 = vld [vmem:[#allocation5 + $0x418] sm:$0xff] }
 0x627   :  { %1982 = vmatpush.msrb.mxu3 %v1925_v29  ;;  %v2060_v29 = vld [vmem:[#allocation5 + $0x458] sm:$0xff] }
 0x628   :  { %1949 = vmatpush.msrb.mxu1 %v1886_v42  ;;  %v2019_v42 = vld [vmem:[#allocation5 + $0x110] sm:$0xff] }
 0x629   :  { %1983 = vmatpush.msrb.mxu3 %v1924_v33  ;;  %v2026_v33 = vld [vmem:[#allocation5 + $0x148] sm:$0xff] }
 0x62a   :  { %2085 = vmatpush.msra.mxu1 %v2048_v3  ;;  %v2051_v3 = vld [vmem:[#allocation5 + $0x410] sm:$0xff] }
 0x62b   :  { %1984 = vmatpush.msrb.mxu3 %v1923_v16  ;;  %v2041_v16 = vld [vmem:[#allocation5 + $0x2c0] sm:$0xff] }
 0x62c   :  { %2086 = vmatpush.msra.mxu1 %v2047_v5  ;;  %v2050_v5 = vld [vmem:[#allocation5 + $0x408] sm:$0xff] }
 0x62d   :  { %1985 = vmatpush.msrb.mxu3 %v1922_v11  ;;  %v2056_v11 = vld [vmem:[#allocation5 + $0x438] sm:$0xff] }
 0x62e   :  { %2087 = vmatpush.msra.mxu1 %v2046_v20  ;;  %v2049_v20 = vld [vmem:[#allocation5 + $0x400] sm:$0xff] }
 0x62f   :  { %1986 = vmatpush.msrb.mxu3 %v1921_v27  ;;  %v1876_v27 = vperm.slane %v3995_v14, 3 }
 0x630   :  { %2088 = vmatpush.msra.mxu1 %v2045_v24  ;;  %v2155_v24 = vld [vmem:[#allocation7 + $0x170] sm:$0xff] }
 0x631   :  { %1987 = vmatpush.msrb.mxu3 %v1920_v2 }
 0x632   :  { %2089 = vmatpush.msra.mxu1 %v2044_v28  ;;  %v2170_v28 = vld [vmem:[#allocation7 + $0x2e8] sm:$0xff] }
 0x633   :  { %1988 = vmatpush.msrb.mxu3 %v1919_v62  ;;  %v2054_v62 = vld [vmem:[#allocation5 + $0x428] sm:$0xff] }
 0x634   :  { %2090 = vmatpush.msra.mxu1 %v2043_v32  ;;  %v2153_v32 = vld [vmem:[#allocation7 + $0x160] sm:$0xff] }
 0x635   :  { %1989 = vmatpush.msrb.mxu3 %v1918_v58  ;;  %v2053_v58 = vld [vmem:[#allocation5 + $0x420] sm:$0xff] }
 0x693   :  { %v1716_v26 = vpop.f32.mrf.mxu0 }
 0x694   :  { %v3987_v30 = vadd.f32 %v1716_v26, %v3967_v18  ;;  %v2028_v26 = vld [vmem:[#allocation5 + $0x158] sm:$0xff] }
 0x695   :  { %2069 = vmatpush.msra.mxu0 %v2028_v26  ;;  %v2154_v26 = vld [vmem:[#allocation7 + $0x168] sm:$0xff] }
 0x696   :  { %v1740_v59 = vmax.f32 %v3987_v30, 0.0 }
 0x698   :  { %v1750_v54 = vmul.f32 %v1747_v31, %v1740_v59  ;;  %v2027_v31 = vld [vmem:[#allocation5 + $0x150] sm:$0xff] }
 0x699   :  { %v1696_v44 = vpop.f32.mrf.mxu3  ;;  %2070 = vmatpush.msra.mxu0 %v2027_v31  ;;  %v2187_v31 = vld [vmem:[#allocation7 + $0x470] sm:$0xff] }
 0x69a   :  { %v1756_v15 = vadd.f32 %v1753_v34, %v1750_v54  ;;  %v4005_v21 = vadd.f32 %v1696_v44, %v3967_v18  ;;  %v1736_v38 = vpop.f32.mrf.mxu1  ;;  %v2042_v34 = vld [vmem:[#allocation5 + $0x2c8] sm:$0xff]  ;;  %v2057_v54 = vld [vmem:[#allocation5 + $0x440] sm:$0xff]  ;;  %v2024_v44 = vld [vmem:[#allocation5 + $0x138] sm:$0xff] }
 0x69b   :  { %v4009_v46 = vadd.f32 %v1736_v38, %v3967_v18  ;;  %2071 = vmatpush.msra.mxu0 %v2026_v33  ;;  %2091 = vmatpush.msra.mxu1 %v2042_v34  ;;  %v2039_v38 = vld [vmem:[#allocation5 + $0x2b0] sm:$0xff]  ;;  %v2186_v33 = vld [vmem:[#allocation7 + $0x468] sm:$0xff]  ;;  %v2152_v34 = vld [vmem:[#allocation7 + $0x158] sm:$0xff] }
 0x69c   :  { %v1759_v40 = vmax.f32 %v1756_v15, 0.0  ;;  %v1739_v19 = vmax.f32 %v4005_v21, 0.0  ;;  %v1871_v15 = vperm.slane %v3984_v23, 2 }
 0x69d   :  { %v1741_v47 = vmax.f32 %v4009_v46, 0.0  ;;  %2072 = vmatpush.msra.mxu0 %v2025_v57  ;;  %2092 = vmatpush.msra.mxu1 %v2041_v16  ;;  %v2185_v57 = vld [vmem:[#allocation7 + $0x460] sm:$0xff]  ;;  %v2151_v16 = vld [vmem:[#allocation7 + $0x150] sm:$0xff] }
 0x69e   :  { %v1749_v45 = vmul.f32 %v1746_v37, %v1739_v19  ;;  %1846 = vmatmul.f32.vlgmr.msra.gmra.mxu3 %v1759_v40  ;;  %v2023_v37 = vld [vmem:[#allocation5 + $0x130] sm:$0xff] }
 0x69f   :  { %v1751_v18 = vmul.f32 %v1748_v41, %v1741_v47  ;;  %v1872_v41 = vperm.slane %v4002_v17, 2  ;;  %2073 = vmatpush.msra.mxu0 %v2024_v44  ;;  %2093 = vmatpush.msra.mxu1 %v2040_v12  ;;  %v2055_v40 = vld [vmem:[#allocation5 + $0x430] sm:$0xff]  ;;  %v2184_v44 = vld [vmem:[#allocation7 + $0x458] sm:$0xff]  ;;  %v2150_v12 = vld [vmem:[#allocation7 + $0x148] sm:$0xff] }
 0x6a0   :  { %v1755_v48 = vadd.f32 %v1752_v10, %v1749_v45  ;;  %v1877_v10 = vperm.slane %v3984_v23, 3  ;;  %v1878_v45 = vperm.slane %v4002_v17, 3 }
 0x6a1   :  { %v1757_v35 = vadd.f32 %v1754_v39, %v1751_v18  ;;  %2074 = vmatpush.msra.mxu0 %v2023_v37  ;;  %2094 = vmatpush.msra.mxu1 %v2039_v38  ;;  %v2149_v37 = vld [vmem:[#allocation7 + $0x140] sm:$0xff] }
 0x6a2   :  { %v1758_v43 = vmax.f32 %v1755_v48, 0.0  ;;  %v2165_v38 = vld [vmem:[#allocation7 + $0x2c0] sm:$0xff] }
 0x6a3   :  { %v1760_v0 = vmax.f32 %v1757_v35, 0.0  ;;  %2075 = vmatpush.msra.mxu0 %v2022_v55  ;;  %2095 = vmatpush.msra.mxu1 %v2038_v52 }
 0x6a4   :  { %1826 = vmatmul.f32.vlgmr.msra.gmra.mxu2 %v1758_v43 }
 0x6a5   :  { %1866 = vmatmul.f32.vlgmr.msrb.gmra.mxu0 %v1760_v0  ;;  %2105 = vmatpush.msra.mxu2 %v2064_v63  ;;  %v1870_v0 = vperm.slane %v3995_v14, 2  ;;  %v2020_v14 = vld [vmem:[#allocation5 + $0x118] sm:$0xff]  ;;  %v2018_v63 = vld [vmem:[#allocation5 + $0x108] sm:$0xff] }
 0x6a6   :  { %2076 = vmatpush.msra.mxu0 %v2021_v4  ;;  %2096 = vmatpush.msra.mxu1 %v2037_v56 }
 0x6a7   :  { %2106 = vmatpush.msra.mxu2 %v2063_v8  ;;  %v2017_v8 = vld [vmem:[#allocation5 + $0x100] sm:$0xff] }
 0x6a8   :  { %2077 = vmatpush.msra.mxu0 %v2020_v14  ;;  %2097 = vmatpush.msra.mxu1 %v2036_v1 }
 0x6a9   :  { %2107 = vmatpush.msra.mxu2 %v2062_v22  ;;  %v2156_v22 = vld [vmem:[#allocation7 + $0x178] sm:$0xff] }
 0x6aa   :  { %2078 = vmatpush.msra.mxu0 %v2019_v42  ;;  %2098 = vmatpush.msra.mxu1 %v2035_v6 }
 0x6ab   :  { %2108 = vmatpush.msra.mxu2 %v2061_v36  ;;  %2189 = vmatpush.msra.mxu3 %v2156_v22  ;;  %v2171_v36 = vld [vmem:[#allocation7 + $0x2f0] sm:$0xff] }
 0x6ac   :  { %2079 = vmatpush.msra.mxu0 %v2018_v63  ;;  %2099 = vmatpush.msra.mxu1 %v2034_v53  ;;  %v2159_v22 = vld [vmem:[#allocation7 + $0x290] sm:$0xff] }
 0x6ad   :  { %2109 = vmatpush.msra.mxu2 %v2060_v29  ;;  %v2188_v29 = vld [vmem:[#allocation7 + $0x478] sm:$0xff]  ;;  %2190 = vmatpush.msra.mxu3 %v2155_v24  ;;  %v2142_v24 = vld [vmem:[#allocation7 + $0x108] sm:$0xff] }
 0x6ae   :  { %2080 = vmatpush.msra.mxu0 %v2017_v8  ;;  %2100 = vmatpush.msra.mxu1 %v2033_v61  ;;  %v2160_v8 = vld [vmem:[#allocation7 + $0x298] sm:$0xff]  ;;  %v2179_v61 = vld [vmem:[#allocation7 + $0x430] sm:$0xff] }
 0x6af   :  { %2110 = vmatpush.msra.mxu2 %v2059_v9  ;;  %v2169_v9 = vld [vmem:[#allocation7 + $0x2e0] sm:$0xff]  ;;  %2191 = vmatpush.msra.mxu3 %v2154_v26 }
 0x6b0   :  { %2209 = vmatpush.msrb.mxu0 %v2172_v7  ;;  %v2178_v7 = vld [vmem:[#allocation7 + $0x428] sm:$0xff]  ;;  %v2177_v26 = vld [vmem:[#allocation7 + $0x420] sm:$0xff] }
 0x6b1   :  { %2111 = vmatpush.msra.mxu2 %v2058_v13  ;;  %v2168_v13 = vld [vmem:[#allocation7 + $0x2d8] sm:$0xff]  ;;  %2192 = vmatpush.msra.mxu3 %v2153_v32  ;;  %v2175_v32 = vld [vmem:[#allocation7 + $0x410] sm:$0xff] }
 0x6b2   :  { %2210 = vmatpush.msrb.mxu0 %v2171_v36  ;;  %v2158_v36 = vld [vmem:[#allocation7 + $0x288] sm:$0xff] }
 0x6b3   :  { %2112 = vmatpush.msra.mxu2 %v2057_v54  ;;  %v2167_v54 = vld [vmem:[#allocation7 + $0x2d0] sm:$0xff]  ;;  %2193 = vmatpush.msra.mxu3 %v2152_v34  ;;  %v2314_v34 = vld [vmem:[%s4277_s8 + $0xf8] sm:$0xff] }
 0x6b4   :  { %2211 = vmatpush.msrb.mxu0 %v2170_v28  ;;  %v2141_v28 = vld [vmem:[#allocation7 + $0x100] sm:$0xff] }
 0x6b5   :  { %2113 = vmatpush.msra.mxu2 %v2056_v11  ;;  %v2166_v11 = vld [vmem:[#allocation7 + $0x2c8] sm:$0xff]  ;;  %2194 = vmatpush.msra.mxu3 %v2151_v16  ;;  %v2330_v16 = vld [vmem:[%s4277_s8 + $0x178] sm:$0xff] }
 0x6b6   :  { %2212 = vmatpush.msrb.mxu0 %v2169_v9  ;;  %v2174_v9 = vld [vmem:[#allocation7 + $0x408] sm:$0xff] }
 0x6b7   :  { %2114 = vmatpush.msra.mxu2 %v2055_v40  ;;  %2195 = vmatpush.msra.mxu3 %v2150_v12  ;;  %v2148_v40 = vld [vmem:[#allocation7 + $0x138] sm:$0xff]  ;;  %v2329_v12 = vld [vmem:[%s4277_s8 + $0x170] sm:$0xff] }
 0x6b8   :  { %2213 = vmatpush.msrb.mxu0 %v2168_v13  ;;  %v2313_v13 = vld [vmem:[%s4277_s8 + $0xf0] sm:$0xff] }
 0x6b9   :  { %2115 = vmatpush.msra.mxu2 %v2054_v62  ;;  %2196 = vmatpush.msra.mxu3 %v2149_v37  ;;  %v2311_v37 = vld [vmem:[%s4277_s8 + $0xe0] sm:$0xff] }
 0x6ba   :  { %2214 = vmatpush.msrb.mxu0 %v2167_v54  ;;  %v2312_v54 = vld [vmem:[%s4277_s8 + $0xe8] sm:$0xff] }
 0x6bb   :  { %2116 = vmatpush.msra.mxu2 %v2053_v58  ;;  %2197 = vmatpush.msra.mxu3 %v2148_v40  ;;  %v2310_v40 = vld [vmem:[%s4277_s8 + $0xd8] sm:$0xff] }
 0x6bc   :  { %2215 = vmatpush.msrb.mxu0 %v2166_v11  ;;  %v2296_v11 = vld [vmem:[%s4277_s8 + $0x68] sm:$0xff] }
 0x6bd   :  { %2117 = vmatpush.msra.mxu2 %v2052_v25 }
 0x6be   :  { %2216 = vmatpush.msrb.mxu0 %v2165_v38  ;;  %v2295_v38 = vld [vmem:[%s4277_s8 + $0x60] sm:$0xff] }
 0x6bf   :  { %2118 = vmatpush.msra.mxu2 %v2051_v3 }
 0x6c1   :  { %2119 = vmatpush.msra.mxu2 %v2050_v5  ;;  %v2144_v5 = vld [vmem:[#allocation7 + $0x118] sm:$0xff] }
 0x6c3   :  { %2120 = vmatpush.msra.mxu2 %v2049_v20  ;;  %v2143_v20 = vld [vmem:[#allocation7 + $0x110] sm:$0xff] }
 0x721   :  { %v1847_v39 = vpop.f32.mrf.mxu3 }
 0x722   :  { %v1874_v18 = vmul.f32 %v1871_v15, %v1847_v39  ;;  %v1867_v48 = vpop.f32.mrf.mxu0  ;;  %v2183_v15 = vld [vmem:[#allocation7 + $0x450] sm:$0xff]  ;;  %v2181_v39 = vld [vmem:[#allocation7 + $0x440] sm:$0xff] }
 0x723   :  { %v1875_v35 = vmul.f32 %v1872_v41, %v1867_v48  ;;  %v2182_v41 = vld [vmem:[#allocation7 + $0x448] sm:$0xff] }
 0x724   :  { %v1880_v43 = vadd.f32 %v1877_v10, %v1874_v18  ;;  %v2164_v10 = vld [vmem:[#allocation7 + $0x2b8] sm:$0xff]  ;;  %v2163_v18 = vld [vmem:[#allocation7 + $0x2b0] sm:$0xff]  ;;  %v4029_v48 = vld [vmem:[%s4273_s4 + $0x8] sm:$0xf] }
 0x725   :  { %v1881_v49 = vadd.f32 %v1878_v45, %v1875_v35  ;;  %v2147_v45 = vld [vmem:[#allocation7 + $0x130] sm:$0xff]  ;;  %2217 = vmatpush.msrb.mxu0 %v2164_v10  ;;  %v2180_v35 = vld [vmem:[#allocation7 + $0x438] sm:$0xff] }
 0x726   :  { %v1883_v50 = vmax.f32 %v1880_v43, 0.0  ;;  %v4034_v43 = vld [vmem:[%s4273_s4 + $0x14] sm:$0xf]  ;;  %2198 = vmatpush.msra.mxu3 %v2147_v45  ;;  %v2294_v10 = vld [vmem:[%s4277_s8 + $0x58] sm:$0xff] }
 0x727   :  { %v1884_v51 = vmax.f32 %v1881_v49, 0.0  ;;  %v1827_v60 = vpop.f32.mrf.mxu2  ;;  %v2162_v49 = vld [vmem:[#allocation7 + $0x2a8] sm:$0xff]  ;;  %2218 = vmatpush.msrb.mxu0 %v2163_v18  ;;  %v2002_v52 = vperm.slane %v4034_v43, 0  ;;  %v2008_v30 = vperm.slane %v4034_v43, 1  ;;  %v2309_v45 = vld [vmem:[%s4277_s8 + $0xd0] sm:$0xff] }
 0x728   :  { %v1873_v23 = vmul.f32 %v1870_v0, %v1827_v60  ;;  %1970 = vmatmul.f32.vlgmr.msrb.gmra.mxu2 %v1883_v50  ;;  %v2146_v0 = vld [vmem:[#allocation7 + $0x128] sm:$0xff]  ;;  %v4039_v50 = vld [vmem:[%s4273_s4 + $0x20] sm:$0xf]  ;;  %v2293_v18 = vld [vmem:[%s4277_s8 + $0x50] sm:$0xff]  ;;  %s2521_s4 = sshll.u32 %s2903_s26, 4  ;;  %s2522_s4 = int_to_ptr.vmem [resolvable:$true] %s2521_s4 }
 0x729   :  { %1990 = vmatmul.f32.vlgmr.msrb.gmra.mxu3 %v1884_v51  ;;  %v2145_v60 = vld [vmem:[#allocation7 + $0x120] sm:$0xff]  ;;  %2219 = vmatpush.msrb.mxu0 %v2162_v49  ;;  %v2003_v56 = vperm.slane %v4039_v50, 0  ;;  %v2009_v14 = vperm.slane %v4039_v50, 1  ;;  %v2292_v49 = vld [vmem:[%s4277_s8 + $0x48] sm:$0xff] }
 0x72a   :  { %v1879_v2 = vadd.f32 %v1876_v27, %v1873_v23  ;;  %v2161_v23 = vld [vmem:[#allocation7 + $0x2a0] sm:$0xff]  ;;  %2199 = vmatpush.msra.mxu3 %v2146_v0  ;;  %v2308_v0 = vld [vmem:[%s4277_s8 + $0xc8] sm:$0xff] }
 0x72b   :  { %2220 = vmatpush.msrb.mxu0 %v2161_v23  ;;  %v2125_v23 = vperm.slane %v4029_v48, 2 }
 0x72c   :  { %v1882_v17 = vmax.f32 %v1879_v2, 0.0  ;;  %2200 = vmatpush.msra.mxu3 %v2145_v60  ;;  %v2306_v60 = vld [vmem:[%s4277_s8 + $0xb8] sm:$0xff] }
 0x72d   :  { %2221 = vmatpush.msrb.mxu0 %v2160_v8  ;;  %v2304_v8 = vld [vmem:[%s4277_s8 + $0xa8] sm:$0xff] }
 0x72e   :  { %1950 = vmatmul.f32.vlgmr.msrb.gmra.mxu1 %v1882_v17  ;;  %v2001_v17 = vperm.slane %v4029_v48, 0  ;;  %2201 = vmatpush.msra.mxu3 %v2144_v5  ;;  %v2291_v5 = vld [vmem:[%s4277_s8 + $0x40] sm:$0xff] }
 0x72f   :  { %2229 = vmatpush.msrb.mxu1 %v2188_v29  ;;  %2222 = vmatpush.msrb.mxu0 %v2159_v22  ;;  %v2157_v29 = vld [vmem:[#allocation7 + $0x280] sm:$0xff]  ;;  %v2322_v22 = vld [vmem:[%s4277_s8 + $0x138] sm:$0xff] }
 0x730   :  { %2202 = vmatpush.msra.mxu3 %v2143_v20  ;;  %v2303_v20 = vld [vmem:[%s4277_s8 + $0xa0] sm:$0xff] }
 0x731   :  { %2230 = vmatpush.msrb.mxu1 %v2187_v31  ;;  %2223 = vmatpush.msrb.mxu0 %v2158_v36  ;;  %v2176_v31 = vld [vmem:[#allocation7 + $0x418] sm:$0xff]  ;;  %v2321_v36 = vld [vmem:[%s4277_s8 + $0x130] sm:$0xff] }
 0x732   :  { %2203 = vmatpush.msra.mxu3 %v2142_v24  ;;  %v2302_v24 = vld [vmem:[%s4277_s8 + $0x98] sm:$0xff] }
 0x733   :  { %2231 = vmatpush.msrb.mxu1 %v2186_v33  ;;  %2224 = vmatpush.msrb.mxu0 %v2157_v29  ;;  %v2173_v33 = vld [vmem:[#allocation7 + $0x400] sm:$0xff]  ;;  %v2320_v29 = vld [vmem:[%s4277_s8 + $0x128] sm:$0xff] }
 0x734   :  { %2204 = vmatpush.msra.mxu3 %v2141_v28  ;;  %v2301_v28 = vld [vmem:[%s4277_s8 + $0x90] sm:$0xff] }
 0x735   :  { %2232 = vmatpush.msrb.mxu1 %v2185_v57  ;;  %v2298_v57 = vld [vmem:[%s4277_s8 + $0x78] sm:$0xff] }
 0x736   :  { %2351 = vmatpush.msrb.mxu3 %v2314_v34  ;;  %2331 = vmatpush.msrb.mxu2 %v2298_v57  ;;  %v2299_v34 = vld [vmem:[%s4277_s8 + $0x80] sm:$0xff]  ;;  %v2285_v57 = vld [vmem:[%s4277_s8 + $0x10] sm:$0xff] }
 0x737   :  { %2233 = vmatpush.msrb.mxu1 %v2184_v44  ;;  %v2297_v44 = vld [vmem:[%s4277_s8 + $0x70] sm:$0xff] }
 0x738   :  { %2352 = vmatpush.msrb.mxu3 %v2313_v13  ;;  %2332 = vmatpush.msrb.mxu2 %v2297_v44  ;;  %v2318_v13 = vld [vmem:[%s4277_s8 + $0x118] sm:$0xff]  ;;  %v2316_v44 = vld [vmem:[%s4277_s8 + $0x108] sm:$0xff] }
 0x739   :  { %2234 = vmatpush.msrb.mxu1 %v2183_v15  ;;  %v2328_v15 = vld [vmem:[%s4277_s8 + $0x168] sm:$0xff] }
 0x73a   :  { %2353 = vmatpush.msrb.mxu3 %v2312_v54  ;;  %2333 = vmatpush.msrb.mxu2 %v2296_v11  ;;  %v2284_v54 = vld [vmem:[%s4277_s8 + $0x8] sm:$0xff]  ;;  %v2315_v11 = vld [vmem:[%s4277_s8 + $0x100] sm:$0xff] }
 0x73b   :  { %2235 = vmatpush.msrb.mxu1 %v2182_v41  ;;  %v2327_v41 = vld [vmem:[%s4277_s8 + $0x160] sm:$0xff] }
 0x73c   :  { %2354 = vmatpush.msrb.mxu3 %v2311_v37  ;;  %2334 = vmatpush.msrb.mxu2 %v2295_v38 }
 0x73d   :  { %2236 = vmatpush.msrb.mxu1 %v2181_v39  ;;  %v2326_v39 = vld [vmem:[%s4277_s8 + $0x158] sm:$0xff] }
 0x73e   :  { %2355 = vmatpush.msrb.mxu3 %v2310_v40  ;;  %2335 = vmatpush.msrb.mxu2 %v2294_v10 }
 0x73f   :  { %2237 = vmatpush.msrb.mxu1 %v2180_v35  ;;  %v2325_v35 = vld [vmem:[%s4277_s8 + $0x150] sm:$0xff] }
 0x740   :  { %2356 = vmatpush.msrb.mxu3 %v2309_v45  ;;  %2336 = vmatpush.msrb.mxu2 %v2293_v18  ;;  %v2254_v18 = vld [vmem:[%s4276_s7 + $0x4] sm:$0x3] }
 0x741   :  { %2238 = vmatpush.msrb.mxu1 %v2179_v61  ;;  %v2323_v61 = vld [vmem:[%s4277_s8 + $0x140] sm:$0xff] }
 0x742   :  { %2357 = vmatpush.msrb.mxu3 %v2308_v0  ;;  %2337 = vmatpush.msrb.mxu2 %v2292_v49 }
 0x743   :  { %2239 = vmatpush.msrb.mxu1 %v2178_v7  ;;  %v2289_v7 = vld [vmem:[%s4277_s8 + $0x30] sm:$0xff] }
 0x744   :  { %2338 = vmatpush.msrb.mxu2 %v2291_v5 }
 0x745   :  { %2240 = vmatpush.msrb.mxu1 %v2177_v26  ;;  %v2288_v26 = vld [vmem:[%s4277_s8 + $0x28] sm:$0xff] }
 0x747   :  { %2241 = vmatpush.msrb.mxu1 %v2176_v31  ;;  %v2287_v31 = vld [vmem:[%s4277_s8 + $0x20] sm:$0xff] }
 0x749   :  { %2242 = vmatpush.msrb.mxu1 %v2175_v32  ;;  %v2300_v32 = vld [vmem:[%s4277_s8 + $0x88] sm:$0xff] }
 0x74b   :  { %2243 = vmatpush.msrb.mxu1 %v2174_v9  ;;  %v2319_v9 = vld [vmem:[%s4277_s8 + $0x120] sm:$0xff] }
 0x74d   :  { %2244 = vmatpush.msrb.mxu1 %v2173_v33  ;;  %v2286_v33 = vld [vmem:[%s4277_s8 + $0x18] sm:$0xff] }
 0x7ab   :  { %v1951_v27 = vpop.f32.mrf.mxu1  ;;  %v1971_v51 = vpop.f32.mrf.mxu2 }
 0x7ac   :  { %v4043_v2 = vadd.f32 %v1951_v27, %v1739_v19  ;;  %v4048_v55 = vadd.f32 %v1971_v51, %v1740_v59  ;;  %v1991_v62 = vpop.f32.mrf.mxu3  ;;  %v2007_v19 = vperm.slane %v4029_v48, 1  ;;  %v2324_v27 = vld [vmem:[%s4277_s8 + $0x148] sm:$0xff]  ;;  %v2307_v51 = vld [vmem:[%s4277_s8 + $0xc0] sm:$0xff] }
 0x7ad   :  { %v4053_v4 = vadd.f32 %v1991_v62, %v1741_v47  ;;  %2358 = vmatpush.msrb.mxu3 %v2307_v51  ;;  %v2131_v62 = vperm.slane %v4029_v48, 3  ;;  %v2257_v51 = vperm.slane %v2254_v18, 0 }
 0x7ae   :  { %v1994_v21 = vmax.f32 %v4043_v2, 0.0  ;;  %v1995_v58 = vmax.f32 %v4048_v55, 0.0 }
 0x7af   :  { %v1996_v59 = vmax.f32 %v4053_v4, 0.0  ;;  %2359 = vmatpush.msrb.mxu3 %v2306_v60 }
 0x7b0   :  { %v2004_v46 = vmul.f32 %v2001_v17, %v1994_v21  ;;  %v2005_v47 = vmul.f32 %v2002_v52, %v1995_v58  ;;  %v2126_v17 = vperm.slane %v4034_v43, 2  ;;  %v2305_v52 = vld [vmem:[%s4277_s8 + $0xb0] sm:$0xff] }
 0x7b1   :  { %v2006_v1 = vmul.f32 %v2003_v56, %v1996_v59  ;;  %v2132_v56 = vperm.slane %v4034_v43, 3  ;;  %2360 = vmatpush.msrb.mxu3 %v2305_v52 }
 0x7b2   :  { %v2010_v25 = vadd.f32 %v2007_v19, %v2004_v46  ;;  %v2011_v42 = vadd.f32 %v2008_v30, %v2005_v47 }
 0x7b3   :  { %v2012_v6 = vadd.f32 %v2009_v14, %v2006_v1  ;;  %2361 = vmatpush.msrb.mxu3 %v2304_v8 }
 0x7b4   :  { %v2013_v3 = vmax.f32 %v2010_v25, 0.0  ;;  %v2014_v63 = vmax.f32 %v2011_v42, 0.0  ;;  %v2127_v25 = vperm.slane %v4039_v50, 2 }
 0x7b5   :  { %v2015_v53 = vmax.f32 %v2012_v6, 0.0  ;;  %2362 = vmatpush.msrb.mxu3 %v2303_v20 }
 0x7b6   :  { %2081 = vmatmul.f32.vlgmr.msra.gmra.mxu0 %v2013_v3  ;;  %2101 = vmatmul.f32.vlgmr.msra.gmra.mxu1 %v2014_v63  ;;  %v2133_v3 = vperm.slane %v4039_v50, 3  ;;  %v2290_v50 = vld [vmem:[%s4277_s8 + $0x38] sm:$0xff] }
 0x7b7   :  { %2121 = vmatmul.f32.vlgmr.msra.gmra.mxu2 %v2015_v53  ;;  %2371 = vmatpush.msra.mxu0 %v2330_v16  ;;  %v2317_v16 = vld [vmem:[%s4277_s8 + $0x110] sm:$0xff] }
 0x7b8   :  { %2339 = vmatpush.msrb.mxu2 %v2290_v50  ;;  %2363 = vmatpush.msrb.mxu3 %v2302_v24  ;;  %v2393_v50 = vld [vmem:[%s4278_s9 + $0x10] sm:$0x1f] }
 0x7b9   :  { %2372 = vmatpush.msra.mxu0 %v2329_v12  ;;  %v2283_v12 = vld [vmem:[%s4277_s8] sm:$0xff]  ;;  %v2396_v24 = vperm.slane %v2393_v50, 0 }
 0x7ba   :  { %2340 = vmatpush.msrb.mxu2 %v2289_v7  ;;  %2364 = vmatpush.msrb.mxu3 %v2301_v28 }
 0x7bb   :  { %2373 = vmatpush.msra.mxu0 %v2328_v15  ;;  %v2253_v15 = vld [vmem:[%s4276_s7 + $0x2] sm:$0x3] }
 0x7bc   :  { %2341 = vmatpush.msrb.mxu2 %v2288_v26  ;;  %2365 = vmatpush.msrb.mxu3 %v2300_v32  ;;  %v2262_v10 = vperm.slane %v2253_v15, 1 }
 0x7bd   :  { %2374 = vmatpush.msra.mxu0 %v2327_v41  ;;  %v2256_v41 = vperm.slane %v2253_v15, 0  ;;  %v2480_v15 = vperm.slane %v2393_v50, 4 }
 0x7be   :  { %2342 = vmatpush.msrb.mxu2 %v2287_v31  ;;  %2366 = vmatpush.msrb.mxu3 %v2299_v34  ;;  %v2402_v31 = vperm.slane %v2393_v50, 1 }
 0x7bf   :  { %2375 = vmatpush.msra.mxu0 %v2326_v39  ;;  %v2252_v39 = vld [vmem:[%s4276_s7] sm:$0x3] }
 0x7c0   :  { %2343 = vmatpush.msrb.mxu2 %v2286_v33  ;;  %v2261_v52 = vperm.slane %v2252_v39, 1 }
 0x7c1   :  { %2376 = vmatpush.msra.mxu0 %v2325_v35 }
 0x7c2   :  { %2344 = vmatpush.msrb.mxu2 %v2285_v57 }
 0x7c3   :  { %2377 = vmatpush.msra.mxu0 %v2324_v27  ;;  %v2255_v27 = vperm.slane %v2252_v39, 0 }
 0x7c4   :  { %2345 = vmatpush.msrb.mxu2 %v2284_v54 }
 0x7c5   :  { %2378 = vmatpush.msra.mxu0 %v2323_v61 }
 0x7c6   :  { %2346 = vmatpush.msrb.mxu2 %v2283_v12 }
 0x7c7   :  { %2379 = vmatpush.msra.mxu0 %v2322_v22 }
 0x7c9   :  { %2380 = vmatpush.msra.mxu0 %v2321_v36 }
 0x7cb   :  { %2381 = vmatpush.msra.mxu0 %v2320_v29 }
 0x7cd   :  { %2382 = vmatpush.msra.mxu0 %v2319_v9 }
 0x7cf   :  { %2383 = vmatpush.msra.mxu0 %v2318_v13  ;;  %v2411_v13 = vperm.slane %v2393_v50, 2 }
 0x7d1   :  { %2384 = vmatpush.msra.mxu0 %v2317_v16 }
 0x7d3   :  { %2385 = vmatpush.msra.mxu0 %v2316_v44 }
 0x7d5   :  { %2386 = vmatpush.msra.mxu0 %v2315_v11 }
 0x833   :  { %v2082_v19 = vpop.f32.mrf.mxu0  ;;  %v2102_v30 = vpop.f32.mrf.mxu1 }
 0x834   :  { %v2128_v14 = vmul.f32 %v2125_v23, %v2082_v19  ;;  %v2129_v46 = vmul.f32 %v2126_v17, %v2102_v30 }
 0x836   :  { %v2134_v47 = vadd.f32 %v2131_v62, %v2128_v14  ;;  %v2135_v1 = vadd.f32 %v2132_v56, %v2129_v46  ;;  %v2263_v56 = vperm.slane %v2254_v18, 1 }
 0x838   :  { %v2137_v42 = vmax.f32 %v2134_v47, 0.0  ;;  %v2138_v6 = vmax.f32 %v2135_v1, 0.0 }
 0x83a   :  { %v2122_v63 = vpop.f32.mrf.mxu2  ;;  %2205 = vmatmul.f32.vlgmr.msra.gmra.mxu3 %v2137_v42  ;;  %2225 = vmatmul.f32.vlgmr.msrb.gmra.mxu0 %v2138_v6  ;;  %v2899_v42 = vmov 0   ;;  %v2900_v6 = vmov 1  }
 0x83b   :  { %v2130_v48 = vmul.f32 %v2127_v25, %v2122_v63  ;;  %2595 = vset.pattern.permute.xlu2 %v2899_v42  ;;  %2593 = vset.pattern.permute.xlu0 %v2899_v42 }
 0x83c   :  { %2594 = vset.pattern.permute.xlu1 %v2900_v6 }
 0x83d   :  { %v2136_v53 = vadd.f32 %v2133_v3, %v2130_v48  ;;  %v4239_v3 = vld [vmem:[%s4278_s9 + $0x8] sm:$0x1f] }
 0x83e   :  { %v2395_v63 = vperm.slane %v4239_v3, 0  ;;  %v2401_v48 = vperm.slane %v4239_v3, 1 }
 0x83f   :  { %v2139_v43 = vmax.f32 %v2136_v53, 0.0 }
 0x841   :  { %2245 = vmatmul.f32.vlgmr.msrb.gmra.mxu1 %v2139_v43  ;;  %v2391_v43 = vld [vmem:[%s4278_s9] sm:$0x1f]  ;;  %s2902_s9 = smov 126  }
 0x842   :  { %v2394_v8 = vperm.slane %v2391_v43, 0  ;;  %v2400_v22 = vperm.slane %v2391_v43, 1  ;;  %v2409_v9 = vperm.slane %v2391_v43, 2  ;;  %v2442_v57 = vperm.slane %v2391_v43, 3 }
 0x843   :  { %v2478_v12 = vperm.slane %v2391_v43, 4 }
 0x8b7   :  { %v2226_v37 = vpop.f32.mrf.mxu0 }
 0x8b8   :  { %v2227_v38 = vadd.f32 %v2226_v37, %v1995_v58  ;;  %v2444_v37 = vperm.slane %v2393_v50, 3 }
 0x8ba   :  { %v2250_v40 = vmax.f32 %v2227_v38, 0.0 }
 0x8bc   :  { %v2259_v45 = vmul.f32 %v2256_v41, %v2250_v40  ;;  %v2274_v23 = vrot.slane %v2250_v40, 4 }
 0x8bd   :  { %v2206_v35 = vpop.f32.mrf.mxu3 }
 0x8be   :  { %v2265_v0 = vadd.f32 %v2262_v10, %v2259_v45  ;;  %v2207_v49 = vadd.f32 %v2206_v35, %v1994_v21  ;;  %v2246_v55 = vpop.f32.mrf.mxu1  ;;  %v2443_v45 = vperm.slane %v4239_v3, 3 }
 0x8bf   :  { %v2247_v58 = vadd.f32 %v2246_v55, %v1996_v59 }
 0x8c0   :  { %v2268_v60 = vmax.f32 %v2265_v0, 0.0  ;;  %v2249_v17 = vmax.f32 %v2207_v49, 0.0 }
 0x8c1   :  { %v2251_v62 = vmax.f32 %v2247_v58, 0.0 }
 0x8c2   :  { %v2258_v19 = vmul.f32 %v2255_v27, %v2249_v17  ;;  %v2281_v30 = vsel %vm2279_vm1, %v2268_v60, %v2274_v23  ;;  %v2273_v47 = vrot.slane %v2249_v17, 4  ;;  %v2479_v27 = vperm.slane %v4239_v3, 4 }
 0x8c3   :  { %v2260_v14 = vmul.f32 %v2257_v51, %v2251_v62  ;;  %2367 = vmatmul.f32.vlgmr.msrb.gmra.mxu3 %v2281_v30  ;;  %v2275_v4 = vrot.slane %v2251_v62, 4  ;;  %v2410_v60 = vperm.slane %v4239_v3, 2 }
 0x8c4   :  { %v2264_v2 = vadd.f32 %v2261_v52, %v2258_v19 }
 0x8c5   :  { %v2266_v21 = vadd.f32 %v2263_v56, %v2260_v14 }
 0x8c6   :  { %v2267_v46 = vmax.f32 %v2264_v2, 0.0 }
 0x8c7   :  { %v2269_v1 = vmax.f32 %v2266_v21, 0.0 }
 0x8c8   :  { %v2280_v59 = vsel %vm2279_vm1, %v2267_v46, %v2273_v47 }
 0x8c9   :  { %2347 = vmatmul.f32.vlgmr.msrb.gmra.mxu2 %v2280_v59  ;;  %v2282_v25 = vsel %vm2279_vm1, %v2269_v1, %v2275_v4 }
 0x8ca   :  { %2387 = vmatmul.f32.vlgmr.msra.gmra.mxu0 %v2282_v25 }
 0x946   :  { %v4243_v53 = vpop.f32.mrf.mxu3 }
 0x947   :  { %v2398_v5 = vmul.f32 %v2395_v63, %v4243_v53  ;;  %v2388_v26 = vpop.f32.mrf.mxu0 }
 0x948   :  { %v2399_v29 = vmul.f32 %v2396_v24, %v2388_v26 }
 0x949   :  { %v2404_v61 = vadd.f32 %v2401_v48, %v2398_v5 }
 0x94a   :  { %v2405_v33 = vadd.f32 %v2402_v31, %v2399_v29 }
 0x94b   :  { %v2407_v20 = vmax.f32 %v2404_v61, 0.0 }
 0x94c   :  { %v2348_v7 = vpop.f32.mrf.mxu2  ;;  %v2408_v34 = vmax.f32 %v2405_v33, 0.0 }
 0x94d   :  { %v2397_v36 = vmul.f32 %v2394_v8, %v2348_v7  ;;  %2434 = vperm.xlu2 %2595, %v2407_v20  }
 0x94f   :  { %v2403_v28 = vadd.f32 %v2400_v22, %v2397_v36 }
 0x951   :  { %v2406_v32 = vmax.f32 %v2403_v28, 0.0 }
 0x953   :  { %2467 = vperm.xlu1 %2594, %v2406_v32   ;;  %2429 = vperm.xlu0 %2593, %v2406_v32  }
 0x955   :  { %2415 = vrot.lane.b32.xlu2 %v2409_v9, %s2901_s25 }
 0x95b   :  { %2475 = vperm.xlu1 %2594, %v2408_v34   ;;  %2439 = vperm.xlu0 %2593, %v2408_v34  }
 0x963   :  { %2419 = vrot.lane.b32.xlu1 %v2411_v13, %s2901_s25  ;;  %2596 = vset.pattern.permute.xlu0 %v2900_v6 }
 0x964   :  { %2471 = vperm.xlu0 %2596, %v2407_v20  }
 0x9a7   :  { %v2435_v49 = vpop.permute.xlu2 %2434 }
 0x9a8   :  { %v2446_v55 = vmul.f32 %v2443_v45, %v2435_v49 }
 0x9aa   :  { %v2452_v23 = vrot.slane %v2446_v55, 4 }
 0x9af   :  { %v2416_v52 = vpop.permute.xlu2 %2415 }
 0x9b0   :  { %v2424_v56 = vadd.f32 %v2416_v52, %v2348_v7 }
 0x9c5   :  { %v2468_v16 = vpop.permute.xlu1 %2467  ;;  %v2430_v54 = vpop.permute.xlu0 %2429 }
 0x9c6   :  { %v2445_v44 = vmul.f32 %v2442_v57, %v2430_v54  ;;  %v2481_v38 = vmul.f32 %v2478_v12, %v2468_v16 }
 0x9c8   :  { %v2451_v11 = vrot.slane %v2445_v44, 4  ;;  %v2487_v18 = vrot.slane %v2481_v38, 4 }
 0x9ca   :  { %2454 = vrot.lane.b32.xlu2 %v2451_v11, %s2901_s25 }
 0x9cd   :  { %v2476_v41 = vpop.permute.xlu1 %2475  ;;  %v2440_v40 = vpop.permute.xlu0 %2439 }
 0x9ce   :  { %v2483_v10 = vmul.f32 %v2480_v15, %v2476_v41  ;;  %v2447_v39 = vmul.f32 %v2444_v37, %v2440_v40 }
 0x9d0   :  { %v2489_v35 = vrot.slane %v2483_v10, 4  ;;  %v2453_v0 = vrot.slane %v2447_v39, 4 }
 0x9d2   :  { %2494 = vrot.lane.b32.xlu0 %v2489_v35, %s2901_s25  ;;  %2490 = vrot.lane.b32.xlu2 %v2487_v18, %s2901_s25 }
 0x9d3   :  { %2458 = vrot.lane.b32.xlu1 %v2453_v0, %s2901_s25 }
 0x9d5   :  { %v2420_v2 = vpop.permute.xlu1 %2419 }
 0x9d6   :  { %v2472_v58 = vpop.permute.xlu0 %2471  ;;  %v2426_v21 = vadd.f32 %v2420_v2, %v2388_v26 }
 0x9d7   :  { %v2482_v51 = vmul.f32 %v2479_v27, %v2472_v58 }
 0x9d9   :  { %v2488_v17 = vrot.slane %v2482_v51, 4 }
 0x9da   :  { %2456 = vrot.lane.b32.xlu2 %v2452_v23, %s2901_s25 }
 0x9db   :  { %2417 = vrot.lane.b32.xlu1 %v2410_v60, %s2901_s25  ;;  %2492 = vrot.lane.b32.xlu0 %v2488_v17, %s2901_s25 }
 0xa24   :  { %v2455_v62 = vpop.permute.xlu2 %2454 }
 0xa25   :  { %v2463_v19 = vadd.f32 %v2455_v62, %v2424_v56 }
 0xa2c   :  { %v2491_v30 = vpop.permute.xlu2 %2490 }
 0xa2d   :  { %v2499_v14 = vadd.f32 %v2491_v30, %v2463_v19 }
 0xa2f   :  { %2503 = vrot.lane.b32.xlu1 %v2499_v14, %s2902_s9 }
 0xa34   :  { %v2457_v42 = vpop.permute.xlu2 %2456 }
 0xa44   :  { %v2495_v1 = vpop.permute.xlu0 %2494 }
 0xa45   :  { %v2459_v46 = vpop.permute.xlu1 %2458 }
 0xa46   :  { %v2465_v47 = vadd.f32 %v2459_v46, %v2426_v21 }
 0xa48   :  { %v2501_v4 = vadd.f32 %v2495_v1, %v2465_v47 }
 0xa4a   :  { %2507 = vrot.lane.b32.xlu2 %v2501_v4, %s2901_s25 }
 0xa4d   :  { %v2418_v59 = vpop.permute.xlu1 %2417  ;;  %v2493_v3 = vpop.permute.xlu0 %2492 }
 0xa4e   :  { %v2425_v25 = vadd.f32 %v2418_v59, %v4243_v53 }
 0xa50   :  { %v2464_v6 = vadd.f32 %v2457_v42, %v2425_v25 }
 0xa52   :  { %v2500_v63 = vadd.f32 %v2493_v3, %v2464_v6 }
 0xaa1   :  { %v2504_v48 = vpop.permute.xlu1 %2503 }
 0xaa2   :  { %v2511_v43 = vsel %vm2510_vm2, %v2504_v48, %v2500_v63 }
 0xaa4   :  { %v2508_v5 = vpop.permute.xlu2 %2507 }
 0xaa5   :  { %v2513_v8 = vsel %vm2512_vm3, %v2511_v43, %v2508_v5 }
 0xaa6   :  { %2515 = vst.msk [vmem:[#allocation8 - $0x4] sm:$0xf0] %vm2514_vm4, %v2513_v8 }
 0xaa7   :  { %2526 = dma.vmem_to_hbm [thread:$0]  %s2522_s4, 64, %s2524_s27, [#allocation4]  }
 0xaa8   :  { %2889 = dma.done.wait [#allocation4], 64  }
 0xaa9   :  { %2890 = vsyncadd [#allocation4], 4294967232 }
 0xaaa   :  { %2531 = vsyncpa [#allocation3], 1 }
 0xaab   :  { %2532 = vsyncpa [#allocation6], 1 }
 0xaac   :  { %2533 = vsyncpa [#allocation4], 1 }

</bundles_post_ra>
